<compile_context>
chip_gen: v7x
topology: tpu7x:2x2x1
jax: 0.10.0
libtpu: 0.0.40
codegen_flags: <defaults>
</compile_context>

<pallas_src>
import functools

import jax
import jax.numpy as jnp
from jax import lax
from jax.experimental import pallas as pl
from jax.experimental.pallas import tpu as pltpu

EPS = 1e-5
LANE = 128


def _round_up(x, m):
    return (x + m - 1) // m * m


def _vmem_capacity_bytes():
    try:
        return int(pltpu.get_tpu_info().vmem_capacity_bytes)
    except Exception:
        return 64 << 20          # conservative (v7x-sized) fallback


def _default_block_rows():
    # ~512 output pixels/tile already reaches ~85% of HBM roofline; use bigger
    # tiles on 128 MiB-VMEM chips (v5e/v6e), smaller on v7x (64 MiB).
    return 1024 if _vmem_capacity_bytes() >= (96 << 20) else 512


def _pick_row_tile(h, w, block_rows):
    """Rows per tile: ~block_rows output pixels, but never fewer than 8 rows
    (wide images would otherwise re-read every input row 3x via the halos)."""
    th = max(1, block_rows // max(w, 1))
    th = max(th, 8)
    return min(th, h)


# ---------------------------------------------------------------------------
# Kernel 1: (optional fused BN+ReLU of the input) -> conv3x3 pad=1
#           -> raw conv tile + per-channel (sum, centered M2) partial stats
# ---------------------------------------------------------------------------
def _conv_stats_kernel(scale_ref, shift_ref, w_ref, xc_ref, xp_ref, xn_ref,
                       y_ref, stats_ref, *, th, w, cin_p, cout_p, h_valid,
                       apply_input_act, ragged):
    j = pl.program_id(1)
    row0 = j * th
    cdt = y_ref.dtype                       # compute dtype (bf16 or f32)

    top = xp_ref[0]                         # (1,  w, cin_p) row above tile
    cur = xc_ref[0]                         # (th, w, cin_p)
    bot = xn_ref[0]                         # (1,  w, cin_p) row below tile
    s = jnp.concatenate([top, cur, bot], axis=0)      # (th+2, w, cin_p)

    if apply_input_act:                     # previous block's BN+ReLU, fused
        s = s.astype(jnp.float32) * scale_ref[...] + shift_ref[...]
        s = jnp.maximum(s, 0.0)
    s = s.astype(cdt)

    # One uniform row-validity mask covers the conv's top/bottom zero padding
    # AND the ragged rows beyond the true image height.
    rowids = row0 - 1 + lax.broadcasted_iota(jnp.int32, (th + 2, 1, 1), 0)
    valid = jnp.logical_and(rowids >= 0, rowids < h_valid)
    s = s * valid.astype(cdt)

    # dx taps as values: only two W-shifted copies (dx=0 is s itself).
    zcol = jnp.zeros((th + 2, 1, cin_p), cdt)
    t_m1 = jnp.concatenate([zcol, s[:, :w - 1, :]], axis=1)   # x[.., ow-1]
    t_p1 = jnp.concatenate([s[:, 1:, :], zcol], axis=1)       # x[.., ow+1]
    taps = (t_m1, s, t_p1)

    # Nine accumulating MXU dots (K = cin_p) into one f32 accumulator; no
    # halo / im2col scratch refs, no misaligned stores.
    acc = jnp.zeros((th * w, cout_p), jnp.float32)
    for dy in range(3):
        for dx in range(3):
            lhs = taps[dx][dy:dy + th].reshape(th * w, cin_p)
            acc = acc + jnp.dot(lhs, w_ref[dy * 3 + dx],
                                preferred_element_type=jnp.float32)
    # Conv bias omitted on purpose: training-mode BatchNorm subtracts the
    # per-channel mean, so a per-channel bias cancels exactly.

    y_ref[...] = acc.reshape(1, th, w, cout_p).astype(y_ref.dtype)

    # Per-tile BN partials: (sum, centered M2) -> numerically stable parallel
    # (Welford-style) combine in the wrapper.
    nvalid = jnp.minimum(row0 + th, h_valid) - row0
    count = (nvalid * w).astype(jnp.float32)
    if ragged:
        out_rows = row0 + (lax.broadcasted_iota(jnp.int32, (th * w, 1), 0) // w)
        omask = (out_rows < h_valid).astype(jnp.float32)
        acc_s = acc * omask
    else:
        omask = None
        acc_s = acc
    s1 = jnp.sum(acc_s, axis=0, keepdims=True)          # (1, cout_p)
    mean_t = s1 / count
    dev = acc - mean_t
    if ragged:
        dev = dev * omask
    m2 = jnp.sum(dev * dev, axis=0, keepdims=True)      # (1, cout_p)
    stats_ref[...] = jnp.concatenate([s1, m2], axis=0)[None]   # (1, 2, cout_p)


def _conv3x3_stats(x, w9, scale, shift, *, h_valid, th, apply_input_act):
    """x: (N, H_arr, W, Cin_p); w9: (9, Cin_p, Cout_p); scale/shift: (1, Cin_p).

    Returns (raw conv output (N, H_arr, W, Cout_p) in x.dtype,
             per-tile partial stats (N*T, 2, Cout_p) f32)."""
    n, h_arr, w, cin_p = x.shape
    cout_p = w9.shape[2]
    nt = h_arr // th
    ragged = h_arr > h_valid

    kernel = functools.partial(
        _conv_stats_kernel, th=th, w=w, cin_p=cin_p, cout_p=cout_p,
        h_valid=h_valid, apply_input_act=apply_input_act, ragged=ragged)

    in_specs = [
        pl.BlockSpec((1, cin_p), lambda i, j: (0, 0)),            # scale
        pl.BlockSpec((1, cin_p), lambda i, j: (0, 0)),            # shift
        pl.BlockSpec((9, cin_p, cout_p), lambda i, j: (0, 0, 0)),  # weights
        pl.BlockSpec((1, th, w, cin_p), lambda i, j: (i, j, 0, 0)),  # tile
        pl.BlockSpec((1, 1, w, cin_p),                            # halo above
                     lambda i, j: (i, jnp.maximum(j * th - 1, 0), 0, 0)),
        pl.BlockSpec((1, 1, w, cin_p),                            # halo below
                     lambda i, j: (i, jnp.minimum(j * th + th, h_arr - 1),
                                   0, 0)),
    ]
    out_specs = [
        pl.BlockSpec((1, th, w, cout_p), lambda i, j: (i, j, 0, 0)),
        pl.BlockSpec((1, 2, cout_p), lambda i, j: (i * nt + j, 0, 0)),
    ]

    bpe = jnp.dtype(x.dtype).itemsize
    flops = 2 * n * h_arr * w * 9 * cin_p * cout_p
    bytes_accessed = (n * h_arr * w * (cin_p + cout_p) * bpe
                      + 9 * cin_p * cout_p * bpe + n * nt * 2 * cout_p * 4)

    # VMEM budget: double-buffered tiles + halos + weights, plus the value
    # temporaries (row stack, two shifted taps, f32 accumulator).
    in_tile = th * w * cin_p * bpe
    out_tile = th * w * cout_p * bpe
    wbytes = 9 * cin_p * cout_p * bpe
    temps = 3 * (th + 2) * w * cin_p * bpe + 2 * th * w * cout_p * 4
    need = 2 * (in_tile + 2 * w * cin_p * bpe + out_tile) + 2 * wbytes + temps
    cap = _vmem_capacity_bytes()
    vmem_limit = int(min(int(0.75 * cap), max(32 << 20, 2 * need)))

    return pl.pallas_call(
        kernel,
        out_shape=(
            jax.ShapeDtypeStruct((n, h_arr, w, cout_p), x.dtype),
            jax.ShapeDtypeStruct((n * nt, 2, cout_p), jnp.float32),
        ),
        grid=(n, nt),
        in_specs=in_specs,
        out_specs=out_specs,
        compiler_params=pltpu.CompilerParams(
            dimension_semantics=("parallel", "parallel"),
            vmem_limit_bytes=vmem_limit),
        cost_estimate=pl.CostEstimate(flops=flops, transcendentals=0,
                                      bytes_accessed=bytes_accessed),
    )(scale, shift, w9, x, x, x)


# ---------------------------------------------------------------------------
# Kernel 2: elementwise BN(scale, shift) + ReLU  (final block output)
# ---------------------------------------------------------------------------
def _bn_relu_kernel(x_ref, scale_ref, shift_ref, o_ref):
    v = x_ref[...].astype(jnp.float32) * scale_ref[...] + shift_ref[...]
    o_ref[...] = jnp.maximum(v, 0.0).astype(o_ref.dtype)


def _bn_relu(x, scale, shift, *, th):
    n, h_arr, w, c = x.shape
    nt = h_arr // th
    # Pure HBM-bandwidth pass: use multi-tile blocks where the tile count
    # allows it (up to 4x the conv tile).
    k = 1
    for cand in (4, 3, 2):
        if nt % cand == 0:
            k = cand
            break
    th_bn, nt_bn = th * k, nt // k

    bpe = jnp.dtype(x.dtype).itemsize
    numel = n * h_arr * w * c
    cap = _vmem_capacity_bytes()
    need = 4 * th_bn * w * c * (bpe + 4)
    vmem_limit = int(min(int(0.75 * cap), max(32 << 20, need)))
    return pl.pallas_call(
        _bn_relu_kernel,
        out_shape=jax.ShapeDtypeStruct((n, h_arr, w, c), x.dtype),
        grid=(n, nt_bn),
        in_specs=[
            pl.BlockSpec((1, th_bn, w, c), lambda i, j: (i, j, 0, 0)),
            pl.BlockSpec((1, c), lambda i, j: (0, 0)),
            pl.BlockSpec((1, c), lambda i, j: (0, 0)),
        ],
        out_specs=pl.BlockSpec((1, th_bn, w, c), lambda i, j: (i, j, 0, 0)),
        compiler_params=pltpu.CompilerParams(
            dimension_semantics=("parallel", "parallel"),
            vmem_limit_bytes=vmem_limit),
        cost_estimate=pl.CostEstimate(flops=3 * numel, transcendentals=0,
                                      bytes_accessed=2 * numel * bpe),
    )(x, scale, shift)


# ---------------------------------------------------------------------------
# Wrapper glue
# ---------------------------------------------------------------------------
def _bn_scale_shift(stats, counts, gamma_p, beta_p):
    """stats: (T, 2, Cp) per-tile [sum, centered M2]; counts: (T,) f32.

    Parallel (Chan/Welford) combine -> BN affine (scale, shift) in f32."""
    c = counts[:, None]
    s = stats[:, 0, :]
    m2 = stats[:, 1, :]
    total = jnp.sum(counts)
    mean = jnp.sum(s, axis=0) / total
    mean_t = s / c
    var = (jnp.sum(m2, axis=0)
           + jnp.sum(c * (mean_t - mean) ** 2, axis=0)) / total   # biased
    rstd = lax.rsqrt(var + EPS)
    scale = gamma_p * rstd
    shift = beta_p - mean * scale
    return scale[None, :].astype(jnp.float32), shift[None, :].astype(jnp.float32)


def _prep_weight(w_oihw, cin_p, cout_p, dtype):
    """PyTorch (Cout,Cin,3,3) -> tap-major (9, Cin_p, Cout_p) matmul weights."""
    cout, cin = w_oihw.shape[0], w_oihw.shape[1]
    w_k = jnp.transpose(w_oihw, (2, 3, 1, 0))                 # (3,3,Cin,Cout)
    w_k = jnp.pad(w_k, ((0, 0), (0, 0),
                        (0, cin_p - cin), (0, cout_p - cout)))
    return w_k.reshape(9, cin_p, cout_p).astype(dtype)


def _pad_channels(v, cp):
    return jnp.pad(v.astype(jnp.float32), (0, cp - v.shape[0]))


def double_conv(x_nchw, params, *, block_rows=None,
                compute_dtype=jnp.bfloat16):
    """Pallas DoubleConv forward.  x: (N, Cin, H, W) -> (N, Cout, H, W)."""
    n, cin, h, w = x_nchw.shape
    cout = params["w1"].shape[0]
    cin_p = _round_up(cin, LANE)
    cout_p = _round_up(cout, LANE)

    if block_rows is None:
        block_rows = _default_block_rows()
    th = _pick_row_tile(h, w, block_rows)
    nt = -(-h // th)
    h_arr = nt * th

    # NCHW -> NHWC, channels padded to a lane-dense multiple of 128, H padded
    # (with zeros) to a multiple of the row tile.  Layout plumbing only.
    x = jnp.transpose(x_nchw, (0, 2, 3, 1))
    x = jnp.pad(x, ((0, 0), (0, h_arr - h), (0, 0), (0, cin_p - cin)))
    x = x.astype(compute_dtype)

    w1 = _prep_weight(params["w1"], cin_p, cout_p, compute_dtype)
    w2 = _prep_weight(params["w2"], cout_p, cout_p, compute_dtype)
    g1 = _pad_channels(params["g1"], cout_p)
    be1 = _pad_channels(params["be1"], cout_p)
    g2 = _pad_channels(params["g2"], cout_p)
    be2 = _pad_channels(params["be2"], cout_p)
    # params["b1"] / params["b2"] (conv biases) are unused: training-mode BN
    # subtracts the per-channel mean, so they cancel exactly.

    counts = jnp.tile(
        (jnp.minimum(th, h - jnp.arange(nt) * th) * w).astype(jnp.float32), n)

    ones = jnp.ones((1, cin_p), jnp.float32)
    zeros = jnp.zeros((1, cin_p), jnp.float32)

    # conv1 (raw) + batch stats
    y1, st1 = _conv3x3_stats(x, w1, ones, zeros,
                             h_valid=h, th=th, apply_input_act=False)
    sc1, sh1 = _bn_scale_shift(st1, counts, g1, be1)
    # BN1+ReLU fused into conv2's input path; conv2 (raw) + batch stats
    y2, st2 = _conv3x3_stats(y1, w2, sc1, sh1,
                             h_valid=h, th=th, apply_input_act=True)
    sc2, sh2 = _bn_scale_shift(st2, counts, g2, be2)
    # final BN2 + ReLU
    y = _bn_relu(y2, sc2, sh2, th=th)

    y = y[:, :h, :, :cout]
    return jnp.transpose(y, (0, 3, 1, 2))


# ---------------------------------------------------------------------------
# Deterministic parameters + pure-JAX reference (keeps the conv bias) to
# verify the kernel, including the bias-cancellation claim.
# ---------------------------------------------------------------------------
def make_params(key, in_channels, out_channels):
    k1, k2, k3, k4 = jax.random.split(key, 4)
    return {
        "w1": jax.random.normal(k1, (out_channels, in_channels, 3, 3),
                                jnp.float32) * 0.1,
        "b1": jax.random.normal(k3, (out_channels,), jnp.float32) * 0.1,
        "g1": jnp.ones((out_channels,), jnp.float32),
        "be1": jnp.zeros((out_channels,), jnp.float32),
        "w2": jax.random.normal(k2, (out_channels, out_channels, 3, 3),
                                jnp.float32) * 0.1,
        "b2": jax.random.normal(k4, (out_channels,), jnp.float32) * 0.1,
        "g2": jnp.ones((out_channels,), jnp.float32),
        "be2": jnp.zeros((out_channels,), jnp.float32),
    }


def ref_double_conv(x_nchw, params):
    def block(x, w_oihw, b, g, be):
        w = jnp.transpose(w_oihw, (2, 3, 1, 0))               # HWIO
        y = lax.conv_general_dilated(
            x, w, window_strides=(1, 1), padding="SAME",
            dimension_numbers=("NHWC", "HWIO", "NHWC"))
        y = y + b.reshape(1, 1, 1, -1)
        mean = y.mean(axis=(0, 1, 2), keepdims=True)
        var = ((y - mean) ** 2).mean(axis=(0, 1, 2), keepdims=True)
        y = (y - mean) / jnp.sqrt(var + EPS)
        y = y * g.reshape(1, 1, 1, -1) + be.reshape(1, 1, 1, -1)
        return jnp.maximum(y, 0.0)

    x = jnp.transpose(x_nchw, (0, 2, 3, 1))
    y = block(x, params["w1"], params["b1"], params["g1"], params["be1"])
    y = block(y, params["w2"], params["b2"], params["g2"], params["be2"])
    return jnp.transpose(y, (0, 3, 1, 2))


if __name__ == "__main__":
    key = jax.random.PRNGKey(0)
    kx, kp, kx2, kp2 = jax.random.split(key, 4)

    # ---- main shape ------------------------------------------------------
    N, Cin, Cout, H, W = 2, 4, 8, 16, 16
    x = jax.random.normal(kx, (N, Cin, H, W), jnp.float32)
    params = make_params(kp, Cin, Cout)
    ref = jax.block_until_ready(ref_double_conv(x, params))

    # exact-math check (f32 compute path)
    f32_fn = jax.jit(functools.partial(double_conv, compute_dtype=jnp.float32))
    out32 = jax.block_until_ready(f32_fn(x, params))
    assert out32.shape == (N, Cout, H, W), out32.shape
    err32 = float(jnp.max(jnp.abs(out32 - ref)))
    assert err32 < 2e-3, f"f32 max abs err {err32}"

    # default (bf16 MXU operands + bf16 HBM intermediates) performance path
    outbf = jax.block_until_ready(jax.jit(double_conv)(x, params))
    errbf = float(jnp.max(jnp.abs(outbf.astype(jnp.float32) - ref)))
    assert errbf < 2e-1, f"bf16 max abs err {errbf}"

    # ---- ragged-H shape (H not a multiple of the row tile) ---------------
    N2, C2i, C2o, H2, W2 = 1, 3, 8, 20, 16
    x2 = jax.random.normal(kx2, (N2, C2i, H2, W2), jnp.float32)
    params2 = make_params(kp2, C2i, C2o)
    ref2 = jax.block_until_ready(ref_double_conv(x2, params2))
    ragged_fn = jax.jit(functools.partial(double_conv,
                                          compute_dtype=jnp.float32,
                                          block_rows=128))   # -> th=8, nt=3
    out2 = jax.block_until_ready(ragged_fn(x2, params2))
    assert out2.shape == (N2, C2o, H2, W2), out2.shape
    err2 = float(jnp.max(jnp.abs(out2 - ref2)))
    assert err2 < 2e-3, f"ragged f32 max abs err {err2}"

    print("KERNEL_OK")
</pallas_src>

<mosaic_0001>
module attributes {stable_mosaic.version = 11 : i64} {
  func.func @_bn_relu_kernel(%arg0: i32, %arg1: i32, %arg2: memref<1x16x16x128xf32, #tpu.memory_space<vmem>>, %arg3: memref<1x128xf32, #tpu.memory_space<vmem>>, %arg4: memref<1x128xf32, #tpu.memory_space<vmem>>, %arg5: memref<1x16x16x128xf32, #tpu.memory_space<vmem>>) attributes {dimension_semantics = [#tpu.dimension_semantics<parallel>, #tpu.dimension_semantics<parallel>], iteration_bounds = array<i64: 2, 1>, scalar_prefetch = 0 : i64, scratch_operands = 0 : i64, tpu.core_type = #tpu.core_type<tc>, window_params = [{transform_indices = @transform_0, window_bounds = array<i64: 1, 16, 16, 128>}, {pipeline_mode = #tpu.pipeline_mode<synchronous>, transform_indices = @transform_1, window_bounds = array<i64: 1, 128>}, {pipeline_mode = #tpu.pipeline_mode<synchronous>, transform_indices = @transform_2, window_bounds = array<i64: 1, 128>}, {transform_indices = @transform_3, window_bounds = array<i64: 1, 16, 16, 128>}]} {
    %c0 = arith.constant 0 : index
    %c0_0 = arith.constant 0 : index
    %c0_1 = arith.constant 0 : index
    %c0_2 = arith.constant 0 : index
    %0 = vector.load %arg2[%c0, %c0_0, %c0_1, %c0_2] : memref<1x16x16x128xf32, #tpu.memory_space<vmem>>, vector<1x16x16x128xf32>
    %c0_3 = arith.constant 0 : index
    %c0_4 = arith.constant 0 : index
    %1 = vector.load %arg3[%c0_3, %c0_4] : memref<1x128xf32, #tpu.memory_space<vmem>>, vector<1x128xf32>
    %2 = vector.shape_cast %1 : vector<1x128xf32> to vector<1x1x1x128xf32>
    %3 = vector.broadcast %2 : vector<1x1x1x128xf32> to vector<1x16x16x128xf32>
    %4 = arith.mulf %0, %3 : vector<1x16x16x128xf32>
    %c0_5 = arith.constant 0 : index
    %c0_6 = arith.constant 0 : index
    %5 = vector.load %arg4[%c0_5, %c0_6] : memref<1x128xf32, #tpu.memory_space<vmem>>, vector<1x128xf32>
    %6 = vector.shape_cast %5 : vector<1x128xf32> to vector<1x1x1x128xf32>
    %7 = vector.broadcast %6 : vector<1x1x1x128xf32> to vector<1x16x16x128xf32>
    %8 = arith.addf %4, %7 : vector<1x16x16x128xf32>
    %cst = arith.constant 0.000000e+00 : f32
    %9 = vector.broadcast %cst : f32 to vector<1x16x16x128xf32>
    %10 = arith.maximumf %8, %9 : vector<1x16x16x128xf32>
    %c0_7 = arith.constant 0 : index
    %c0_8 = arith.constant 0 : index
    %c0_9 = arith.constant 0 : index
    %c0_10 = arith.constant 0 : index
    %11 = vector.load %arg5[%c0_7, %c0_8, %c0_9, %c0_10] : memref<1x16x16x128xf32, #tpu.memory_space<vmem>>, vector<1x16x16x128xf32>
    tpu.vector_store %arg5[%c0_7, %c0_8, %c0_9, %c0_10], %10 {strides = array<i32>} : memref<1x16x16x128xf32, #tpu.memory_space<vmem>>, vector<1x16x16x128xf32>,
    return
  }
  func.func @transform_0(%arg0: i32, %arg1: i32) -> (i32, i32, i32, i32) {
    %c0_i32 = arith.constant 0 : i32
    %c0_i32_0 = arith.constant 0 : i32
    %c0_i32_1 = arith.constant 0 : i32
    return %arg0, %arg1, %c0_i32, %c0_i32_0 : i32, i32, i32, i32
  }
  func.func @transform_1(%arg0: i32, %arg1: i32) -> (i32, i32) {
    %c0_i32 = arith.constant 0 : i32
    %c0_i32_0 = arith.constant 0 : i32
    %c0_i32_1 = arith.constant 0 : i32
    return %c0_i32, %c0_i32_0 : i32, i32
  }
  func.func @transform_2(%arg0: i32, %arg1: i32) -> (i32, i32) {
    %c0_i32 = arith.constant 0 : i32
    %c0_i32_0 = arith.constant 0 : i32
    %c0_i32_1 = arith.constant 0 : i32
    return %c0_i32, %c0_i32_0 : i32, i32
  }
  func.func @transform_3(%arg0: i32, %arg1: i32) -> (i32, i32, i32, i32) {
    %c0_i32 = arith.constant 0 : i32
    %c0_i32_0 = arith.constant 0 : i32
    %c0_i32_1 = arith.constant 0 : i32
    return %arg0, %arg1, %c0_i32, %c0_i32_0 : i32, i32, i32, i32
  }
}

module attributes {stable_mosaic.version = 11 : i64} {
  func.func @_conv_stats_kernel(%arg0: i32, %arg1: i32, %arg2: memref<1x128xf32, #tpu.memory_space<vmem>>, %arg3: memref<1x128xf32, #tpu.memory_space<vmem>>, %arg4: memref<9x128x128xf32, #tpu.memory_space<vmem>>, %arg5: memref<1x16x16x128xf32, #tpu.memory_space<vmem>>, %arg6: memref<1x1x16x128xf32, #tpu.memory_space<vmem>>, %arg7: memref<1x1x16x128xf32, #tpu.memory_space<vmem>>, %arg8: memref<1x16x16x128xf32, #tpu.memory_space<vmem>>, %arg9: memref<1x2x128xf32, #tpu.memory_space<vmem>>) attributes {dimension_semantics = [#tpu.dimension_semantics<parallel>, #tpu.dimension_semantics<parallel>], iteration_bounds = array<i64: 2, 1>, scalar_prefetch = 0 : i64, scratch_operands = 0 : i64, tpu.core_type = #tpu.core_type<tc>, window_params = [{pipeline_mode = #tpu.pipeline_mode<synchronous>, transform_indices = @transform_0, window_bounds = array<i64: 1, 128>}, {pipeline_mode = #tpu.pipeline_mode<synchronous>, transform_indices = @transform_1, window_bounds = array<i64: 1, 128>}, {pipeline_mode = #tpu.pipeline_mode<synchronous>, transform_indices = @transform_2, window_bounds = array<i64: 9, 128, 128>}, {transform_indices = @transform_3, window_bounds = array<i64: 1, 16, 16, 128>}, {transform_indices = @transform_4, window_bounds = array<i64: 1, 1, 16, 128>}, {transform_indices = @transform_5, window_bounds = array<i64: 1, 1, 16, 128>}, {transform_indices = @transform_6, window_bounds = array<i64: 1, 16, 16, 128>}, {transform_indices = @transform_7, window_bounds = array<i64: 1, 2, 128>}]} {
    %c16_i32 = arith.constant 16 : i32
    %0 = arith.muli %arg1, %c16_i32 : i32
    %c0 = arith.constant 0 : index
    %c0_0 = arith.constant 0 : index
    %c0_1 = arith.constant 0 : index
    %c0_2 = arith.constant 0 : index
    %1 = vector.load %arg6[%c0, %c0_0, %c0_1, %c0_2] : memref<1x1x16x128xf32, #tpu.memory_space<vmem>>, vector<1x1x16x128xf32>
    %2 = vector.shape_cast %1 : vector<1x1x16x128xf32> to vector<1x16x128xf32>
    %c0_3 = arith.constant 0 : index
    %c0_4 = arith.constant 0 : index
    %c0_5 = arith.constant 0 : index
    %c0_6 = arith.constant 0 : index
    %3 = vector.load %arg5[%c0_3, %c0_4, %c0_5, %c0_6] : memref<1x16x16x128xf32, #tpu.memory_space<vmem>>, vector<1x16x16x128xf32>
    %4 = vector.shape_cast %3 : vector<1x16x16x128xf32> to vector<16x16x128xf32>
    %c0_7 = arith.constant 0 : index
    %c0_8 = arith.constant 0 : index
    %c0_9 = arith.constant 0 : index
    %c0_10 = arith.constant 0 : index
    %5 = vector.load %arg7[%c0_7, %c0_8, %c0_9, %c0_10] : memref<1x1x16x128xf32, #tpu.memory_space<vmem>>, vector<1x1x16x128xf32>
    %6 = vector.shape_cast %5 : vector<1x1x16x128xf32> to vector<1x16x128xf32>
    %7 = tpu.concatenate %2, %4, %6 in 0 : vector<1x16x128xf32>, vector<16x16x128xf32>, vector<1x16x128xf32> -> vector<18x16x128xf32>
    %c1_i32 = arith.constant 1 : i32
    %8 = arith.subi %0, %c1_i32 : i32
    %9 = tpu.iota {dimensions = array<i32: 0>} : vector<18x1x1xi32>
    %10 = vector.broadcast %8 : i32 to vector<18x1x1xi32>
    %11 = arith.addi %10, %9 : vector<18x1x1xi32>
    %c0_i32 = arith.constant 0 : i32
    %12 = vector.broadcast %c0_i32 : i32 to vector<18x1x1xi32>
    %13 = arith.cmpi sge, %11, %12 : vector<18x1x1xi32>
    %c16_i32_11 = arith.constant 16 : i32
    %14 = vector.broadcast %c16_i32_11 : i32 to vector<18x1x1xi32>
    %15 = arith.cmpi slt, %11, %14 : vector<18x1x1xi32>
    %16 = arith.andi %13, %15 : vector<18x1x1xi1>
    %17 = arith.extui %16 : vector<18x1x1xi1> to vector<18x1x1xi32>
    %18 = arith.sitofp %17 : vector<18x1x1xi32> to vector<18x1x1xf32>
    %19 = vector.broadcast %18 : vector<18x1x1xf32> to vector<18x16x128xf32>
    %20 = arith.mulf %7, %19 : vector<18x16x128xf32>
    %cst = arith.constant 0.000000e+00 : f32
    %21 = vector.broadcast %cst : f32 to vector<18x1x128xf32>
    %22 = vector.extract_strided_slice %20 {offsets = [0, 0, 0], sizes = [18, 15, 128], strides = [1, 1, 1]} : vector<18x16x128xf32> to vector<18x15x128xf32>
    %23 = tpu.concatenate %21, %22 in 1 : vector<18x1x128xf32>, vector<18x15x128xf32> -> vector<18x16x128xf32>
    %24 = vector.extract_strided_slice %20 {offsets = [0, 1, 0], sizes = [18, 15, 128], strides = [1, 1, 1]} : vector<18x16x128xf32> to vector<18x15x128xf32>
    %25 = tpu.concatenate %24, %21 in 1 : vector<18x15x128xf32>, vector<18x1x128xf32> -> vector<18x16x128xf32>
    %cst_12 = arith.constant 0.000000e+00 : f32
    %26 = vector.broadcast %cst_12 : f32 to vector<256x128xf32>
    %27 = vector.extract_strided_slice %23 {offsets = [0, 0, 0], sizes = [16, 16, 128], strides = [1, 1, 1]} : vector<18x16x128xf32> to vector<16x16x128xf32>
    %28 = vector.shape_cast %27 : vector<16x16x128xf32> to vector<256x128xf32>
    %c0_13 = arith.constant 0 : index
    %c0_14 = arith.constant 0 : index
    %c0_15 = arith.constant 0 : index
    %29 = vector.load %arg4[%c0_13, %c0_14, %c0_15] : memref<9x128x128xf32, #tpu.memory_space<vmem>>, vector<1x128x128xf32>
    %30 = vector.shape_cast %29 : vector<1x128x128xf32> to vector<128x128xf32>
    %cst_16 = arith.constant dense<0.000000e+00> : vector<256x128xf32>
    %31 = tpu.matmul %28, %30, %cst_16 {dimension_numbers = #tpu.dot_dimension_numbers<[1], [0], [0], [1], [0, 0, 1, 1], [], []>} : vector<256x128xf32>, vector<128x128xf32>, vector<256x128xf32> -> vector<256x128xf32>
    %32 = arith.addf %26, %31 : vector<256x128xf32>
    %33 = vector.extract_strided_slice %20 {offsets = [0, 0, 0], sizes = [16, 16, 128], strides = [1, 1, 1]} : vector<18x16x128xf32> to vector<16x16x128xf32>
    %34 = vector.shape_cast %33 : vector<16x16x128xf32> to vector<256x128xf32>
    %c1 = arith.constant 1 : index
    %c0_17 = arith.constant 0 : index
    %c0_18 = arith.constant 0 : index
    %35 = vector.load %arg4[%c1, %c0_17, %c0_18] : memref<9x128x128xf32, #tpu.memory_space<vmem>>, vector<1x128x128xf32>
    %36 = vector.shape_cast %35 : vector<1x128x128xf32> to vector<128x128xf32>
    %cst_19 = arith.constant dense<0.000000e+00> : vector<256x128xf32>
    %37 = tpu.matmul %34, %36, %cst_19 {dimension_numbers = #tpu.dot_dimension_numbers<[1], [0], [0], [1], [0, 0, 1, 1], [], []>} : vector<256x128xf32>, vector<128x128xf32>, vector<256x128xf32> -> vector<256x128xf32>
    %38 = arith.addf %32, %37 : vector<256x128xf32>
    %39 = vector.extract_strided_slice %25 {offsets = [0, 0, 0], sizes = [16, 16, 128], strides = [1, 1, 1]} : vector<18x16x128xf32> to vector<16x16x128xf32>
    %40 = vector.shape_cast %39 : vector<16x16x128xf32> to vector<256x128xf32>
    %c2 = arith.constant 2 : index
    %c0_20 = arith.constant 0 : index
    %c0_21 = arith.constant 0 : index
    %41 = vector.load %arg4[%c2, %c0_20, %c0_21] : memref<9x128x128xf32, #tpu.memory_space<vmem>>, vector<1x128x128xf32>
    %42 = vector.shape_cast %41 : vector<1x128x128xf32> to vector<128x128xf32>
    %cst_22 = arith.constant dense<0.000000e+00> : vector<256x128xf32>
    %43 = tpu.matmul %40, %42, %cst_22 {dimension_numbers = #tpu.dot_dimension_numbers<[1], [0], [0], [1], [0, 0, 1, 1], [], []>} : vector<256x128xf32>, vector<128x128xf32>, vector<256x128xf32> -> vector<256x128xf32>
    %44 = arith.addf %38, %43 : vector<256x128xf32>
    %45 = vector.extract_strided_slice %23 {offsets = [1, 0, 0], sizes = [16, 16, 128], strides = [1, 1, 1]} : vector<18x16x128xf32> to vector<16x16x128xf32>
    %46 = vector.shape_cast %45 : vector<16x16x128xf32> to vector<256x128xf32>
    %c3 = arith.constant 3 : index
    %c0_23 = arith.constant 0 : index
    %c0_24 = arith.constant 0 : index
    %47 = vector.load %arg4[%c3, %c0_23, %c0_24] : memref<9x128x128xf32, #tpu.memory_space<vmem>>, vector<1x128x128xf32>
    %48 = vector.shape_cast %47 : vector<1x128x128xf32> to vector<128x128xf32>
    %cst_25 = arith.constant dense<0.000000e+00> : vector<256x128xf32>
    %49 = tpu.matmul %46, %48, %cst_25 {dimension_numbers = #tpu.dot_dimension_numbers<[1], [0], [0], [1], [0, 0, 1, 1], [], []>} : vector<256x128xf32>, vector<128x128xf32>, vector<256x128xf32> -> vector<256x128xf32>
    %50 = arith.addf %44, %49 : vector<256x128xf32>
    %51 = vector.extract_strided_slice %20 {offsets = [1, 0, 0], sizes = [16, 16, 128], strides = [1, 1, 1]} : vector<18x16x128xf32> to vector<16x16x128xf32>
    %52 = vector.shape_cast %51 : vector<16x16x128xf32> to vector<256x128xf32>
    %c4 = arith.constant 4 : index
    %c0_26 = arith.constant 0 : index
    %c0_27 = arith.constant 0 : index
    %53 = vector.load %arg4[%c4, %c0_26, %c0_27] : memref<9x128x128xf32, #tpu.memory_space<vmem>>, vector<1x128x128xf32>
    %54 = vector.shape_cast %53 : vector<1x128x128xf32> to vector<128x128xf32>
    %cst_28 = arith.constant dense<0.000000e+00> : vector<256x128xf32>
    %55 = tpu.matmul %52, %54, %cst_28 {dimension_numbers = #tpu.dot_dimension_numbers<[1], [0], [0], [1], [0, 0, 1, 1], [], []>} : vector<256x128xf32>, vector<128x128xf32>, vector<256x128xf32> -> vector<256x128xf32>
    %56 = arith.addf %50, %55 : vector<256x128xf32>
    %57 = vector.extract_strided_slice %25 {offsets = [1, 0, 0], sizes = [16, 16, 128], strides = [1, 1, 1]} : vector<18x16x128xf32> to vector<16x16x128xf32>
    %58 = vector.shape_cast %57 : vector<16x16x128xf32> to vector<256x128xf32>
    %c5 = arith.constant 5 : index
    %c0_29 = arith.constant 0 : index
    %c0_30 = arith.constant 0 : index
    %59 = vector.load %arg4[%c5, %c0_29, %c0_30] : memref<9x128x128xf32, #tpu.memory_space<vmem>>, vector<1x128x128xf32>
    %60 = vector.shape_cast %59 : vector<1x128x128xf32> to vector<128x128xf32>
    %cst_31 = arith.constant dense<0.000000e+00> : vector<256x128xf32>
    %61 = tpu.matmul %58, %60, %cst_31 {dimension_numbers = #tpu.dot_dimension_numbers<[1], [0], [0], [1], [0, 0, 1, 1], [], []>} : vector<256x128xf32>, vector<128x128xf32>, vector<256x128xf32> -> vector<256x128xf32>
    %62 = arith.addf %56, %61 : vector<256x128xf32>
    %63 = vector.extract_strided_slice %23 {offsets = [2, 0, 0], sizes = [16, 16, 128], strides = [1, 1, 1]} : vector<18x16x128xf32> to vector<16x16x128xf32>
    %64 = vector.shape_cast %63 : vector<16x16x128xf32> to vector<256x128xf32>
    %c6 = arith.constant 6 : index
    %c0_32 = arith.constant 0 : index
    %c0_33 = arith.constant 0 : index
    %65 = vector.load %arg4[%c6, %c0_32, %c0_33] : memref<9x128x128xf32, #tpu.memory_space<vmem>>, vector<1x128x128xf32>
    %66 = vector.shape_cast %65 : vector<1x128x128xf32> to vector<128x128xf32>
    %cst_34 = arith.constant dense<0.000000e+00> : vector<256x128xf32>
    %67 = tpu.matmul %64, %66, %cst_34 {dimension_numbers = #tpu.dot_dimension_numbers<[1], [0], [0], [1], [0, 0, 1, 1], [], []>} : vector<256x128xf32>, vector<128x128xf32>, vector<256x128xf32> -> vector<256x128xf32>
    %68 = arith.addf %62, %67 : vector<256x128xf32>
    %69 = vector.extract_strided_slice %20 {offsets = [2, 0, 0], sizes = [16, 16, 128], strides = [1, 1, 1]} : vector<18x16x128xf32> to vector<16x16x128xf32>
    %70 = vector.shape_cast %69 : vector<16x16x128xf32> to vector<256x128xf32>
    %c7 = arith.constant 7 : index
    %c0_35 = arith.constant 0 : index
    %c0_36 = arith.constant 0 : index
    %71 = vector.load %arg4[%c7, %c0_35, %c0_36] : memref<9x128x128xf32, #tpu.memory_space<vmem>>, vector<1x128x128xf32>
    %72 = vector.shape_cast %71 : vector<1x128x128xf32> to vector<128x128xf32>
    %cst_37 = arith.constant dense<0.000000e+00> : vector<256x128xf32>
    %73 = tpu.matmul %70, %72, %cst_37 {dimension_numbers = #tpu.dot_dimension_numbers<[1], [0], [0], [1], [0, 0, 1, 1], [], []>} : vector<256x128xf32>, vector<128x128xf32>, vector<256x128xf32> -> vector<256x128xf32>
    %74 = arith.addf %68, %73 : vector<256x128xf32>
    %75 = vector.extract_strided_slice %25 {offsets = [2, 0, 0], sizes = [16, 16, 128], strides = [1, 1, 1]} : vector<18x16x128xf32> to vector<16x16x128xf32>
    %76 = vector.shape_cast %75 : vector<16x16x128xf32> to vector<256x128xf32>
    %c8 = arith.constant 8 : index
    %c0_38 = arith.constant 0 : index
    %c0_39 = arith.constant 0 : index
    %77 = vector.load %arg4[%c8, %c0_38, %c0_39] : memref<9x128x128xf32, #tpu.memory_space<vmem>>, vector<1x128x128xf32>
    %78 = vector.shape_cast %77 : vector<1x128x128xf32> to vector<128x128xf32>
    %cst_40 = arith.constant dense<0.000000e+00> : vector<256x128xf32>
    %79 = tpu.matmul %76, %78, %cst_40 {dimension_numbers = #tpu.dot_dimension_numbers<[1], [0], [0], [1], [0, 0, 1, 1], [], []>} : vector<256x128xf32>, vector<128x128xf32>, vector<256x128xf32> -> vector<256x128xf32>
    %80 = arith.addf %74, %79 : vector<256x128xf32>
    %81 = vector.shape_cast %80 : vector<256x128xf32> to vector<1x16x16x128xf32>
    %c0_41 = arith.constant 0 : index
    %c0_42 = arith.constant 0 : index
    %c0_43 = arith.constant 0 : index
    %c0_44 = arith.constant 0 : index
    %82 = vector.load %arg8[%c0_41, %c0_42, %c0_43, %c0_44] : memref<1x16x16x128xf32, #tpu.memory_space<vmem>>, vector<1x16x16x128xf32>
    tpu.vector_store %arg8[%c0_41, %c0_42, %c0_43, %c0_44], %81 {strides = array<i32>} : memref<1x16x16x128xf32, #tpu.memory_space<vmem>>, vector<1x16x16x128xf32>,
    %c16_i32_45 = arith.constant 16 : i32
    %83 = arith.addi %0, %c16_i32_45 : i32
    %c16_i32_46 = arith.constant 16 : i32
    %84 = arith.minsi %83, %c16_i32_46 : i32
    %85 = arith.subi %84, %0 : i32
    %c16_i32_47 = arith.constant 16 : i32
    %86 = arith.muli %85, %c16_i32_47 : i32
    %87 = arith.sitofp %86 : i32 to f32
    %cst_48 = arith.constant dense<0.000000e+00> : vector<128xf32>
    %88 = vector.multi_reduction <add>, %80, %cst_48 [0] : vector<256x128xf32> to vector<128xf32>
    %89 = vector.shape_cast %88 : vector<128xf32> to vector<1x128xf32>
    %90 = vector.broadcast %87 : f32 to vector<1x128xf32>
    %91 = arith.divf %89, %90 : vector<1x128xf32>
    %92 = vector.broadcast %91 : vector<1x128xf32> to vector<256x128xf32>
    %93 = arith.subf %80, %92 : vector<256x128xf32>
    %94 = arith.mulf %93, %93 : vector<256x128xf32>
    %cst_49 = arith.constant dense<0.000000e+00> : vector<128xf32>
    %95 = vector.multi_reduction <add>, %94, %cst_49 [0] : vector<256x128xf32> to vector<128xf32>
    %96 = vector.shape_cast %95 : vector<128xf32> to vector<1x128xf32>
    %97 = tpu.concatenate %89, %96 in 0 : vector<1x128xf32>, vector<1x128xf32> -> vector<2x128xf32>
    %98 = vector.shape_cast %97 : vector<2x128xf32> to vector<1x2x128xf32>
    %c0_50 = arith.constant 0 : index
    %c0_51 = arith.constant 0 : index
    %c0_52 = arith.constant 0 : index
    %99 = vector.load %arg9[%c0_50, %c0_51, %c0_52] : memref<1x2x128xf32, #tpu.memory_space<vmem>>, vector<1x2x128xf32>
    tpu.vector_store %arg9[%c0_50, %c0_51, %c0_52], %98 {strides = array<i32>} : memref<1x2x128xf32, #tpu.memory_space<vmem>>, vector<1x2x128xf32>,
    return
  }
  func.func @transform_0(%arg0: i32, %arg1: i32) -> (i32, i32) {
    %c0_i32 = arith.constant 0 : i32
    %c0_i32_0 = arith.constant 0 : i32
    %c0_i32_1 = arith.constant 0 : i32
    return %c0_i32, %c0_i32_0 : i32, i32
  }
  func.func @transform_1(%arg0: i32, %arg1: i32) -> (i32, i32) {
    %c0_i32 = arith.constant 0 : i32
    %c0_i32_0 = arith.constant 0 : i32
    %c0_i32_1 = arith.constant 0 : i32
    return %c0_i32, %c0_i32_0 : i32, i32
  }
  func.func @transform_2(%arg0: i32, %arg1: i32) -> (i32, i32, i32) {
    %c0_i32 = arith.constant 0 : i32
    %c0_i32_0 = arith.constant 0 : i32
    %c0_i32_1 = arith.constant 0 : i32
    %c0_i32_2 = arith.constant 0 : i32
    return %c0_i32, %c0_i32_0, %c0_i32_1 : i32, i32, i32
  }
  func.func @transform_3(%arg0: i32, %arg1: i32) -> (i32, i32, i32, i32) {
    %c0_i32 = arith.constant 0 : i32
    %c0_i32_0 = arith.constant 0 : i32
    %c0_i32_1 = arith.constant 0 : i32
    return %arg0, %arg1, %c0_i32, %c0_i32_0 : i32, i32, i32, i32
  }
  func.func @transform_4(%arg0: i32, %arg1: i32) -> (i32, i32, i32, i32) {
    %c16_i32 = arith.constant 16 : i32
    %0 = arith.muli %arg1, %c16_i32 : i32
    %c1_i32 = arith.constant 1 : i32
    %1 = arith.subi %0, %c1_i32 : i32
    %c0_i32 = arith.constant 0 : i32
    %2 = arith.maxsi %1, %c0_i32 : i32
    %c0_i32_0 = arith.constant 0 : i32
    %c0_i32_1 = arith.constant 0 : i32
    %c0_i32_2 = arith.constant 0 : i32
    return %arg0, %2, %c0_i32_0, %c0_i32_1 : i32, i32, i32, i32
  }
  func.func @transform_5(%arg0: i32, %arg1: i32) -> (i32, i32, i32, i32) {
    %c16_i32 = arith.constant 16 : i32
    %0 = arith.muli %arg1, %c16_i32 : i32
    %c16_i32_0 = arith.constant 16 : i32
    %1 = arith.addi %0, %c16_i32_0 : i32
    %c15_i32 = arith.constant 15 : i32
    %2 = arith.minsi %1, %c15_i32 : i32
    %c0_i32 = arith.constant 0 : i32
    %c0_i32_1 = arith.constant 0 : i32
    %c0_i32_2 = arith.constant 0 : i32
    return %arg0, %2, %c0_i32, %c0_i32_1 : i32, i32, i32, i32
  }
  func.func @transform_6(%arg0: i32, %arg1: i32) -> (i32, i32, i32, i32) {
    %c0_i32 = arith.constant 0 : i32
    %c0_i32_0 = arith.constant 0 : i32
    %c0_i32_1 = arith.constant 0 : i32
    return %arg0, %arg1, %c0_i32, %c0_i32_0 : i32, i32, i32, i32
  }
  func.func @transform_7(%arg0: i32, %arg1: i32) -> (i32, i32, i32) {
    %c1_i32 = arith.constant 1 : i32
    %0 = arith.muli %arg0, %c1_i32 : i32
    %1 = arith.addi %0, %arg1 : i32
    %c0_i32 = arith.constant 0 : i32
    %c0_i32_0 = arith.constant 0 : i32
    %c0_i32_1 = arith.constant 0 : i32
    return %1, %c0_i32, %c0_i32_0 : i32, i32, i32
  }
}

module attributes {stable_mosaic.version = 11 : i64} {
  func.func @_conv_stats_kernel(%arg0: i32, %arg1: i32, %arg2: memref<1x128xf32, #tpu.memory_space<vmem>>, %arg3: memref<1x128xf32, #tpu.memory_space<vmem>>, %arg4: memref<9x128x128xf32, #tpu.memory_space<vmem>>, %arg5: memref<1x16x16x128xf32, #tpu.memory_space<vmem>>, %arg6: memref<1x1x16x128xf32, #tpu.memory_space<vmem>>, %arg7: memref<1x1x16x128xf32, #tpu.memory_space<vmem>>, %arg8: memref<1x16x16x128xf32, #tpu.memory_space<vmem>>, %arg9: memref<1x2x128xf32, #tpu.memory_space<vmem>>) attributes {dimension_semantics = [#tpu.dimension_semantics<parallel>, #tpu.dimension_semantics<parallel>], iteration_bounds = array<i64: 2, 1>, scalar_prefetch = 0 : i64, scratch_operands = 0 : i64, tpu.core_type = #tpu.core_type<tc>, window_params = [{pipeline_mode = #tpu.pipeline_mode<synchronous>, transform_indices = @transform_0, window_bounds = array<i64: 1, 128>}, {pipeline_mode = #tpu.pipeline_mode<synchronous>, transform_indices = @transform_1, window_bounds = array<i64: 1, 128>}, {pipeline_mode = #tpu.pipeline_mode<synchronous>, transform_indices = @transform_2, window_bounds = array<i64: 9, 128, 128>}, {transform_indices = @transform_3, window_bounds = array<i64: 1, 16, 16, 128>}, {transform_indices = @transform_4, window_bounds = array<i64: 1, 1, 16, 128>}, {transform_indices = @transform_5, window_bounds = array<i64: 1, 1, 16, 128>}, {transform_indices = @transform_6, window_bounds = array<i64: 1, 16, 16, 128>}, {transform_indices = @transform_7, window_bounds = array<i64: 1, 2, 128>}]} {
    %c16_i32 = arith.constant 16 : i32
    %0 = arith.muli %arg1, %c16_i32 : i32
    %c0 = arith.constant 0 : index
    %c0_0 = arith.constant 0 : index
    %c0_1 = arith.constant 0 : index
    %c0_2 = arith.constant 0 : index
    %1 = vector.load %arg6[%c0, %c0_0, %c0_1, %c0_2] : memref<1x1x16x128xf32, #tpu.memory_space<vmem>>, vector<1x1x16x128xf32>
    %2 = vector.shape_cast %1 : vector<1x1x16x128xf32> to vector<1x16x128xf32>
    %c0_3 = arith.constant 0 : index
    %c0_4 = arith.constant 0 : index
    %c0_5 = arith.constant 0 : index
    %c0_6 = arith.constant 0 : index
    %3 = vector.load %arg5[%c0_3, %c0_4, %c0_5, %c0_6] : memref<1x16x16x128xf32, #tpu.memory_space<vmem>>, vector<1x16x16x128xf32>
    %4 = vector.shape_cast %3 : vector<1x16x16x128xf32> to vector<16x16x128xf32>
    %c0_7 = arith.constant 0 : index
    %c0_8 = arith.constant 0 : index
    %c0_9 = arith.constant 0 : index
    %c0_10 = arith.constant 0 : index
    %5 = vector.load %arg7[%c0_7, %c0_8, %c0_9, %c0_10] : memref<1x1x16x128xf32, #tpu.memory_space<vmem>>, vector<1x1x16x128xf32>
    %6 = vector.shape_cast %5 : vector<1x1x16x128xf32> to vector<1x16x128xf32>
    %7 = tpu.concatenate %2, %4, %6 in 0 : vector<1x16x128xf32>, vector<16x16x128xf32>, vector<1x16x128xf32> -> vector<18x16x128xf32>
    %c0_11 = arith.constant 0 : index
    %c0_12 = arith.constant 0 : index
    %8 = vector.load %arg2[%c0_11, %c0_12] : memref<1x128xf32, #tpu.memory_space<vmem>>, vector<1x128xf32>
    %9 = vector.shape_cast %8 : vector<1x128xf32> to vector<1x1x128xf32>
    %10 = vector.broadcast %9 : vector<1x1x128xf32> to vector<18x16x128xf32>
    %11 = arith.mulf %7, %10 : vector<18x16x128xf32>
    %c0_13 = arith.constant 0 : index
    %c0_14 = arith.constant 0 : index
    %12 = vector.load %arg3[%c0_13, %c0_14] : memref<1x128xf32, #tpu.memory_space<vmem>>, vector<1x128xf32>
    %13 = vector.shape_cast %12 : vector<1x128xf32> to vector<1x1x128xf32>
    %14 = vector.broadcast %13 : vector<1x1x128xf32> to vector<18x16x128xf32>
    %15 = arith.addf %11, %14 : vector<18x16x128xf32>
    %cst = arith.constant 0.000000e+00 : f32
    %16 = vector.broadcast %cst : f32 to vector<18x16x128xf32>
    %17 = arith.maximumf %15, %16 : vector<18x16x128xf32>
    %c1_i32 = arith.constant 1 : i32
    %18 = arith.subi %0, %c1_i32 : i32
    %19 = tpu.iota {dimensions = array<i32: 0>} : vector<18x1x1xi32>
    %20 = vector.broadcast %18 : i32 to vector<18x1x1xi32>
    %21 = arith.addi %20, %19 : vector<18x1x1xi32>
    %c0_i32 = arith.constant 0 : i32
    %22 = vector.broadcast %c0_i32 : i32 to vector<18x1x1xi32>
    %23 = arith.cmpi sge, %21, %22 : vector<18x1x1xi32>
    %c16_i32_15 = arith.constant 16 : i32
    %24 = vector.broadcast %c16_i32_15 : i32 to vector<18x1x1xi32>
    %25 = arith.cmpi slt, %21, %24 : vector<18x1x1xi32>
    %26 = arith.andi %23, %25 : vector<18x1x1xi1>
    %27 = arith.extui %26 : vector<18x1x1xi1> to vector<18x1x1xi32>
    %28 = arith.sitofp %27 : vector<18x1x1xi32> to vector<18x1x1xf32>
    %29 = vector.broadcast %28 : vector<18x1x1xf32> to vector<18x16x128xf32>
    %30 = arith.mulf %17, %29 : vector<18x16x128xf32>
    %cst_16 = arith.constant 0.000000e+00 : f32
    %31 = vector.broadcast %cst_16 : f32 to vector<18x1x128xf32>
    %32 = vector.extract_strided_slice %30 {offsets = [0, 0, 0], sizes = [18, 15, 128], strides = [1, 1, 1]} : vector<18x16x128xf32> to vector<18x15x128xf32>
    %33 = tpu.concatenate %31, %32 in 1 : vector<18x1x128xf32>, vector<18x15x128xf32> -> vector<18x16x128xf32>
    %34 = vector.extract_strided_slice %30 {offsets = [0, 1, 0], sizes = [18, 15, 128], strides = [1, 1, 1]} : vector<18x16x128xf32> to vector<18x15x128xf32>
    %35 = tpu.concatenate %34, %31 in 1 : vector<18x15x128xf32>, vector<18x1x128xf32> -> vector<18x16x128xf32>
    %cst_17 = arith.constant 0.000000e+00 : f32
    %36 = vector.broadcast %cst_17 : f32 to vector<256x128xf32>
    %37 = vector.extract_strided_slice %33 {offsets = [0, 0, 0], sizes = [16, 16, 128], strides = [1, 1, 1]} : vector<18x16x128xf32> to vector<16x16x128xf32>
    %38 = vector.shape_cast %37 : vector<16x16x128xf32> to vector<256x128xf32>
    %c0_18 = arith.constant 0 : index
    %c0_19 = arith.constant 0 : index
    %c0_20 = arith.constant 0 : index
    %39 = vector.load %arg4[%c0_18, %c0_19, %c0_20] : memref<9x128x128xf32, #tpu.memory_space<vmem>>, vector<1x128x128xf32>
    %40 = vector.shape_cast %39 : vector<1x128x128xf32> to vector<128x128xf32>
    %cst_21 = arith.constant dense<0.000000e+00> : vector<256x128xf32>
    %41 = tpu.matmul %38, %40, %cst_21 {dimension_numbers = #tpu.dot_dimension_numbers<[1], [0], [0], [1], [0, 0, 1, 1], [], []>} : vector<256x128xf32>, vector<128x128xf32>, vector<256x128xf32> -> vector<256x128xf32>
    %42 = arith.addf %36, %41 : vector<256x128xf32>
    %43 = vector.extract_strided_slice %30 {offsets = [0, 0, 0], sizes = [16, 16, 128], strides = [1, 1, 1]} : vector<18x16x128xf32> to vector<16x16x128xf32>
    %44 = vector.shape_cast %43 : vector<16x16x128xf32> to vector<256x128xf32>
    %c1 = arith.constant 1 : index
    %c0_22 = arith.constant 0 : index
    %c0_23 = arith.constant 0 : index
    %45 = vector.load %arg4[%c1, %c0_22, %c0_23] : memref<9x128x128xf32, #tpu.memory_space<vmem>>, vector<1x128x128xf32>
    %46 = vector.shape_cast %45 : vector<1x128x128xf32> to vector<128x128xf32>
    %cst_24 = arith.constant dense<0.000000e+00> : vector<256x128xf32>
    %47 = tpu.matmul %44, %46, %cst_24 {dimension_numbers = #tpu.dot_dimension_numbers<[1], [0], [0], [1], [0, 0, 1, 1], [], []>} : vector<256x128xf32>, vector<128x128xf32>, vector<256x128xf32> -> vector<256x128xf32>
    %48 = arith.addf %42, %47 : vector<256x128xf32>
    %49 = vector.extract_strided_slice %35 {offsets = [0, 0, 0], sizes = [16, 16, 128], strides = [1, 1, 1]} : vector<18x16x128xf32> to vector<16x16x128xf32>
    %50 = vector.shape_cast %49 : vector<16x16x128xf32> to vector<256x128xf32>
    %c2 = arith.constant 2 : index
    %c0_25 = arith.constant 0 : index
    %c0_26 = arith.constant 0 : index
    %51 = vector.load %arg4[%c2, %c0_25, %c0_26] : memref<9x128x128xf32, #tpu.memory_space<vmem>>, vector<1x128x128xf32>
    %52 = vector.shape_cast %51 : vector<1x128x128xf32> to vector<128x128xf32>
    %cst_27 = arith.constant dense<0.000000e+00> : vector<256x128xf32>
    %53 = tpu.matmul %50, %52, %cst_27 {dimension_numbers = #tpu.dot_dimension_numbers<[1], [0], [0], [1], [0, 0, 1, 1], [], []>} : vector<256x128xf32>, vector<128x128xf32>, vector<256x128xf32> -> vector<256x128xf32>
    %54 = arith.addf %48, %53 : vector<256x128xf32>
    %55 = vector.extract_strided_slice %33 {offsets = [1, 0, 0], sizes = [16, 16, 128], strides = [1, 1, 1]} : vector<18x16x128xf32> to vector<16x16x128xf32>
    %56 = vector.shape_cast %55 : vector<16x16x128xf32> to vector<256x128xf32>
    %c3 = arith.constant 3 : index
    %c0_28 = arith.constant 0 : index
    %c0_29 = arith.constant 0 : index
    %57 = vector.load %arg4[%c3, %c0_28, %c0_29] : memref<9x128x128xf32, #tpu.memory_space<vmem>>, vector<1x128x128xf32>
    %58 = vector.shape_cast %57 : vector<1x128x128xf32> to vector<128x128xf32>
    %cst_30 = arith.constant dense<0.000000e+00> : vector<256x128xf32>
    %59 = tpu.matmul %56, %58, %cst_30 {dimension_numbers = #tpu.dot_dimension_numbers<[1], [0], [0], [1], [0, 0, 1, 1], [], []>} : vector<256x128xf32>, vector<128x128xf32>, vector<256x128xf32> -> vector<256x128xf32>
    %60 = arith.addf %54, %59 : vector<256x128xf32>
    %61 = vector.extract_strided_slice %30 {offsets = [1, 0, 0], sizes = [16, 16, 128], strides = [1, 1, 1]} : vector<18x16x128xf32> to vector<16x16x128xf32>
    %62 = vector.shape_cast %61 : vector<16x16x128xf32> to vector<256x128xf32>
    %c4 = arith.constant 4 : index
    %c0_31 = arith.constant 0 : index
    %c0_32 = arith.constant 0 : index
    %63 = vector.load %arg4[%c4, %c0_31, %c0_32] : memref<9x128x128xf32, #tpu.memory_space<vmem>>, vector<1x128x128xf32>
    %64 = vector.shape_cast %63 : vector<1x128x128xf32> to vector<128x128xf32>
    %cst_33 = arith.constant dense<0.000000e+00> : vector<256x128xf32>
    %65 = tpu.matmul %62, %64, %cst_33 {dimension_numbers = #tpu.dot_dimension_numbers<[1], [0], [0], [1], [0, 0, 1, 1], [], []>} : vector<256x128xf32>, vector<128x128xf32>, vector<256x128xf32> -> vector<256x128xf32>
    %66 = arith.addf %60, %65 : vector<256x128xf32>
    %67 = vector.extract_strided_slice %35 {offsets = [1, 0, 0], sizes = [16, 16, 128], strides = [1, 1, 1]} : vector<18x16x128xf32> to vector<16x16x128xf32>
    %68 = vector.shape_cast %67 : vector<16x16x128xf32> to vector<256x128xf32>
    %c5 = arith.constant 5 : index
    %c0_34 = arith.constant 0 : index
    %c0_35 = arith.constant 0 : index
    %69 = vector.load %arg4[%c5, %c0_34, %c0_35] : memref<9x128x128xf32, #tpu.memory_space<vmem>>, vector<1x128x128xf32>
    %70 = vector.shape_cast %69 : vector<1x128x128xf32> to vector<128x128xf32>
    %cst_36 = arith.constant dense<0.000000e+00> : vector<256x128xf32>
    %71 = tpu.matmul %68, %70, %cst_36 {dimension_numbers = #tpu.dot_dimension_numbers<[1], [0], [0], [1], [0, 0, 1, 1], [], []>} : vector<256x128xf32>, vector<128x128xf32>, vector<256x128xf32> -> vector<256x128xf32>
    %72 = arith.addf %66, %71 : vector<256x128xf32>
    %73 = vector.extract_strided_slice %33 {offsets = [2, 0, 0], sizes = [16, 16, 128], strides = [1, 1, 1]} : vector<18x16x128xf32> to vector<16x16x128xf32>
    %74 = vector.shape_cast %73 : vector<16x16x128xf32> to vector<256x128xf32>
    %c6 = arith.constant 6 : index
    %c0_37 = arith.constant 0 : index
    %c0_38 = arith.constant 0 : index
    %75 = vector.load %arg4[%c6, %c0_37, %c0_38] : memref<9x128x128xf32, #tpu.memory_space<vmem>>, vector<1x128x128xf32>
    %76 = vector.shape_cast %75 : vector<1x128x128xf32> to vector<128x128xf32>
    %cst_39 = arith.constant dense<0.000000e+00> : vector<256x128xf32>
    %77 = tpu.matmul %74, %76, %cst_39 {dimension_numbers = #tpu.dot_dimension_numbers<[1], [0], [0], [1], [0, 0, 1, 1], [], []>} : vector<256x128xf32>, vector<128x128xf32>, vector<256x128xf32> -> vector<256x128xf32>
    %78 = arith.addf %72, %77 : vector<256x128xf32>
    %79 = vector.extract_strided_slice %30 {offsets = [2, 0, 0], sizes = [16, 16, 128], strides = [1, 1, 1]} : vector<18x16x128xf32> to vector<16x16x128xf32>
    %80 = vector.shape_cast %79 : vector<16x16x128xf32> to vector<256x128xf32>
    %c7 = arith.constant 7 : index
    %c0_40 = arith.constant 0 : index
    %c0_41 = arith.constant 0 : index
    %81 = vector.load %arg4[%c7, %c0_40, %c0_41] : memref<9x128x128xf32, #tpu.memory_space<vmem>>, vector<1x128x128xf32>
    %82 = vector.shape_cast %81 : vector<1x128x128xf32> to vector<128x128xf32>
    %cst_42 = arith.constant dense<0.000000e+00> : vector<256x128xf32>
    %83 = tpu.matmul %80, %82, %cst_42 {dimension_numbers = #tpu.dot_dimension_numbers<[1], [0], [0], [1], [0, 0, 1, 1], [], []>} : vector<256x128xf32>, vector<128x128xf32>, vector<256x128xf32> -> vector<256x128xf32>
    %84 = arith.addf %78, %83 : vector<256x128xf32>
    %85 = vector.extract_strided_slice %35 {offsets = [2, 0, 0], sizes = [16, 16, 128], strides = [1, 1, 1]} : vector<18x16x128xf32> to vector<16x16x128xf32>
    %86 = vector.shape_cast %85 : vector<16x16x128xf32> to vector<256x128xf32>
    %c8 = arith.constant 8 : index
    %c0_43 = arith.constant 0 : index
    %c0_44 = arith.constant 0 : index
    %87 = vector.load %arg4[%c8, %c0_43, %c0_44] : memref<9x128x128xf32, #tpu.memory_space<vmem>>, vector<1x128x128xf32>
    %88 = vector.shape_cast %87 : vector<1x128x128xf32> to vector<128x128xf32>
    %cst_45 = arith.constant dense<0.000000e+00> : vector<256x128xf32>
    %89 = tpu.matmul %86, %88, %cst_45 {dimension_numbers = #tpu.dot_dimension_numbers<[1], [0], [0], [1], [0, 0, 1, 1], [], []>} : vector<256x128xf32>, vector<128x128xf32>, vector<256x128xf32> -> vector<256x128xf32>
    %90 = arith.addf %84, %89 : vector<256x128xf32>
    %91 = vector.shape_cast %90 : vector<256x128xf32> to vector<1x16x16x128xf32>
    %c0_46 = arith.constant 0 : index
    %c0_47 = arith.constant 0 : index
    %c0_48 = arith.constant 0 : index
    %c0_49 = arith.constant 0 : index
    %92 = vector.load %arg8[%c0_46, %c0_47, %c0_48, %c0_49] : memref<1x16x16x128xf32, #tpu.memory_space<vmem>>, vector<1x16x16x128xf32>
    tpu.vector_store %arg8[%c0_46, %c0_47, %c0_48, %c0_49], %91 {strides = array<i32>} : memref<1x16x16x128xf32, #tpu.memory_space<vmem>>, vector<1x16x16x128xf32>,
    %c16_i32_50 = arith.constant 16 : i32
    %93 = arith.addi %0, %c16_i32_50 : i32
    %c16_i32_51 = arith.constant 16 : i32
    %94 = arith.minsi %93, %c16_i32_51 : i32
    %95 = arith.subi %94, %0 : i32
    %c16_i32_52 = arith.constant 16 : i32
    %96 = arith.muli %95, %c16_i32_52 : i32
    %97 = arith.sitofp %96 : i32 to f32
    %cst_53 = arith.constant dense<0.000000e+00> : vector<128xf32>
    %98 = vector.multi_reduction <add>, %90, %cst_53 [0] : vector<256x128xf32> to vector<128xf32>
    %99 = vector.shape_cast %98 : vector<128xf32> to vector<1x128xf32>
    %100 = vector.broadcast %97 : f32 to vector<1x128xf32>
    %101 = arith.divf %99, %100 : vector<1x128xf32>
    %102 = vector.broadcast %101 : vector<1x128xf32> to vector<256x128xf32>
    %103 = arith.subf %90, %102 : vector<256x128xf32>
    %104 = arith.mulf %103, %103 : vector<256x128xf32>
    %cst_54 = arith.constant dense<0.000000e+00> : vector<128xf32>
    %105 = vector.multi_reduction <add>, %104, %cst_54 [0] : vector<256x128xf32> to vector<128xf32>
    %106 = vector.shape_cast %105 : vector<128xf32> to vector<1x128xf32>
    %107 = tpu.concatenate %99, %106 in 0 : vector<1x128xf32>, vector<1x128xf32> -> vector<2x128xf32>
    %108 = vector.shape_cast %107 : vector<2x128xf32> to vector<1x2x128xf32>
    %c0_55 = arith.constant 0 : index
    %c0_56 = arith.constant 0 : index
    %c0_57 = arith.constant 0 : index
    %109 = vector.load %arg9[%c0_55, %c0_56, %c0_57] : memref<1x2x128xf32, #tpu.memory_space<vmem>>, vector<1x2x128xf32>
    tpu.vector_store %arg9[%c0_55, %c0_56, %c0_57], %108 {strides = array<i32>} : memref<1x2x128xf32, #tpu.memory_space<vmem>>, vector<1x2x128xf32>,
    return
  }
  func.func @transform_0(%arg0: i32, %arg1: i32) -> (i32, i32) {
    %c0_i32 = arith.constant 0 : i32
    %c0_i32_0 = arith.constant 0 : i32
    %c0_i32_1 = arith.constant 0 : i32
    return %c0_i32, %c0_i32_0 : i32, i32
  }
  func.func @transform_1(%arg0: i32, %arg1: i32) -> (i32, i32) {
    %c0_i32 = arith.constant 0 : i32
    %c0_i32_0 = arith.constant 0 : i32
    %c0_i32_1 = arith.constant 0 : i32
    return %c0_i32, %c0_i32_0 : i32, i32
  }
  func.func @transform_2(%arg0: i32, %arg1: i32) -> (i32, i32, i32) {
    %c0_i32 = arith.constant 0 : i32
    %c0_i32_0 = arith.constant 0 : i32
    %c0_i32_1 = arith.constant 0 : i32
    %c0_i32_2 = arith.constant 0 : i32
    return %c0_i32, %c0_i32_0, %c0_i32_1 : i32, i32, i32
  }
  func.func @transform_3(%arg0: i32, %arg1: i32) -> (i32, i32, i32, i32) {
    %c0_i32 = arith.constant 0 : i32
    %c0_i32_0 = arith.constant 0 : i32
    %c0_i32_1 = arith.constant 0 : i32
    return %arg0, %arg1, %c0_i32, %c0_i32_0 : i32, i32, i32, i32
  }
  func.func @transform_4(%arg0: i32, %arg1: i32) -> (i32, i32, i32, i32) {
    %c16_i32 = arith.constant 16 : i32
    %0 = arith.muli %arg1, %c16_i32 : i32
    %c1_i32 = arith.constant 1 : i32
    %1 = arith.subi %0, %c1_i32 : i32
    %c0_i32 = arith.constant 0 : i32
    %2 = arith.maxsi %1, %c0_i32 : i32
    %c0_i32_0 = arith.constant 0 : i32
    %c0_i32_1 = arith.constant 0 : i32
    %c0_i32_2 = arith.constant 0 : i32
    return %arg0, %2, %c0_i32_0, %c0_i32_1 : i32, i32, i32, i32
  }
  func.func @transform_5(%arg0: i32, %arg1: i32) -> (i32, i32, i32, i32) {
    %c16_i32 = arith.constant 16 : i32
    %0 = arith.muli %arg1, %c16_i32 : i32
    %c16_i32_0 = arith.constant 16 : i32
    %1 = arith.addi %0, %c16_i32_0 : i32
    %c15_i32 = arith.constant 15 : i32
    %2 = arith.minsi %1, %c15_i32 : i32
    %c0_i32 = arith.constant 0 : i32
    %c0_i32_1 = arith.constant 0 : i32
    %c0_i32_2 = arith.constant 0 : i32
    return %arg0, %2, %c0_i32, %c0_i32_1 : i32, i32, i32, i32
  }
  func.func @transform_6(%arg0: i32, %arg1: i32) -> (i32, i32, i32, i32) {
    %c0_i32 = arith.constant 0 : i32
    %c0_i32_0 = arith.constant 0 : i32
    %c0_i32_1 = arith.constant 0 : i32
    return %arg0, %arg1, %c0_i32, %c0_i32_0 : i32, i32, i32, i32
  }
  func.func @transform_7(%arg0: i32, %arg1: i32) -> (i32, i32, i32) {
    %c1_i32 = arith.constant 1 : i32
    %0 = arith.muli %arg0, %c1_i32 : i32
    %1 = arith.addi %0, %arg1 : i32
    %c0_i32 = arith.constant 0 : i32
    %c0_i32_0 = arith.constant 0 : i32
    %c0_i32_1 = arith.constant 0 : i32
    return %1, %c0_i32, %c0_i32_0 : i32, i32, i32
  }
}

</mosaic_0001>

<bundles_post_ra>
// kernel: double_conv.5
= control target key start
LH: loop header
LB: loop body
LE: loop exit
PB: predicated region body
PF: predicated region fallthrough
CT: control target
= control target key end

     0   :  { %s568_s12 = smov 0   ;;  %s570_s13 = smov 0   ;;  %s743_s0 = inlined_call_operand.vmem [shape: f32[2,16,16,128], index: 0, kind: input, shape index: {}]   ;;  %s744_s1 = inlined_call_operand.vmem [shape: f32[1,128], index: 1, kind: input, shape index: {}]   ;;  %s745_s2 = inlined_call_operand.vmem [shape: f32[1,128], index: 2, kind: input, shape index: {}]   ;;  %s746_s3 = inlined_call_operand.vmem [shape: f32[2,16,16,128], index: 3, kind: output, shape index: {}]  }
   0x1   :  { %s572_s14 = smov 0  }
   0x2 LB: > { %s25_s15 = sadd.s32 1, %s542_s13  ;;  %p489_p0 = scmp.ge.s32.totalorder %s546_s14, 1  ;;  %s546_s14 = sphi %s572_s14, %s13_s14   ;;  %s542_s13 = sphi %s570_s13, %s748_s13   ;;  %s538_s12 = sphi %s568_s12, %s747_s12  }
   0x3   : > { %p27_p1 = scmp.ge.s32.totalorder %s25_s15, 2  ;;  %p159_p2 = scmp.lt.s32.totalorder %s546_s14, 3 }
   0x5   : > { %s750_s15 = smov (%p27_p1, %s25_s15), 0  ;;  %p160_p3 = pnand %p489_p0, %p159_p2 }
   0x6   : > { %p194_p4 = scmp.lt.s32.totalorder (!%p160_p3), %s538_s12, 1  ;;  %v589_v0 = vld [vmem:[%s744_s1] ss:$0 sm:$0xff] (!%p160_p3) }
   0x7   : > { %163 = sbr.rel (%p160_p3) target bundleno = 47 (0x2f), region = 32  ;;  %v599_v1 = vld [vmem:[%s745_s2] ss:$0 sm:$0xff] (!%p160_p3) }
   0xe   : > { %s752_s12 = smov (!%p194_p4, %s538_s12), 1 }
   0xf   : > { %s498_s16 = sshll.u32 %s752_s12, 8 }
  0x10   : > { %s594_s21 = scalar_lea.vmem %s743_s0, %s498_s16  ;;  %s622_s26 = scalar_lea.vmem %s746_s3, %s498_s16 }
  0x11   : > { %v215_v2 = vld [vmem:[%s594_s21] sm:$0xff]  ;;  %v216_v3 = vld [vmem:[%s594_s21 + $0x8] sm:$0xff]  ;;  %v217_v4 = vld [vmem:[%s594_s21 + $0x10] sm:$0xff] }
  0x12   : > { %v254_v5 = vmul.f32 %v589_v0, %v215_v2  ;;  %v255_v6 = vmul.f32 %v589_v0, %v216_v3  ;;  %v256_v7 = vmul.f32 %v589_v0, %v217_v4  ;;  %v218_v8 = vld [vmem:[%s594_s21 + $0x18] sm:$0xff]  ;;  %v219_v9 = vld [vmem:[%s594_s21 + $0x20] sm:$0xff]  ;;  %v220_v10 = vld [vmem:[%s594_s21 + $0x28] sm:$0xff] }
  0x13   : > { %v257_v11 = vmul.f32 %v589_v0, %v218_v8  ;;  %v258_v12 = vmul.f32 %v589_v0, %v219_v9  ;;  %v259_v13 = vmul.f32 %v589_v0, %v220_v10  ;;  %v221_v14 = vld [vmem:[%s594_s21 + $0x30] sm:$0xff]  ;;  %v222_v15 = vld [vmem:[%s594_s21 + $0x38] sm:$0xff]  ;;  %v223_v24 = vld [vmem:[%s594_s21 + $0x40] sm:$0xff] }
  0x14   : > { %v293_v16 = vadd.f32 %v599_v1, %v254_v5  ;;  %v294_v17 = vadd.f32 %v599_v1, %v255_v6  ;;  %v295_v18 = vadd.f32 %v599_v1, %v256_v7  ;;  %v260_v19 = vmul.f32 %v589_v0, %v221_v14  ;;  %v224_v25 = vld [vmem:[%s594_s21 + $0x48] sm:$0xff]  ;;  %v225_v26 = vld [vmem:[%s594_s21 + $0x50] sm:$0xff]  ;;  %v226_v31 = vld [vmem:[%s594_s21 + $0x58] sm:$0xff] }
  0x15   : > { %v296_v20 = vadd.f32 %v599_v1, %v257_v11  ;;  %v297_v21 = vadd.f32 %v599_v1, %v258_v12  ;;  %v298_v22 = vadd.f32 %v599_v1, %v259_v13  ;;  %v261_v23 = vmul.f32 %v589_v0, %v222_v15  ;;  %v227_v32 = vld [vmem:[%s594_s21 + $0x60] sm:$0xff]  ;;  %v228_v33 = vld [vmem:[%s594_s21 + $0x68] sm:$0xff]  ;;  %v229_v38 = vld [vmem:[%s594_s21 + $0x70] sm:$0xff] }
  0x16   : > { %v325_v27 = vmax.f32 %v293_v16, 0.0  ;;  %v326_v28 = vmax.f32 %v294_v17, 0.0  ;;  %v327_v29 = vmax.f32 %v295_v18, 0.0  ;;  %v299_v30 = vadd.f32 %v599_v1, %v260_v19  ;;  %v230_v43 = vld [vmem:[%s594_s21 + $0x78] sm:$0xff]  ;;  %v231_v56 = vld [vmem:[%s594_s21 + $0x80] sm:$0xff]  ;;  %v232_v57 = vld [vmem:[%s594_s21 + $0x88] sm:$0xff] }
  0x17   : > { %v328_v34 = vmax.f32 %v296_v20, 0.0  ;;  %v329_v35 = vmax.f32 %v297_v21, 0.0  ;;  %v330_v36 = vmax.f32 %v298_v22, 0.0  ;;  %v300_v37 = vadd.f32 %v599_v1, %v261_v23  ;;  %v233_v58 = vld [vmem:[%s594_s21 + $0x90] sm:$0xff]  ;;  %v234_v63 = vld [vmem:[%s594_s21 + $0x98] sm:$0xff]  ;;  %v235_v2 = vld [vmem:[%s594_s21 + $0xa0] sm:$0xff] }
  0x18   : > { %357 = vst [vmem:[%s622_s26] sm:$0xff] %v325_v27  ;;  %358 = vst [vmem:[%s622_s26 + $0x8] sm:$0xff] %v326_v28  ;;  %v331_v39 = vmax.f32 %v299_v30, 0.0  ;;  %v262_v40 = vmul.f32 %v589_v0, %v223_v24  ;;  %v263_v41 = vmul.f32 %v589_v0, %v224_v25  ;;  %v264_v42 = vmul.f32 %v589_v0, %v225_v26  ;;  %v236_v3 = vld [vmem:[%s594_s21 + $0xa8] sm:$0xff]  ;;  %v237_v8 = vld [vmem:[%s594_s21 + $0xb0] sm:$0xff] }
  0x19   : > { %359 = vst [vmem:[%s622_s26 + $0x10] sm:$0xff] %v327_v29  ;;  %360 = vst [vmem:[%s622_s26 + $0x18] sm:$0xff] %v328_v34  ;;  %v332_v44 = vmax.f32 %v300_v37, 0.0  ;;  %v265_v45 = vmul.f32 %v589_v0, %v226_v31  ;;  %v266_v46 = vmul.f32 %v589_v0, %v227_v32  ;;  %v267_v47 = vmul.f32 %v589_v0, %v228_v33  ;;  %v238_v13 = vld [vmem:[%s594_s21 + $0xb8] sm:$0xff]  ;;  %v239_v26 = vld [vmem:[%s594_s21 + $0xc0] sm:$0xff] }
  0x1a   : > { %361 = vst [vmem:[%s622_s26 + $0x20] sm:$0xff] %v329_v35  ;;  %362 = vst [vmem:[%s622_s26 + $0x28] sm:$0xff] %v330_v36  ;;  %v301_v48 = vadd.f32 %v599_v1, %v262_v40  ;;  %v302_v49 = vadd.f32 %v599_v1, %v263_v41  ;;  %v303_v50 = vadd.f32 %v599_v1, %v264_v42  ;;  %v240_v27 = vld [vmem:[%s594_s21 + $0xc8] sm:$0xff]  ;;  %v241_v28 = vld [vmem:[%s594_s21 + $0xd0] sm:$0xff] }
  0x1b   : > { %363 = vst [vmem:[%s622_s26 + $0x30] sm:$0xff] %v331_v39  ;;  %v268_v51 = vmul.f32 %v589_v0, %v229_v38  ;;  %364 = vst [vmem:[%s622_s26 + $0x38] sm:$0xff] %v332_v44  ;;  %v304_v52 = vadd.f32 %v599_v1, %v265_v45  ;;  %v305_v53 = vadd.f32 %v599_v1, %v266_v46  ;;  %v242_v33 = vld [vmem:[%s594_s21 + $0xd8] sm:$0xff]  ;;  %v243_v34 = vld [vmem:[%s594_s21 + $0xe0] sm:$0xff] }
  0x1c   : > { %v306_v54 = vadd.f32 %v599_v1, %v267_v47  ;;  %v269_v55 = vmul.f32 %v589_v0, %v230_v43  ;;  %v333_v59 = vmax.f32 %v301_v48, 0.0  ;;  %v334_v60 = vmax.f32 %v302_v49, 0.0  ;;  %v244_v35 = vld [vmem:[%s594_s21 + $0xe8] sm:$0xff]  ;;  %v245_v40 = vld [vmem:[%s594_s21 + $0xf0] sm:$0xff]  ;;  %v246_v45 = vld [vmem:[%s594_s21 + $0xf8] sm:$0xff] }
  0x1d   : > { %v335_v61 = vmax.f32 %v303_v50, 0.0  ;;  %v307_v62 = vadd.f32 %v599_v1, %v268_v51  ;;  %v336_v4 = vmax.f32 %v304_v52, 0.0  ;;  %v337_v5 = vmax.f32 %v305_v53, 0.0 }
  0x1e   : > { %v338_v6 = vmax.f32 %v306_v54, 0.0  ;;  %v308_v7 = vadd.f32 %v599_v1, %v269_v55  ;;  %365 = vst [vmem:[%s622_s26 + $0x40] sm:$0xff] %v333_v59  ;;  %366 = vst [vmem:[%s622_s26 + $0x48] sm:$0xff] %v334_v60  ;;  %v270_v10 = vmul.f32 %v589_v0, %v231_v56  ;;  %v271_v11 = vmul.f32 %v589_v0, %v232_v57 }
  0x1f   : > { %367 = vst [vmem:[%s622_s26 + $0x50] sm:$0xff] %v335_v61  ;;  %v339_v9 = vmax.f32 %v307_v62, 0.0  ;;  %v272_v12 = vmul.f32 %v589_v0, %v233_v58  ;;  %368 = vst [vmem:[%s622_s26 + $0x58] sm:$0xff] %v336_v4  ;;  %v273_v15 = vmul.f32 %v589_v0, %v234_v63  ;;  %v274_v16 = vmul.f32 %v589_v0, %v235_v2 }
  0x20   : > { %369 = vst [vmem:[%s622_s26 + $0x60] sm:$0xff] %v337_v5  ;;  %370 = vst [vmem:[%s622_s26 + $0x68] sm:$0xff] %v338_v6  ;;  %v340_v14 = vmax.f32 %v308_v7, 0.0  ;;  %v275_v17 = vmul.f32 %v589_v0, %v236_v3  ;;  %v309_v18 = vadd.f32 %v599_v1, %v270_v10  ;;  %v310_v19 = vadd.f32 %v599_v1, %v271_v11 }
  0x21   : > { %371 = vst [vmem:[%s622_s26 + $0x70] sm:$0xff] %v339_v9  ;;  %v311_v20 = vadd.f32 %v599_v1, %v272_v12  ;;  %v276_v21 = vmul.f32 %v589_v0, %v237_v8  ;;  %v312_v22 = vadd.f32 %v599_v1, %v273_v15  ;;  %v313_v23 = vadd.f32 %v599_v1, %v274_v16 }
  0x22   : > { %372 = vst [vmem:[%s622_s26 + $0x78] sm:$0xff] %v340_v14  ;;  %v314_v24 = vadd.f32 %v599_v1, %v275_v17  ;;  %v277_v25 = vmul.f32 %v589_v0, %v238_v13  ;;  %v341_v29 = vmax.f32 %v309_v18, 0.0  ;;  %v342_v30 = vmax.f32 %v310_v19, 0.0 }
  0x23   : > { %v343_v31 = vmax.f32 %v311_v20, 0.0  ;;  %v315_v32 = vadd.f32 %v599_v1, %v276_v21  ;;  %v344_v36 = vmax.f32 %v312_v22, 0.0  ;;  %v345_v37 = vmax.f32 %v313_v23, 0.0 }
  0x24   : > { %v346_v38 = vmax.f32 %v314_v24, 0.0  ;;  %v316_v39 = vadd.f32 %v599_v1, %v277_v25  ;;  %373 = vst [vmem:[%s622_s26 + $0x80] sm:$0xff] %v341_v29  ;;  %374 = vst [vmem:[%s622_s26 + $0x88] sm:$0xff] %v342_v30  ;;  %v278_v42 = vmul.f32 %v589_v0, %v239_v26  ;;  %v279_v43 = vmul.f32 %v589_v0, %v240_v27 }
  0x25   : > { %375 = vst [vmem:[%s622_s26 + $0x90] sm:$0xff] %v343_v31  ;;  %v347_v41 = vmax.f32 %v315_v32, 0.0  ;;  %v280_v44 = vmul.f32 %v589_v0, %v241_v28  ;;  %376 = vst [vmem:[%s622_s26 + $0x98] sm:$0xff] %v344_v36  ;;  %v281_v47 = vmul.f32 %v589_v0, %v242_v33  ;;  %v282_v48 = vmul.f32 %v589_v0, %v243_v34 }
  0x26   : > { %377 = vst [vmem:[%s622_s26 + $0xa0] sm:$0xff] %v345_v37  ;;  %378 = vst [vmem:[%s622_s26 + $0xa8] sm:$0xff] %v346_v38  ;;  %v348_v46 = vmax.f32 %v316_v39, 0.0  ;;  %v283_v49 = vmul.f32 %v589_v0, %v244_v35  ;;  %v317_v50 = vadd.f32 %v599_v1, %v278_v42  ;;  %v318_v51 = vadd.f32 %v599_v1, %v279_v43 }
  0x27   : > { %379 = vst [vmem:[%s622_s26 + $0xb0] sm:$0xff] %v347_v41  ;;  %v319_v52 = vadd.f32 %v599_v1, %v280_v44  ;;  %v284_v53 = vmul.f32 %v589_v0, %v245_v40  ;;  %v320_v54 = vadd.f32 %v599_v1, %v281_v47  ;;  %v321_v55 = vadd.f32 %v599_v1, %v282_v48 }
  0x28   : > { %380 = vst [vmem:[%s622_s26 + $0xb8] sm:$0xff] %v348_v46  ;;  %v322_v56 = vadd.f32 %v599_v1, %v283_v49  ;;  %v285_v57 = vmul.f32 %v589_v0, %v246_v45  ;;  %v349_v58 = vmax.f32 %v317_v50, 0.0  ;;  %v350_v59 = vmax.f32 %v318_v51, 0.0 }
  0x29   : > { %v351_v60 = vmax.f32 %v319_v52, 0.0  ;;  %v323_v61 = vadd.f32 %v599_v1, %v284_v53  ;;  %v352_v62 = vmax.f32 %v320_v54, 0.0  ;;  %v353_v63 = vmax.f32 %v321_v55, 0.0 }
  0x2a   : > { %v354_v2 = vmax.f32 %v322_v56, 0.0  ;;  %v324_v3 = vadd.f32 %v599_v1, %v285_v57  ;;  %381 = vst [vmem:[%s622_s26 + $0xc0] sm:$0xff] %v349_v58  ;;  %382 = vst [vmem:[%s622_s26 + $0xc8] sm:$0xff] %v350_v59 }
  0x2b   : > { %383 = vst [vmem:[%s622_s26 + $0xd0] sm:$0xff] %v351_v60  ;;  %v355_v4 = vmax.f32 %v323_v61, 0.0  ;;  %384 = vst [vmem:[%s622_s26 + $0xd8] sm:$0xff] %v352_v62 }
  0x2c   : > { %385 = vst [vmem:[%s622_s26 + $0xe0] sm:$0xff] %v353_v63  ;;  %386 = vst [vmem:[%s622_s26 + $0xe8] sm:$0xff] %v354_v2  ;;  %v356_v0 = vmax.f32 %v324_v3, 0.0 }
  0x2d   : > { %387 = vst [vmem:[%s622_s26 + $0xf0] sm:$0xff] %v355_v4 }
  0x2e   : > { %388 = vst [vmem:[%s622_s26 + $0xf8] sm:$0xff] %v356_v0 }
  0x2f PF: > { %s13_s14 = sadd.s32 1, %s546_s14   ;;  %s747_s12 = smov %s542_s13 }
  0x30   : > { %p10_p5 = scmp.ge.s32.totalorder %s13_s14, 4   ;;  %s748_s13 = smov %s750_s15 }
  0x32   :  { %12 = sbr.rel (!%p10_p5) target bundleno = 2 (0x2), region = 62 }

// kernel: double_conv.3
= control target key start
LH: loop header
LB: loop body
LE: loop exit
PB: predicated region body
PF: predicated region fallthrough
CT: control target
= control target key end

     0   :  { %s5761_s23 = smov 0   ;;  %s5763_s1 = smov 0   ;;  %s7356_s0 = inlined_call_operand.vmem [shape: f32[1,128], index: 0, kind: input, shape index: {}]   ;;  %s7357_s1 = inlined_call_operand.vmem [shape: f32[1,128], index: 1, kind: input, shape index: {}]   ;;  %s7358_s2 = inlined_call_operand.vmem [shape: f32[9,128,128], index: 2, kind: input, shape index: {}]   ;;  %s7359_s3 = inlined_call_operand.vmem [shape: f32[2,16,16,128], index: 3, kind: input, shape index: {}, may-alias: {3,4,5}]   ;;  %s7360_s4 = inlined_call_operand.vmem [shape: f32[2,16,16,128], index: 4, kind: input, shape index: {}, may-alias: {3,4,5}]   ;;  %s7361_s5 = inlined_call_operand.vmem [shape: f32[2,16,16,128], index: 5, kind: input, shape index: {}, may-alias: {3,4,5}]   ;;  %s7362_s6 = inlined_call_operand.vmem [shape: f32[2,16,16,128], index: 6, kind: output, shape index: {0}]   ;;  %s7363_s7 = inlined_call_operand.vmem [shape: f32[2,2,128], index: 7, kind: output, shape index: {1}]  }
   0x1   :  { %s5765_s24 = smov 0  }
   0x2 LB: > { %s30_s25 = sadd.s32 1, %s5715_s1  ;;  %p3657_p0 = scmp.ge.s32.totalorder %s5719_s24, 1  ;;  %s5719_s24 = sphi %s5765_s24, %s18_s24   ;;  %s5715_s1 = sphi %s5763_s1, %s7537_s1   ;;  %s5711_s23 = sphi %s5761_s23, %s7536_s23  }
   0x3   : > { %p32_p1 = scmp.ge.s32.totalorder %s30_s25, 2  ;;  %p328_p2 = scmp.lt.s32.totalorder %s5719_s24, 3 }
   0x5   : > { %s7539_s25 = smov (%p32_p1, %s30_s25), 0  ;;  %p329_p3 = pnand %p3657_p0, %p328_p2 }
   0x7   : > { %332 = sbr.rel (%p329_p3) target bundleno = 647 (0x287), region = 44 }
   0xe   : > { %v3667_v0 = vld [vmem:[%s7358_s2 + $0x80] sm:$0xff]  ;;  %v3668_v1 = vld [vmem:[%s7358_s2 + $0x88] sm:$0xff]  ;;  %p402_p4 = scmp.lt.s32.totalorder %s5711_s23, 1  ;;  %v3669_v5 = vld [vmem:[%s7358_s2 + $0x90] sm:$0xff]  ;;  %vm790_vm0 = vcmask 1046528   ;;  %vm681_vm1 = vcmask 1040384  }
   0xf   : > { %v3795_v2 = vld [vmem:[%s7358_s2 + $0x200] sm:$0xff]  ;;  %v5099_v3 = vpack.c.bf16 %v3668_v1, %v3667_v0  ;;  %v3796_v4 = vld [vmem:[%s7358_s2 + $0x208] sm:$0xff]  ;;  %v3670_v6 = vld [vmem:[%s7358_s2 + $0x98] sm:$0xff] }
  0x10   : > { %v5797_v7 = vpack.c.bf16 %v3796_v4, %v3795_v2  ;;  %v5103_v8 = vpack.c.bf16 %v3670_v6, %v3669_v5  ;;  %v3797_v9 = vld [vmem:[%s7358_s2 + $0x210] sm:$0xff]  ;;  %v3798_v10 = vld [vmem:[%s7358_s2 + $0x218] sm:$0xff]  ;;  %v3671_v11 = vld [vmem:[%s7358_s2 + $0xa0] sm:$0xff]  ;;  %s7541_s23 = smov (!%p402_p4, %s5711_s23), 1 }
  0x11   : > { %5100 = vmatprep.subr.bf16.mxu1 %v5099_v3  ;;  %v5810_v12 = vpack.c.bf16 %v3798_v10, %v3797_v9  ;;  %v3672_v13 = vld [vmem:[%s7358_s2 + $0xa8] sm:$0xff]  ;;  %v3799_v14 = vld [vmem:[%s7358_s2 + $0x220] sm:$0xff]  ;;  %s5823_s29 = sshll.u32 %s7541_s23, 8  ;;  %v3673_v18 = vld [vmem:[%s7358_s2 + $0xb0] sm:$0xff] }
  0x12   : > { %7434 = vst [vmem:[#allocation2_spill] sm:$0xff] %v5797_v7  ;;  %v3800_v15 = vld [vmem:[%s7358_s2 + $0x228] sm:$0xff]  ;;  %5228 = vmatprep.subr.bf16.mxu0 %v5797_v7  ;;  %5102 = vmatpush3.bf16.msra.mxu1 %v5099_v3  ;;  %v5107_v16 = vpack.c.bf16 %v3672_v13, %v3671_v11  ;;  %v3674_v19 = vld [vmem:[%s7358_s2 + $0xb8] sm:$0xff]  ;;  %v3801_v20 = vld [vmem:[%s7358_s2 + $0x230] sm:$0xff]  ;;  %s5845_s17 = scalar_lea.vmem %s7360_s4, %s5823_s29  ;;  %s5851_s20 = scalar_lea.vmem %s7359_s3, %s5823_s29 }
  0x13   : > { %7435 = vst [vmem:[#allocation3_spill] sm:$0xff] %v5810_v12  ;;  %5230 = vmatpush3.bf16.msra.mxu0 %v5797_v7  ;;  %5104 = vmatprep.subr.bf16.mxu1 %v5103_v8  ;;  %v5827_v17 = vpack.c.bf16 %v3800_v15, %v3799_v14  ;;  %v3802_v21 = vld [vmem:[%s7358_s2 + $0x238] sm:$0xff]  ;;  %v5111_v22 = vpack.c.bf16 %v3674_v19, %v3673_v18  ;;  %v3675_v24 = vld [vmem:[%s7358_s2 + $0xc0] sm:$0xff]  ;;  %v3676_v25 = vld [vmem:[%s7358_s2 + $0xc8] sm:$0xff]  ;;  %s3944_s9 = sadd.s32 240, %s5823_s29  ;;  %s7110_s16 = scalar_lea.vmem %s7362_s6, %s5823_s29 }
  0x14   : > { %5232 = vmatprep.subr.bf16.mxu0 %v5810_v12  ;;  %v5855_v23 = vpack.c.bf16 %v3802_v21, %v3801_v20  ;;  %v464_v26 = vld [vmem:[%s5845_s17] sm:$0xff]  ;;  %v3804_v28 = vld [vmem:[%s7358_s2 + $0x248] sm:$0xff]  ;;  %v5115_v31 = vpack.c.bf16 %v3676_v25, %v3675_v24  ;;  %v3677_v33 = vld [vmem:[%s7358_s2 + $0xd0] sm:$0xff]  ;;  %s441_s12 = scalar_lea.vmem %s7361_s5, %s3944_s9  ;;  %s3666_s29 = sshll.u32 %s7541_s23, 1 }
  0x15   : > { %7436 = vst [vmem:[#allocation4_spill] sm:$0xff] %v5827_v17  ;;  %v3803_v27 = vld [vmem:[%s7358_s2 + $0x240] sm:$0xff]  ;;  %v5870_v29 = vmul.f32 0.0, %v464_v26  ;;  %v3678_v34 = vld [vmem:[%s7358_s2 + $0xd8] sm:$0xff]  ;;  %v3805_v35 = vld [vmem:[%s7358_s2 + $0x250] sm:$0xff]  ;;  %s461_s21 = scalar_lea.vmem %s7363_s7, %s3666_s29 }
  0x16   : > { %5106 = vmatpush3.bf16.msra.mxu1 %v5103_v8  ;;  %7437 = vst [vmem:[#allocation5_spill] sm:$0xff] %v5855_v23  ;;  %v5873_v30 = vld [vmem:[%s5851_s20] sm:$0xff]  ;;  %v5878_v32 = vpack.c.bf16 %v3804_v28, %v3803_v27  ;;  %v3806_v36 = vld [vmem:[%s7358_s2 + $0x258] sm:$0xff]  ;;  %v5119_v37 = vpack.c.bf16 %v3678_v34, %v3677_v33  ;;  %v3680_v40 = vld [vmem:[%s7358_s2 + $0xe8] sm:$0xff] }
  0x17   : > { %5234 = vmatpush3.bf16.msra.mxu0 %v5810_v12  ;;  %5108 = vmatprep.subr.bf16.mxu1 %v5107_v16  ;;  %v5895_v38 = vpack.c.bf16 %v3806_v36, %v3805_v35  ;;  %v3679_v39 = vld [vmem:[%s7358_s2 + $0xe0] sm:$0xff]  ;;  %v3808_v42 = vld [vmem:[%s7358_s2 + $0x268] sm:$0xff]  ;;  %v3681_v45 = vld [vmem:[%s7358_s2 + $0xf0] sm:$0xff]  ;;  %v791_v25 = vrot.slane %v5870_v29, 1 }
  0x18   : > { %5236 = vmatprep.subr.bf16.mxu0 %v5827_v17  ;;  %4731 = vmatprep.mubr.f32.mxu0 %v5873_v30  ;;  %7438 = vst [vmem:[#allocation6_spill] sm:$0xff] %v5878_v32  ;;  %v3807_v41 = vld [vmem:[%s7358_s2 + $0x260] sm:$0xff]  ;;  %v5123_v43 = vpack.c.bf16 %v3680_v40, %v3679_v39  ;;  %v3682_v46 = vld [vmem:[%s7358_s2 + $0xf8] sm:$0xff]  ;;  %v3809_v47 = vld [vmem:[%s7358_s2 + $0x270] sm:$0xff] }
  0x19   : > { %4411 = vmatprep.mubr.f32.mxu1 %v5870_v29  ;;  %7439 = vst [vmem:[#allocation7_spill] sm:$0xff] %v5895_v38  ;;  %v5911_v44 = vpack.c.bf16 %v3808_v42, %v3807_v41  ;;  %v3810_v48 = vld [vmem:[%s7358_s2 + $0x278] sm:$0xff]  ;;  %v5127_v49 = vpack.c.bf16 %v3682_v46, %v3681_v45  ;;  %v899_v51 = vld [vmem:[%s7358_s2] sm:$0xff]  ;;  %v900_v52 = vld [vmem:[%s7358_s2 + $0x8] sm:$0xff] }
  0x1a   : > { %5110 = vmatpush3.bf16.msra.mxu1 %v5107_v16  ;;  %v5927_v50 = vpack.c.bf16 %v3810_v48, %v3809_v47  ;;  %v3811_v53 = vld [vmem:[%s7358_s2 + $0x280] sm:$0xff]  ;;  %v3812_v54 = vld [vmem:[%s7358_s2 + $0x288] sm:$0xff]  ;;  %v5131_v56 = vpack.c.bf16 %v900_v52, %v899_v51  ;;  %v3813_v59 = vld [vmem:[%s7358_s2 + $0x290] sm:$0xff] }
  0x1b   : > { %5238 = vmatpush3.bf16.msra.mxu0 %v5827_v17  ;;  %5112 = vmatprep.subr.bf16.mxu1 %v5111_v22  ;;  %7440 = vst [vmem:[#allocation8_spill] sm:$0xff] %v5911_v44  ;;  %v465_v55 = vld [vmem:[%s5845_s17 + $0x8] sm:$0xff]  ;;  %v5259_v57 = vpack.c.bf16 %v3812_v54, %v3811_v53  ;;  %v3814_v60 = vld [vmem:[%s7358_s2 + $0x298] sm:$0xff]  ;;  %v901_v61 = vld [vmem:[%s7358_s2 + $0x10] sm:$0xff] }
  0x1c   : > { %5240 = vmatprep.subr.bf16.mxu0 %v5855_v23  ;;  %7441 = vst [vmem:[#allocation9_spill] sm:$0xff] %v5927_v50  ;;  %v5944_v58 = vmul.f32 0.0, %v465_v55  ;;  %v902_v62 = vld [vmem:[%s7358_s2 + $0x18] sm:$0xff]  ;;  %v5960_v63 = vld [vmem:[%s5851_s20 + $0x8] sm:$0xff]  ;;  %v5263_v0 = vpack.c.bf16 %v3814_v60, %v3813_v59  ;;  %v5964_v1 = vld [vmem:[%s5851_s20 + $0x10] sm:$0xff] }
  0x1d   : > { %v5135_v2 = vpack.c.bf16 %v902_v62, %v901_v61  ;;  %v3815_v3 = vld [vmem:[%s7358_s2 + $0x2a0] sm:$0xff]  ;;  %v3816_v4 = vld [vmem:[%s7358_s2 + $0x2a8] sm:$0xff]  ;;  %v5981_v8 = vld [vmem:[%s5851_s20 + $0x18] sm:$0xff] }
  0x1e   : > { %5114 = vmatpush3.bf16.msra.mxu1 %v5111_v22  ;;  %v903_v5 = vld [vmem:[%s7358_s2 + $0x20] sm:$0xff]  ;;  %v904_v6 = vld [vmem:[%s7358_s2 + $0x28] sm:$0xff]  ;;  %v5267_v10 = vpack.c.bf16 %v3816_v4, %v3815_v3  ;;  %v3817_v11 = vld [vmem:[%s7358_s2 + $0x2b0] sm:$0xff]  ;;  %v7364_v28 = vrot.slane %v5944_v58, 1  ;;  %v6106_v3 = vrot.slane %v5960_v63, 1 }
  0x1f   : > { %5242 = vmatpush3.bf16.msra.mxu0 %v5855_v23  ;;  %5116 = vmatprep.subr.bf16.mxu1 %v5115_v31  ;;  %v5985_v9 = vld [vmem:[%s5851_s20 + $0x20] sm:$0xff]  ;;  %v3818_v13 = vld [vmem:[%s7358_s2 + $0x2b8] sm:$0xff]  ;;  %v5139_v14 = vpack.c.bf16 %v904_v6, %v903_v5  ;;  %v905_v15 = vld [vmem:[%s7358_s2 + $0x30] sm:$0xff] }
  0x20   : > { %5244 = vmatprep.subr.bf16.mxu0 %v5878_v32  ;;  %v906_v16 = vld [vmem:[%s7358_s2 + $0x38] sm:$0xff]  ;;  %v6004_v18 = vld [vmem:[%s5851_s20 + $0x28] sm:$0xff]  ;;  %v6007_v19 = vld [vmem:[%s5851_s20 + $0x30] sm:$0xff]  ;;  %v5271_v20 = vpack.c.bf16 %v3818_v13, %v3817_v11  ;;  %v6036_v35 = vsel %vm790_vm0, %v791_v25, %v7364_v28 }
  0x21   : > { %v3819_v21 = vld [vmem:[%s7358_s2 + $0x2c0] sm:$0xff]  ;;  %v3820_v22 = vld [vmem:[%s7358_s2 + $0x2c8] sm:$0xff]  ;;  %v5143_v24 = vpack.c.bf16 %v906_v16, %v905_v15  ;;  %v3821_v36 = vld [vmem:[%s7358_s2 + $0x2d0] sm:$0xff]  ;;  %v797_v16 = vrot.slane %v5964_v1, 1 }
  0x22   : > { %5118 = vmatpush3.bf16.msra.mxu1 %v5115_v31  ;;  %v907_v26 = vld [vmem:[%s7358_s2 + $0x40] sm:$0xff]  ;;  %v908_v27 = vld [vmem:[%s7358_s2 + $0x48] sm:$0xff]  ;;  %v6028_v31 = vld [vmem:[%s5851_s20 + $0x38] sm:$0xff]  ;;  %v5275_v34 = vpack.c.bf16 %v3820_v22, %v3819_v21 }
  0x23   : > { %5246 = vmatpush3.bf16.msra.mxu0 %v5878_v32  ;;  %5120 = vmatprep.subr.bf16.mxu1 %v5119_v37  ;;  %v6031_v33 = vld [vmem:[%s5851_s20 + $0x40] sm:$0xff]  ;;  %v5147_v39 = vpack.c.bf16 %v908_v27, %v907_v26  ;;  %v909_v40 = vld [vmem:[%s7358_s2 + $0x50] sm:$0xff]  ;;  %v910_v41 = vld [vmem:[%s7358_s2 + $0x58] sm:$0xff]  ;;  %v800_v27 = vrot.slane %v5985_v9, 1 }
  0x24   : > { %5248 = vmatprep.subr.bf16.mxu0 %v5895_v38  ;;  %v6055_v42 = vld [vmem:[%s5851_s20 + $0x48] sm:$0xff]  ;;  %v3823_v46 = vld [vmem:[%s7358_s2 + $0x2e0] sm:$0xff]  ;;  %v5151_v48 = vpack.c.bf16 %v910_v41, %v909_v40  ;;  %v6077_v52 = vld [vmem:[%s5851_s20 + $0x58] sm:$0xff] }
  0x25   : > { %7442 = vst [vmem:[#allocation10_spill] sm:$0xff] %v6055_v42  ;;  %v3824_v47 = vld [vmem:[%s7358_s2 + $0x2e8] sm:$0xff]  ;;  %7443 = vst [vmem:[#allocation11_spill] sm:$0xff] %v6077_v52  ;;  %v6080_v53 = vld [vmem:[%s5851_s20 + $0x60] sm:$0xff] }
  0x26   : > { %5122 = vmatpush3.bf16.msra.mxu1 %v5119_v37  ;;  %v3822_v37 = vld [vmem:[%s7358_s2 + $0x2d8] sm:$0xff]  ;;  %v912_v51 = vld [vmem:[%s7358_s2 + $0x68] sm:$0xff]  ;;  %7444 = vst [vmem:[#allocation12_spill] sm:$0xff] %v6080_v53  ;;  %v5283_v54 = vpack.c.bf16 %v3824_v47, %v3823_v46  ;;  %v3825_v55 = vld [vmem:[%s7358_s2 + $0x2f0] sm:$0xff]  ;;  %v803_v46 = vrot.slane %v6007_v19, 1  ;;  %v6182_v47 = vrot.slane %v6028_v31, 1 }
  0x27   : > { %5250 = vmatpush3.bf16.msra.mxu0 %v5895_v38  ;;  %5124 = vmatprep.subr.bf16.mxu1 %v5123_v43  ;;  %v5279_v45 = vpack.c.bf16 %v3822_v37, %v3821_v36  ;;  %v913_v59 = vld [vmem:[%s7358_s2 + $0x70] sm:$0xff]  ;;  %v914_v60 = vld [vmem:[%s7358_s2 + $0x78] sm:$0xff]  ;;  %v6099_v61 = vld [vmem:[%s5851_s20 + $0x68] sm:$0xff] }
  0x28   : > { %5252 = vmatprep.subr.bf16.mxu0 %v5911_v44  ;;  %v6102_v62 = vld [vmem:[%s5851_s20 + $0x70] sm:$0xff]  ;;  %v3843_v4 = vld [vmem:[%s7358_s2 + $0x300] sm:$0xff]  ;;  %v3844_v5 = vld [vmem:[%s7358_s2 + $0x308] sm:$0xff]  ;;  %v5159_v6 = vpack.c.bf16 %v914_v60, %v913_v59  ;;  %v6207_v59 = vrot.slane %v6055_v42, 1 }
  0x29   : > { %v3716_v11 = vld [vmem:[%s7358_s2 + $0x108] sm:$0xff]  ;;  %v6125_v13 = vld [vmem:[%s5851_s20 + $0x78] sm:$0xff]  ;;  %v5291_v15 = vpack.c.bf16 %v3844_v5, %v3843_v4  ;;  %v3845_v21 = vld [vmem:[%s7358_s2 + $0x310] sm:$0xff] }
  0x2a   : > { %5126 = vmatpush3.bf16.msra.mxu1 %v5123_v43  ;;  %v6058_v43 = vld [vmem:[%s5851_s20 + $0x50] sm:$0xff]  ;;  %v3846_v22 = vld [vmem:[%s7358_s2 + $0x318] sm:$0xff]  ;;  %v6148_v25 = vld [vmem:[%s5851_s20 + $0x80] sm:$0xff] }
  0x2b   : > { %5254 = vmatpush3.bf16.msra.mxu0 %v5911_v44  ;;  %5128 = vmatprep.subr.bf16.mxu1 %v5127_v49  ;;  %v5295_v36 = vpack.c.bf16 %v3846_v22, %v3845_v21  ;;  %v3847_v37 = vld [vmem:[%s7358_s2 + $0x320] sm:$0xff]  ;;  %v6170_v40 = vld [vmem:[%s5851_s20 + $0x88] sm:$0xff]  ;;  %v6174_v41 = vld [vmem:[%s5851_s20 + $0x90] sm:$0xff] }
  0x2c   : > { %5256 = vmatprep.subr.bf16.mxu0 %v5927_v50  ;;  %v6220_v4 = vld [vmem:[%s5851_s20 + $0xa8] sm:$0xff]  ;;  %v6224_v5 = vld [vmem:[%s5851_s20 + $0xb0] sm:$0xff]  ;;  %v3854_v21 = vld [vmem:[%s7358_s2 + $0x358] sm:$0xff]  ;;  %v6307_v28 = vrot.slane %v6170_v40, 1  ;;  %v821_v23 = vrot.slane %v6174_v41, 1 }
  0x2d   : > { %v6245_v22 = vld [vmem:[%s5851_s20 + $0xb8] sm:$0xff]  ;;  %v3891_v44 = vld [vmem:[%s7358_s2 + $0x380] sm:$0xff]  ;;  %v6321_v38 = vld [vmem:[%s5851_s20 + $0xe8] sm:$0xff] }
  0x2e   : > { %5130 = vmatpush3.bf16.msra.mxu1 %v5127_v49  ;;  %v911_v49 = vld [vmem:[%s7358_s2 + $0x60] sm:$0xff]  ;;  %7448 = vst [vmem:[#allocation16_spill] sm:$0xff] %v6307_v28  ;;  %vm6326_vm2 = vmneg %vm681_vm1 }
  0x2f   : > { %5258 = vmatpush3.bf16.msra.mxu0 %v5927_v50  ;;  %5132 = vmatprep.subr.bf16.mxu1 %v5131_v56 }
  0x30   : > { %5260 = vmatprep.subr.bf16.mxu0 %v5259_v57 }
  0x31   : > { %4412 = vmatmul.mubr.f32.vlgmr.msra.gmra.mrb[0].mxu1 %v5944_v58 }
  0x32   : > { %4732 = vmatmul.mubr.f32.vlgmr.msra.gmra.mrb[0].mxu0 %v5960_v63  ;;  %5134 = vmatpush3.bf16.msra.mxu1 %v5131_v56  ;;  %v3826_v56 = vld [vmem:[%s7358_s2 + $0x2f8] sm:$0xff] }
  0x33   : > { %5262 = vmatpush3.bf16.msra.mxu0 %v5259_v57  ;;  %4414 = vmatprep.mubr.f32.mxu1 %v5873_v30  ;;  %v5155_v57 = vpack.c.bf16 %v912_v51, %v911_v49  ;;  %v3849_v49 = vld [vmem:[%s7358_s2 + $0x330] sm:$0xff]  ;;  %v3850_v51 = vld [vmem:[%s7358_s2 + $0x338] sm:$0xff] }
  0x34   : > { %4734 = vmatprep.mubr.f32.mxu0 %v5964_v1  ;;  %5264 = vmatprep.subr.bf16.mxu0 %v5263_v0  ;;  %v5303_v60 = vpack.c.bf16 %v3850_v51, %v3849_v49  ;;  %v3856_v49 = vld [vmem:[%s7358_s2 + $0x368] sm:$0xff] }
  0x35   : > { %4415 = vmatmul.mubr.f32.gmra.mrb[2].mxu1 %v5960_v63  ;;  %5136 = vmatprep.subr.bf16.mxu1 %v5135_v2  ;;  %v6270_v51 = vld [vmem:[%s5851_s20 + $0xc8] sm:$0xff] }
  0x36   : > { %4735 = vmatmul.mubr.f32.gmra.mrb[2].mxu0 %v5981_v8  ;;  %4417 = vmatprep.mubr.f32.mxu1 %v5964_v1 }
  0x37   : > { %5266 = vmatpush3.bf16.msra.mxu0 %v5263_v0  ;;  %4737 = vmatprep.mubr.f32.mxu0 %v5985_v9  ;;  %v5287_v0 = vpack.c.bf16 %v3826_v56, %v3825_v55  ;;  %v6199_v55 = vld [vmem:[%s5851_s20 + $0xa0] sm:$0xff]  ;;  %v6203_v56 = vsel %vm790_vm0, %v803_v46, %v6182_v47 }
  0x38   : > { %5268 = vmatprep.subr.bf16.mxu0 %v5267_v10  ;;  %5138 = vmatpush3.bf16.msra.mxu1 %v5135_v2  ;;  %v794_v2 = vrot.slane %v5873_v30, 1 }
  0x39   : > { %4418 = vmatmul.mubr.f32.gmra.mrb[4].mxu1 %v5981_v8  ;;  %5140 = vmatprep.subr.bf16.mxu1 %v5139_v14 }
  0x3a   : > { %4738 = vmatmul.mubr.f32.gmra.mrb[4].mxu0 %v6004_v18  ;;  %4420 = vmatprep.mubr.f32.mxu1 %v5985_v9 }
  0x3b   : > { %5270 = vmatpush3.bf16.msra.mxu0 %v5267_v10  ;;  %4740 = vmatprep.mubr.f32.mxu0 %v6007_v19  ;;  %v3715_v10 = vld [vmem:[%s7358_s2 + $0x100] sm:$0xff] }
  0x3c   : > { %5272 = vmatprep.subr.bf16.mxu0 %v5271_v20  ;;  %5142 = vmatpush3.bf16.msra.mxu1 %v5139_v14  ;;  %v6129_v14 = vsel %vm790_vm0, %v794_v2, %v6106_v3  ;;  %v3852_v2 = vld [vmem:[%s7358_s2 + $0x348] sm:$0xff] }
  0x3d   : > { %4421 = vmatmul.mubr.f32.gmra.mrb[6].mxu1 %v6004_v18  ;;  %5144 = vmatprep.subr.bf16.mxu1 %v5143_v24 }
  0x3e   : > { %4741 = vmatmul.mubr.f32.gmra.mrb[6].mxu0 %v6028_v31  ;;  %4423 = vmatprep.mubr.f32.mxu1 %v6007_v19 }
  0x3f   : > { %5274 = vmatpush3.bf16.msra.mxu0 %v5271_v20  ;;  %4743 = vmatprep.mubr.f32.mxu0 %v6031_v33  ;;  %v6133_v20 = vrot.slane %v5981_v8, 1 }
  0x40   : > { %5276 = vmatprep.subr.bf16.mxu0 %v5275_v34  ;;  %5146 = vmatpush3.bf16.msra.mxu1 %v5143_v24  ;;  %v6142_v24 = vpack.c.bf16 %v3716_v11, %v3715_v10  ;;  %v809_v10 = vrot.slane %v6058_v43, 1  ;;  %v6232_v11 = vrot.slane %v6077_v52, 1 }
  0x41   : > { %4424 = vmatmul.mubr.f32.gmra.mrb[8].mxu1 %v6028_v31  ;;  %5148 = vmatprep.subr.bf16.mxu1 %v5147_v39  ;;  %v6152_v26 = vsel %vm790_vm0, %v797_v16, %v6133_v20  ;;  %v3853_v16 = vld [vmem:[%s7358_s2 + $0x350] sm:$0xff] }
  0x42   : > { %4744 = vmatmul.mubr.f32.gmra.mrb[8].mxu0 %v6055_v42  ;;  %4426 = vmatprep.mubr.f32.mxu1 %v6031_v33  ;;  %v5311_v46 = vpack.c.bf16 %v3854_v21, %v3853_v16  ;;  %v3857_v16 = vld [vmem:[%s7358_s2 + $0x370] sm:$0xff]  ;;  %v6295_v21 = vld [vmem:[%s5851_s20 + $0xd8] sm:$0xff] }
  0x43   : > { %5278 = vmatpush3.bf16.msra.mxu0 %v5275_v34  ;;  %4746 = vmatprep.mubr.f32.mxu0 %v6058_v43  ;;  %v6156_v34 = vrot.slane %v6004_v18, 1 }
  0x44   : > { %5280 = vmatprep.subr.bf16.mxu0 %v5279_v45  ;;  %5150 = vmatpush3.bf16.msra.mxu1 %v5147_v39  ;;  %v3848_v39 = vld [vmem:[%s7358_s2 + $0x328] sm:$0xff] }
  0x45   : > { %4427 = vmatmul.mubr.f32.gmra.mrb[10].mxu1 %v6055_v42  ;;  %5152 = vmatprep.subr.bf16.mxu1 %v5151_v48 }
  0x46   : > { %4747 = vmatmul.mubr.f32.gmra.mrb[10].mxu0 %v6077_v52  ;;  %4429 = vmatprep.mubr.f32.mxu1 %v6058_v43 }
  0x47   : > { %5282 = vmatpush3.bf16.msra.mxu0 %v5279_v45  ;;  %4749 = vmatprep.mubr.f32.mxu0 %v6080_v53  ;;  %v6178_v45 = vsel %vm790_vm0, %v800_v27, %v6156_v34  ;;  %v6249_v27 = vld [vmem:[%s5851_s20 + $0xc0] sm:$0xff] }
  0x48   : > { %5284 = vmatprep.subr.bf16.mxu0 %v5283_v54  ;;  %5154 = vmatpush3.bf16.msra.mxu1 %v5151_v48  ;;  %v5299_v48 = vpack.c.bf16 %v3848_v39, %v3847_v37  ;;  %v812_v37 = vrot.slane %v6080_v53, 1  ;;  %v6257_v39 = vrot.slane %v6099_v61, 1 }
  0x49   : > { %4430 = vmatmul.mubr.f32.gmra.mrb[12].mxu1 %v6077_v52  ;;  %5156 = vmatprep.subr.bf16.mxu1 %v5155_v57 }
  0x4a   : > { %4750 = vmatmul.mubr.f32.gmra.mrb[12].mxu0 %v6099_v61  ;;  %4432 = vmatprep.mubr.f32.mxu1 %v6080_v53  ;;  %7445 = vst [vmem:[#allocation13_spill] sm:$0xff] %v6257_v39 }
  0x4b   : > { %5286 = vmatpush3.bf16.msra.mxu0 %v5283_v54  ;;  %4752 = vmatprep.mubr.f32.mxu0 %v6102_v62  ;;  %v6195_v54 = vld [vmem:[%s5851_s20 + $0x98] sm:$0xff] }
  0x4c   : > { %5288 = vmatprep.subr.bf16.mxu0 %v5287_v0  ;;  %5158 = vmatpush3.bf16.msra.mxu1 %v5155_v57  ;;  %v806_v57 = vrot.slane %v6031_v33, 1  ;;  %v6336_v17 = vrot.slane %v6195_v54, 1 }
  0x4d   : > { %4433 = vmatmul.mubr.f32.gmra.mrb[14].mxu1 %v6099_v61  ;;  %5160 = vmatprep.subr.bf16.mxu1 %v5159_v6 }
  0x4e   : > { %4753 = vmatmul.mubr.f32.gmra.mrb[14].mxu0 %v6125_v13  ;;  %4435 = vmatprep.mubr.f32.mxu1 %v6102_v62  ;;  %7452 = vst [vmem:[#allocation18_spill] sm:$0xff] %v6336_v17  ;;  %v6359_v7 = vsel %vm790_vm0, %v821_v23, %v6336_v17 }
  0x4f   : > { %5290 = vmatpush3.bf16.msra.mxu0 %v5287_v0  ;;  %4811 = vmatprep.mubr.f32.mxu0 %v6129_v14  ;;  %v3851_v0 = vld [vmem:[%s7358_s2 + $0x340] sm:$0xff]  ;;  %7454 = vst [vmem:[#allocation20_spill] sm:$0xff] %v6359_v7 }
  0x50   : > { %5292 = vmatprep.subr.bf16.mxu0 %v5291_v15  ;;  %5162 = vmatpush3.bf16.msra.mxu1 %v5159_v6  ;;  %v6228_v6 = vsel %vm790_vm0, %v806_v57, %v6207_v59  ;;  %v6274_v57 = vld [vmem:[%s5851_s20 + $0xd0] sm:$0xff] }
  0x51   : > { %4436 = vmatmul.mubr.f32.gmra.mrb[16].mxu1 %v6125_v13  ;;  %5164 = vmatprep.subr.bf16.mxu1 %v6142_v24 }
  0x52   : > { %4812 = vmatmul.mubr.msk.f32.vlgmr.msra.gmra.mrb[0].mxu0 %vm790_vm0, %v6106_v3  ;;  %4438 = vmatprep.mubr.f32.mxu1 %v6148_v25 }
  0x53   : > { %5294 = vmatpush3.bf16.msra.mxu0 %v5291_v15  ;;  %4814 = vmatprep.mubr.f32.mxu0 %v6152_v26  ;;  %v5307_v15 = vpack.c.bf16 %v3852_v2, %v3851_v0  ;;  %v815_v0 = vrot.slane %v6102_v62, 1  ;;  %v6282_v2 = vrot.slane %v6125_v13, 1 }
  0x54   : > { %5296 = vmatprep.subr.bf16.mxu0 %v5295_v36 }
  0x55   : > { %4439 = vmatmul.mubr.f32.gmra.mrb[18].mxu1 %v6170_v40  ;;  %7446 = vst [vmem:[#allocation14_spill] sm:$0xff] %v6282_v2 }
  0x56   : > { %4815 = vmatmul.mubr.msk.f32.gmra.mrb[2].mxu0 %vm790_vm0, %v6133_v20  ;;  %4441 = vmatprep.mubr.f32.mxu1 %v6174_v41 }
  0x57   : > { %4817 = vmatprep.mubr.f32.mxu0 %v6178_v45  ;;  %5298 = vmatpush3.bf16.msra.mxu0 %v5295_v36  ;;  %v6253_v36 = vsel %vm790_vm0, %v809_v10, %v6232_v11 }
  0x58   : > { %5300 = vmatprep.subr.bf16.mxu0 %v5299_v48 }
  0x59   : > { %4442 = vmatmul.mubr.f32.gmra.mrb[20].mxu1 %v6195_v54 }
  0x5a   : > { %4818 = vmatmul.mubr.msk.f32.gmra.mrb[4].mxu0 %vm790_vm0, %v6156_v34  ;;  %4444 = vmatprep.mubr.f32.mxu1 %v6199_v55 }
  0x5b   : > { %4820 = vmatprep.mubr.f32.mxu0 %v6203_v56  ;;  %5302 = vmatpush3.bf16.msra.mxu0 %v5299_v48  ;;  %v3855_v48 = vld [vmem:[%s7358_s2 + $0x360] sm:$0xff] }
  0x5c   : > { %5304 = vmatprep.subr.bf16.mxu0 %v5303_v60  ;;  %v5315_v10 = vpack.c.bf16 %v3856_v49, %v3855_v48  ;;  %v6303_v48 = vsel %vm790_vm0, %v815_v0, %v6282_v2  ;;  %v818_v49 = vrot.slane %v6148_v25, 1  ;;  %v683_v0 = vrot.slane %v5944_v58, 7 }
  0x5d   : > { %4445 = vmatmul.mubr.f32.gmra.mrb[22].mxu1 %v6220_v4  ;;  %7447 = vst [vmem:[#allocation15_spill] sm:$0xff] %v6303_v48 }
  0x5e   : > { %4821 = vmatmul.mubr.msk.f32.gmra.mrb[6].mxu0 %vm790_vm0, %v6182_v47  ;;  %4447 = vmatprep.mubr.f32.mxu1 %v6224_v5  ;;  %v6332_v32 = vsel %vm790_vm0, %v818_v49, %v6307_v28 }
  0x5f   : > { %4823 = vmatprep.mubr.f32.mxu0 %v6228_v6  ;;  %5306 = vmatpush3.bf16.msra.mxu0 %v5303_v60  ;;  %v6278_v60 = vsel %vm790_vm0, %v812_v37, %v6257_v39  ;;  %v6299_v37 = vld [vmem:[%s5851_s20 + $0xe0] sm:$0xff]  ;;  %7451 = vst [vmem:[#allocation17_spill] sm:$0xff] %v6332_v32 }
  0x60   : > { %5308 = vmatprep.subr.bf16.mxu0 %v5307_v15 }
  0x61   : > { %4448 = vmatmul.mubr.f32.gmra.mrb[24].mxu1 %v6245_v22 }
  0x62   : > { %4824 = vmatmul.mubr.msk.f32.gmra.mrb[8].mxu0 %vm790_vm0, %v6207_v59  ;;  %4450 = vmatprep.mubr.f32.mxu1 %v6249_v27 }
  0x63   : > { %4826 = vmatprep.mubr.f32.mxu0 %v6253_v36  ;;  %5310 = vmatpush3.bf16.msra.mxu0 %v5307_v15  ;;  %v3858_v15 = vld [vmem:[%s7358_s2 + $0x378] sm:$0xff] }
  0x64   : > { %5312 = vmatprep.subr.bf16.mxu0 %v5311_v46  ;;  %v5319_v50 = vpack.c.bf16 %v3858_v15, %v3857_v16  ;;  %v682_v16 = vrot.slane %v5870_v29, 7  ;;  %v3717_v29 = vld [vmem:[%s7358_s2 + $0x110] sm:$0xff]  ;;  %v5693_v15 = vld [vmem:[%s5851_s20 + $0x98] sm:$0xff] }
  0x65   : > { %4451 = vmatmul.mubr.f32.gmra.mrb[26].mxu1 %v6270_v51 }
  0x66   : > { %4827 = vmatmul.mubr.msk.f32.gmra.mrb[10].mxu0 %vm790_vm0, %v6232_v11  ;;  %4453 = vmatprep.mubr.f32.mxu1 %v6274_v57  ;;  %v684_v49 = vsel %vm681_vm1, %v682_v16, %v683_v0  ;;  %v689_v0 = vrot.slane %v5981_v8, 7  ;;  %v3721_v8 = vld [vmem:[%s7358_s2 + $0x130] sm:$0xff] }
  0x67   : > { %4829 = vmatprep.mubr.f32.mxu0 %v6278_v60  ;;  %5314 = vmatpush3.bf16.msra.mxu0 %v5311_v46  ;;  %v3892_v46 = vld [vmem:[%s7358_s2 + $0x388] sm:$0xff] }
  0x68   : > { %5316 = vmatprep.subr.bf16.mxu0 %v5315_v10  ;;  %v6338_v12 = vpack.c.bf16 %v3892_v46, %v3891_v44  ;;  %v6353_v44 = vrot.slane %v5873_v30, 7  ;;  %v686_v46 = vrot.slane %v5960_v63, 7  ;;  %v3719_v30 = vld [vmem:[%s7358_s2 + $0x120] sm:$0xff]  ;;  %v6380_v63 = vrot.slane %v5964_v1, 7 }
  0x69   : > { %4454 = vmatmul.mubr.f32.gmra.mrb[28].mxu1 %v6295_v21 }
  0x6a   : > { %4830 = vmatmul.mubr.msk.f32.gmra.mrb[12].mxu0 %vm790_vm0, %v6257_v39  ;;  %4456 = vmatprep.mubr.f32.mxu1 %v6299_v37  ;;  %7453 = vst [vmem:[#allocation19_spill] sm:$0xff] %v6353_v44  ;;  %v6377_v23 = vsel %vm681_vm1, %v6353_v44, %v686_v46  ;;  %7457 = vst [vmem:[#allocation23_spill] sm:$0xff] %v6380_v63  ;;  %v692_v46 = vrot.slane %v6004_v18, 7  ;;  %v3724_v18 = vld [vmem:[%s7358_s2 + $0x148] sm:$0xff] }
  0x6b   : > { %4832 = vmatprep.mubr.f32.mxu0 %v6303_v48  ;;  %5318 = vmatpush3.bf16.msra.mxu0 %v5315_v10  ;;  %v3718_v10 = vld [vmem:[%s7358_s2 + $0x118] sm:$0xff]  ;;  %v824_v48 = vrot.slane %v6199_v55, 1  ;;  %7456 = vst [vmem:[#allocation22_spill] sm:$0xff] %v6377_v23 }
  0x6c   : > { %5320 = vmatprep.subr.bf16.mxu0 %v5319_v50  ;;  %v5167_v39 = vpack.c.bf16 %v3718_v10, %v3717_v29  ;;  %v6393_v29 = vrot.slane %v6245_v22, 1  ;;  %v3722_v10 = vld [vmem:[%s7358_s2 + $0x138] sm:$0xff] }
  0x6d   : > { %4457 = vmatmul.mubr.f32.gmra.mrb[30].mxu1 %v6321_v38 }
  0x6e   : > { %4833 = vmatmul.mubr.msk.f32.gmra.mrb[14].mxu0 %vm790_vm0, %v6282_v2  ;;  %4491 = vmatprep.mubr.msk.f32.mxu1 %vm6326_vm2, %v682_v16  ;;  %v6363_v2 = vrot.slane %v6220_v4, 1  ;;  %7459 = vst [vmem:[#allocation25_spill] sm:$0xff] %v6393_v29 }
  0x6f   : > { %4835 = vmatprep.mubr.f32.mxu0 %v6332_v32  ;;  %5322 = vmatpush3.bf16.msra.mxu0 %v5319_v50  ;;  %v3720_v50 = vld [vmem:[%s7358_s2 + $0x128] sm:$0xff] }
  0x70   : > { %7455 = vst [vmem:[#allocation21_spill] sm:$0xff] %v6363_v2  ;;  %5324 = vmatprep.subr.bf16.mxu0 %v6338_v12  ;;  %v6389_v16 = vsel %vm790_vm0, %v824_v48, %v6363_v2  ;;  %v5171_v1 = vpack.c.bf16 %v3720_v50, %v3719_v30  ;;  %v6409_v48 = vsel %vm681_vm1, %v6380_v63, %v689_v0  ;;  %v830_v50 = vrot.slane %v6249_v27, 1 }
  0x71   : > { %4492 = vmatmul.mubr.f32.vlgmr.msra.gmra.mrb[0].mxu1 %v684_v49  ;;  %7458 = vst [vmem:[#allocation24_spill] sm:$0xff] %v6389_v16  ;;  %7460 = vst [vmem:[#allocation26_spill] sm:$0xff] %v6409_v48  ;;  %v6412_v49 = vrot.slane %v5985_v9, 7  ;;  %v5175_v0 = vpack.c.bf16 %v3722_v10, %v3721_v8  ;;  %v3723_v9 = vld [vmem:[%s7358_s2 + $0x140] sm:$0xff]  ;;  %v695_v8 = vrot.slane %v6028_v31, 7  ;;  %v3726_v31 = vld [vmem:[%s7358_s2 + $0x158] sm:$0xff] }
  0x72   : > { %4836 = vmatmul.mubr.msk.f32.gmra.mrb[16].mxu0 %vm790_vm0, %v6307_v28  ;;  %5166 = vmatpush3.bf16.msra.mxu1 %v6142_v24  ;;  %v827_v24 = vrot.slane %v6224_v5, 1 }
  0x73   : > { %4494 = vmatprep.mubr.msk.f32.mxu1 %vm6326_vm2, %v6353_v44  ;;  %4838 = vmatprep.mubr.f32.mxu0 %v6359_v7  ;;  %7461 = vst [vmem:[#allocation27_spill] sm:$0xff] %v6412_v49  ;;  %v833_v44 = vrot.slane %v6274_v57, 1 }
  0x74   : > { %5168 = vmatprep.subr.bf16.mxu1 %v5167_v39  ;;  %v6418_v30 = vsel %vm790_vm0, %v827_v24, %v6393_v29  ;;  %v6441_v24 = vrot.slane %v6007_v19, 7  ;;  %v3725_v19 = vld [vmem:[%s7358_s2 + $0x150] sm:$0xff] }
  0x75   : > { %4495 = vmatmul.mubr.f32.gmra.mrb[2].mxu1 %v6377_v23  ;;  %7462 = vst [vmem:[#allocation28_spill] sm:$0xff] %v6418_v30  ;;  %v6422_v23 = vrot.slane %v6270_v51, 1 }
  0x76   : > { %4839 = vmatmul.mubr.msk.f32.gmra.mrb[18].mxu0 %vm790_vm0, %v6336_v17  ;;  %4497 = vmatprep.mubr.msk.f32.mxu1 %vm6326_vm2, %v6380_v63  ;;  %7465 = vst [vmem:[#allocation31_spill] sm:$0xff] %v6441_v24 }
  0x77   : > { %4841 = vmatprep.mubr.f32.mxu0 %v6389_v16  ;;  %5170 = vmatpush3.bf16.msra.mxu1 %v5167_v39  ;;  %7463 = vst [vmem:[#allocation29_spill] sm:$0xff] %v6422_v23  ;;  %v6438_v39 = vsel %vm681_vm1, %v6412_v49, %v692_v46  ;;  %v6447_v10 = vsel %vm790_vm0, %v830_v50, %v6422_v23  ;;  %v6470_v50 = vrot.slane %v6031_v33, 7  ;;  %v6483_v16 = vld [vmem:[%s5851_s20 + $0xf0] sm:$0xff]  ;;  %v6487_v33 = vld [vmem:[%s5851_s20 + $0xf8] sm:$0xff] }
  0x78   : > { %5172 = vmatprep.subr.bf16.mxu1 %v5171_v1  ;;  %7464 = vst [vmem:[#allocation30_spill] sm:$0xff] %v6438_v39  ;;  %7466 = vst [vmem:[#allocation32_spill] sm:$0xff] %v6447_v10  ;;  %v5179_v46 = vpack.c.bf16 %v3724_v18, %v3723_v9  ;;  %v698_v9 = vrot.slane %v6055_v42, 7  ;;  %v6515_v17 = vrot.slane %v6487_v33, 1 }
  0x79   : > { %4498 = vmatmul.mubr.f32.gmra.mrb[4].mxu1 %v6409_v48  ;;  %7469 = vst [vmem:[#allocation35_spill] sm:$0xff] %v6470_v50 }
  0x7a   : > { %4842 = vmatmul.mubr.msk.f32.gmra.mrb[20].mxu0 %vm790_vm0, %v6363_v2  ;;  %4500 = vmatprep.mubr.msk.f32.mxu1 %vm6326_vm2, %v6412_v49  ;;  %v6451_v2 = vrot.slane %v6295_v21, 1  ;;  %7474 = vst [vmem:[#allocation40_spill] sm:$0xff] %v6515_v17 }
  0x7b   : > { %4844 = vmatprep.mubr.f32.mxu0 %v6418_v30  ;;  %5174 = vmatpush3.bf16.msra.mxu1 %v5171_v1  ;;  %v6467_v1 = vsel %vm681_vm1, %v6441_v24, %v695_v8  ;;  %v6480_v30 = vrot.slane %v6321_v38, 1  ;;  %v5183_v8 = vpack.c.bf16 %v3726_v31, %v3725_v19  ;;  %v6502_v19 = vsel %vm681_vm1, %v6470_v50, %v698_v9 }
  0x7c   : > { %7467 = vst [vmem:[#allocation33_spill] sm:$0xff] %v6451_v2  ;;  %5176 = vmatprep.subr.bf16.mxu1 %v5175_v0  ;;  %7468 = vst [vmem:[#allocation34_spill] sm:$0xff] %v6467_v1  ;;  %v6476_v18 = vsel %vm790_vm0, %v833_v44, %v6451_v2  ;;  %v3728_v44 = vld [vmem:[%s7358_s2 + $0x168] sm:$0xff]  ;;  %v6505_v31 = vrot.slane %v6058_v43, 7 }
  0x7d   : > { %4501 = vmatmul.mubr.f32.gmra.mrb[6].mxu1 %v6438_v39  ;;  %7470 = vst [vmem:[#allocation36_spill] sm:$0xff] %v6476_v18  ;;  %7471 = vst [vmem:[#allocation37_spill] sm:$0xff] %v6480_v30 }
  0x7e   : > { %4845 = vmatmul.mubr.msk.f32.gmra.mrb[22].mxu0 %vm790_vm0, %v6393_v29  ;;  %4503 = vmatprep.mubr.msk.f32.mxu1 %vm6326_vm2, %v6441_v24  ;;  %v836_v29 = vrot.slane %v6299_v37, 1  ;;  %7472 = vst [vmem:[#allocation38_spill] sm:$0xff] %v6502_v19  ;;  %7473 = vst [vmem:[#allocation39_spill] sm:$0xff] %v6505_v31 }
  0x7f   : > { %4847 = vmatprep.mubr.f32.mxu0 %v6447_v10  ;;  %5178 = vmatpush3.bf16.msra.mxu1 %v5175_v0  ;;  %v3727_v0 = vld [vmem:[%s7358_s2 + $0x160] sm:$0xff]  ;;  %v701_v10 = vrot.slane %v6077_v52, 7  ;;  %v3729_v52 = vld [vmem:[%s7358_s2 + $0x170] sm:$0xff] }
  0x80   : > { %5180 = vmatprep.subr.bf16.mxu1 %v5179_v46  ;;  %v6511_v42 = vsel %vm790_vm0, %v836_v29, %v6480_v30  ;;  %v5187_v9 = vpack.c.bf16 %v3728_v44, %v3727_v0  ;;  %v6534_v0 = vrot.slane %v6080_v53, 7  ;;  %v704_v44 = vrot.slane %v6099_v61, 7  ;;  %v3748_v53 = vld [vmem:[%s7358_s2 + $0x188] sm:$0xff] }
  0x81   : > { %4504 = vmatmul.mubr.f32.gmra.mrb[8].mxu1 %v6467_v1  ;;  %v6531_v29 = vsel %vm681_vm1, %v6505_v31, %v701_v10  ;;  %v3747_v10 = vld [vmem:[%s7358_s2 + $0x180] sm:$0xff] }
  0x82   : > { %4848 = vmatmul.mubr.msk.f32.gmra.mrb[24].mxu0 %vm790_vm0, %v6422_v23  ;;  %4506 = vmatprep.mubr.msk.f32.mxu1 %vm6326_vm2, %v6470_v50  ;;  %v839_v23 = vrot.slane %v6483_v16, 1  ;;  %7475 = vst [vmem:[#allocation41_spill] sm:$0xff] %v6531_v29  ;;  %7476 = vst [vmem:[#allocation42_spill] sm:$0xff] %v6534_v0 }
  0x83   : > { %4850 = vmatprep.mubr.f32.mxu0 %v6476_v18  ;;  %5182 = vmatpush3.bf16.msra.mxu1 %v5179_v46  ;;  %v3730_v46 = vld [vmem:[%s7358_s2 + $0x178] sm:$0xff] }
  0x84   : > { %5184 = vmatprep.subr.bf16.mxu1 %v5183_v8  ;;  %v6540_v18 = vsel %vm790_vm0, %v839_v23, %v6515_v17  ;;  %v6559_v23 = vrot.slane %v6102_v62, 7 }
  0x85   : > { %4507 = vmatmul.mubr.f32.gmra.mrb[10].mxu1 %v6502_v19  ;;  %7477 = vst [vmem:[#allocation43_spill] sm:$0xff] %v6540_v18 }
  0x86   : > { %4851 = vmatmul.mubr.msk.f32.gmra.mrb[26].mxu0 %vm790_vm0, %v6451_v2  ;;  %4509 = vmatprep.mubr.msk.f32.mxu1 %vm6326_vm2, %v6505_v31  ;;  %v5191_v2 = vpack.c.bf16 %v3730_v46, %v3729_v52  ;;  %v6556_v52 = vsel %vm681_vm1, %v6534_v0, %v704_v44  ;;  %v6563_v46 = vpack.c.bf16 %v3748_v53, %v3747_v10  ;;  %v3894_v44 = vld [vmem:[%s7358_s2 + $0x398] sm:$0xff]  ;;  %v710_v10 = vrot.slane %v6170_v40, 7 }
  0x87   : > { %4853 = vmatprep.mubr.f32.mxu0 %v6511_v42  ;;  %5186 = vmatpush3.bf16.msra.mxu1 %v5183_v8  ;;  %7478 = vst [vmem:[#allocation44_spill] sm:$0xff] %v6556_v52  ;;  %v707_v8 = vrot.slane %v6125_v13, 7 }
  0x88   : > { %5188 = vmatprep.subr.bf16.mxu1 %v5187_v9 }
  0x89   : > { %4510 = vmatmul.mubr.f32.gmra.mrb[12].mxu1 %v6531_v29  ;;  %v6579_v53 = vsel %vm681_vm1, %v6559_v23, %v707_v8  ;;  %v3895_v8 = vld [vmem:[%s7358_s2 + $0x3a0] sm:$0xff] }
  0x8a   : > { %4854 = vmatmul.mubr.msk.f32.gmra.mrb[28].mxu0 %vm790_vm0, %v6480_v30  ;;  %4512 = vmatprep.mubr.msk.f32.mxu1 %vm6326_vm2, %v6534_v0  ;;  %v3893_v30 = vld [vmem:[%s7358_s2 + $0x390] sm:$0xff]  ;;  %7479 = vst [vmem:[#allocation45_spill] sm:$0xff] %v6579_v53 }
  0x8b   : > { %4856 = vmatprep.mubr.f32.mxu0 %v6540_v18  ;;  %5190 = vmatpush3.bf16.msra.mxu1 %v5187_v9  ;;  %v6582_v9 = vrot.slane %v6148_v25, 7  ;;  %v5327_v18 = vpack.c.bf16 %v3894_v44, %v3893_v30  ;;  %v6605_v30 = vrot.slane %v6174_v41, 7  ;;  %v713_v44 = vrot.slane %v6195_v54, 7 }
  0x8c   : > { %5192 = vmatprep.subr.bf16.mxu1 %v5191_v2 }
  0x8d   : > { %4513 = vmatmul.mubr.f32.gmra.mrb[14].mxu1 %v6556_v52 }
  0x8e   : > { %4857 = vmatmul.mubr.msk.f32.gmra.mrb[30].mxu0 %vm790_vm0, %v6515_v17  ;;  %4515 = vmatprep.mubr.msk.f32.mxu1 %vm6326_vm2, %v6559_v23  ;;  %v3896_v17 = vld [vmem:[%s7358_s2 + $0x3a8] sm:$0xff] }
  0x8f   : > { %4891 = vmatprep.mubr.msk.f32.mxu0 %vm6326_vm2, %v6380_v63  ;;  %5194 = vmatpush3.bf16.msra.mxu1 %v5191_v2  ;;  %v6602_v2 = vsel %vm681_vm1, %v6582_v9, %v710_v10  ;;  %v3897_v10 = vld [vmem:[%s7358_s2 + $0x3b0] sm:$0xff]  ;;  %v3898_v63 = vld [vmem:[%s7358_s2 + $0x3b8] sm:$0xff] }
  0x90   : > { %5196 = vmatprep.subr.bf16.mxu1 %v6563_v46 }
  0x91   : > { %4516 = vmatmul.mubr.f32.gmra.mrb[16].mxu1 %v6579_v53 }
  0x92   : > { %4892 = vmatmul.mubr.f32.vlgmr.msra.gmra.mrb[0].mxu0 %v6409_v48  ;;  %4518 = vmatprep.mubr.msk.f32.mxu1 %vm6326_vm2, %v6582_v9  ;;  %v5331_v48 = vpack.c.bf16 %v3896_v17, %v3895_v8  ;;  %v6628_v17 = vrot.slane %v6199_v55, 7  ;;  %v716_v8 = vrot.slane %v6220_v4, 7 }
  0x93   : > { %5326 = vmatpush3.bf16.msra.mxu0 %v6338_v12  ;;  %4894 = vmatprep.mubr.msk.f32.mxu0 %vm6326_vm2, %v6412_v49  ;;  %v6625_v12 = vsel %vm681_vm1, %v6605_v30, %v713_v44  ;;  %v3899_v49 = vld [vmem:[%s7358_s2 + $0x3c0] sm:$0xff]  ;;  %v3900_v44 = vld [vmem:[%s7358_s2 + $0x3c8] sm:$0xff] }
  0x94   : > { %5328 = vmatprep.subr.bf16.mxu0 %v5327_v18 }
  0x95   : > { %4519 = vmatmul.mubr.f32.gmra.mrb[18].mxu1 %v6602_v2 }
  0x96   : > { %4895 = vmatmul.mubr.f32.gmra.mrb[2].mxu0 %v6438_v39  ;;  %4521 = vmatprep.mubr.msk.f32.mxu1 %vm6326_vm2, %v6605_v30  ;;  %v5335_v39 = vpack.c.bf16 %v3898_v63, %v3897_v10  ;;  %v6650_v63 = vrot.slane %v6224_v5, 7  ;;  %v719_v10 = vrot.slane %v6245_v22, 7 }
  0x97   : > { %4897 = vmatprep.mubr.msk.f32.mxu0 %vm6326_vm2, %v6441_v24  ;;  %5330 = vmatpush3.bf16.msra.mxu0 %v5327_v18  ;;  %v6647_v18 = vsel %vm681_vm1, %v6628_v17, %v716_v8  ;;  %v3901_v24 = vld [vmem:[%s7358_s2 + $0x3d0] sm:$0xff]  ;;  %v3902_v8 = vld [vmem:[%s7358_s2 + $0x3d8] sm:$0xff] }
  0x98   : > { %5332 = vmatprep.subr.bf16.mxu0 %v5331_v48 }
  0x99   : > { %4522 = vmatmul.mubr.f32.gmra.mrb[20].mxu1 %v6625_v12 }
  0x9a   : > { %4898 = vmatmul.mubr.f32.gmra.mrb[4].mxu0 %v6467_v1  ;;  %4524 = vmatprep.mubr.msk.f32.mxu1 %vm6326_vm2, %v6628_v17  ;;  %v5339_v1 = vpack.c.bf16 %v3900_v44, %v3899_v49  ;;  %v6672_v49 = vrot.slane %v6249_v27, 7  ;;  %v722_v44 = vrot.slane %v6270_v51, 7 }
  0x9b   : > { %4900 = vmatprep.mubr.msk.f32.mxu0 %vm6326_vm2, %v6470_v50  ;;  %5334 = vmatpush3.bf16.msra.mxu0 %v5331_v48  ;;  %v6669_v48 = vsel %vm681_vm1, %v6650_v63, %v719_v10  ;;  %v3903_v50 = vld [vmem:[%s7358_s2 + $0x3e0] sm:$0xff]  ;;  %v3904_v10 = vld [vmem:[%s7358_s2 + $0x3e8] sm:$0xff] }
  0x9c   : > { %5336 = vmatprep.subr.bf16.mxu0 %v5335_v39 }
  0x9d   : > { %4525 = vmatmul.mubr.f32.gmra.mrb[22].mxu1 %v6647_v18 }
  0x9e   : > { %4901 = vmatmul.mubr.f32.gmra.mrb[6].mxu0 %v6502_v19  ;;  %4527 = vmatprep.mubr.msk.f32.mxu1 %vm6326_vm2, %v6650_v63  ;;  %v5343_v19 = vpack.c.bf16 %v3902_v8, %v3901_v24  ;;  %v6694_v24 = vrot.slane %v6274_v57, 7  ;;  %v725_v8 = vrot.slane %v6295_v21, 7 }
  0x9f   : > { %4903 = vmatprep.mubr.msk.f32.mxu0 %vm6326_vm2, %v6505_v31  ;;  %5338 = vmatpush3.bf16.msra.mxu0 %v5335_v39  ;;  %v6691_v39 = vsel %vm681_vm1, %v6672_v49, %v722_v44  ;;  %v3905_v31 = vld [vmem:[%s7358_s2 + $0x3f0] sm:$0xff]  ;;  %v3906_v44 = vld [vmem:[%s7358_s2 + $0x3f8] sm:$0xff] }
  0xa0   : > { %5340 = vmatprep.subr.bf16.mxu0 %v5339_v1 }
  0xa1   : > { %4528 = vmatmul.mubr.f32.gmra.mrb[24].mxu1 %v6669_v48 }
  0xa2   : > { %4904 = vmatmul.mubr.f32.gmra.mrb[8].mxu0 %v6531_v29  ;;  %4530 = vmatprep.mubr.msk.f32.mxu1 %vm6326_vm2, %v6672_v49  ;;  %v5347_v29 = vpack.c.bf16 %v3904_v10, %v3903_v50  ;;  %v6716_v50 = vrot.slane %v6299_v37, 7  ;;  %v728_v10 = vrot.slane %v6321_v38, 7 }
  0xa3   : > { %4906 = vmatprep.mubr.msk.f32.mxu0 %vm6326_vm2, %v6534_v0  ;;  %5342 = vmatpush3.bf16.msra.mxu0 %v5339_v1  ;;  %v6713_v1 = vsel %vm681_vm1, %v6694_v24, %v725_v8  ;;  %v3907_v0 = vld [vmem:[%s7358_s2 + $0x400] sm:$0xff]  ;;  %v3908_v8 = vld [vmem:[%s7358_s2 + $0x408] sm:$0xff] }
  0xa4   : > { %5344 = vmatprep.subr.bf16.mxu0 %v5343_v19  ;;  %7480 = vst [vmem:[#allocation46_spill] sm:$0xff] %v6716_v50 }
  0xa5   : > { %4531 = vmatmul.mubr.f32.gmra.mrb[26].mxu1 %v6691_v39 }
  0xa6   : > { %4907 = vmatmul.mubr.f32.gmra.mrb[10].mxu0 %v6556_v52  ;;  %4533 = vmatprep.mubr.msk.f32.mxu1 %vm6326_vm2, %v6694_v24  ;;  %v5351_v52 = vpack.c.bf16 %v3906_v44, %v3905_v31  ;;  %v6740_v31 = vpack.c.bf16 %v3908_v8, %v3907_v0  ;;  %v3749_v44 = vld [vmem:[%s7358_s2 + $0x190] sm:$0xff]  ;;  %v7482_v0 = vrot.slane %v5944_v58, 1 }
  0xa7   : > { %4909 = vmatprep.mubr.msk.f32.mxu0 %vm6326_vm2, %v6559_v23  ;;  %5346 = vmatpush3.bf16.msra.mxu0 %v5343_v19  ;;  %v6735_v19 = vsel %vm681_vm1, %v6716_v50, %v728_v10  ;;  %v3751_v10 = vld [vmem:[%s7358_s2 + $0x1a0] sm:$0xff] }
  0xa8   : > { %5348 = vmatprep.subr.bf16.mxu0 %v5347_v29  ;;  %7481 = vst [vmem:[#allocation47_spill] sm:$0xff] %v6735_v19 }
  0xa9   : > { %4534 = vmatmul.mubr.f32.gmra.mrb[28].mxu1 %v6713_v1 }
  0xaa   : > { %4910 = vmatmul.mubr.f32.gmra.mrb[12].mxu0 %v6579_v53  ;;  %4536 = vmatprep.mubr.msk.f32.mxu1 %vm6326_vm2, %v6716_v50  ;;  %v3750_v53 = vld [vmem:[%s7358_s2 + $0x198] sm:$0xff] }
  0xab   : > { %4912 = vmatprep.mubr.msk.f32.mxu0 %vm6326_vm2, %v6582_v9  ;;  %5350 = vmatpush3.bf16.msra.mxu0 %v5347_v29  ;;  %v5199_v29 = vpack.c.bf16 %v3750_v53, %v3749_v44  ;;  %v3756_v53 = vld [vmem:[%s7358_s2 + $0x1c8] sm:$0xff]  ;;  %v3757_v44 = vld [vmem:[%s7358_s2 + $0x1d0] sm:$0xff] }
  0xac   : > { %5352 = vmatprep.subr.bf16.mxu0 %v5351_v52 }
  0xad   : > { %4537 = vmatmul.mubr.f32.gmra.mrb[30].mxu1 %v6735_v19 }
  0xae   : > { %4913 = vmatmul.mubr.f32.gmra.mrb[14].mxu0 %v6602_v2  ;;  %4571 = vmatprep.mubr.f32.mxu1 %v6036_v35  ;;  %v3752_v35 = vld [vmem:[%s7358_s2 + $0x1a8] sm:$0xff] }
  0xaf   : > { %4915 = vmatprep.mubr.msk.f32.mxu0 %vm6326_vm2, %v6605_v30  ;;  %5354 = vmatpush3.bf16.msra.mxu0 %v5351_v52  ;;  %v5203_v58 = vpack.c.bf16 %v3752_v35, %v3751_v10  ;;  %v3753_v52 = vld [vmem:[%s7358_s2 + $0x1b0] sm:$0xff]  ;;  %v499_v10 = vld [vmem:[%s441_s12 + $0x8] sm:$0xff] }
  0xb0   : > { %5356 = vmatprep.subr.bf16.mxu0 %v6740_v31 }
  0xb1   : > { %4572 = vmatmul.mubr.msk.f32.vlgmr.msra.gmra.mrb[0].mxu1 %vm790_vm0, %v7482_v0  ;;  %v498_v0 = vld [vmem:[%s441_s12] sm:$0xff] }
  0xb2   : > { %4916 = vmatmul.mubr.f32.gmra.mrb[16].mxu0 %v6625_v12  ;;  %5198 = vmatpush3.bf16.msra.mxu1 %v6563_v46  ;;  %v3754_v46 = vld [vmem:[%s7358_s2 + $0x1b8] sm:$0xff] }
  0xb3   : > { %4574 = vmatprep.mubr.f32.mxu1 %v6129_v14  ;;  %4918 = vmatprep.mubr.msk.f32.mxu0 %vm6326_vm2, %v6628_v17  ;;  %v5207_v14 = vpack.c.bf16 %v3754_v46, %v3753_v52  ;;  %v3760_v52 = vld [vmem:[%s7358_s2 + $0x1e8] sm:$0xff]  ;;  %v6827_v46 = vrot.slane %v6483_v16, 7 }
  0xb4   : > { %5200 = vmatprep.subr.bf16.mxu1 %v5199_v29 }
  0xb5   : > { %4575 = vmatmul.mubr.msk.f32.gmra.mrb[2].mxu1 %vm790_vm0, %v6106_v3  ;;  %v3755_v3 = vld [vmem:[%s7358_s2 + $0x1c0] sm:$0xff]  ;;  %7483 = vst [vmem:[#allocation48_spill] sm:$0xff] %v6827_v46 }
  0xb6   : > { %4919 = vmatmul.mubr.f32.gmra.mrb[18].mxu0 %v6647_v18  ;;  %4577 = vmatprep.mubr.f32.mxu1 %v6152_v26  ;;  %v5211_v8 = vpack.c.bf16 %v3756_v53, %v3755_v3  ;;  %v6830_v3 = vmul.f32 0.0, %v498_v0  ;;  %v6832_v53 = vmul.f32 0.0, %v499_v10 }
  0xb7   : > { %4921 = vmatprep.mubr.msk.f32.mxu0 %vm6326_vm2, %v6650_v63  ;;  %5202 = vmatpush3.bf16.msra.mxu1 %v5199_v29  ;;  %v3758_v29 = vld [vmem:[%s7358_s2 + $0x1d8] sm:$0xff] }
  0xb8   : > { %5204 = vmatprep.subr.bf16.mxu1 %v5203_v58  ;;  %v5215_v35 = vpack.c.bf16 %v3758_v29, %v3757_v44  ;;  %v3761_v29 = vld [vmem:[%s7358_s2 + $0x1f0] sm:$0xff]  ;;  %v733_v0 = vrot.slane %v6830_v3, 7  ;;  %v734_v10 = vrot.slane %v6832_v53, 7 }
  0xb9   : > { %4578 = vmatmul.mubr.msk.f32.gmra.mrb[4].mxu1 %vm790_vm0, %v6133_v20 }
  0xba   : > { %4922 = vmatmul.mubr.f32.gmra.mrb[20].mxu0 %v6669_v48  ;;  %4580 = vmatprep.mubr.f32.mxu1 %v6178_v45 }
  0xbb   : > { %4924 = vmatprep.mubr.msk.f32.mxu0 %vm6326_vm2, %v6672_v49  ;;  %5206 = vmatpush3.bf16.msra.mxu1 %v5203_v58  ;;  %v3759_v58 = vld [vmem:[%s7358_s2 + $0x1e0] sm:$0xff] }
  0xbc   : > { %5208 = vmatprep.subr.bf16.mxu1 %v5207_v14  ;;  %v5219_v44 = vpack.c.bf16 %v3760_v52, %v3759_v58  ;;  %v735_v52 = vsel %vm681_vm1, %v733_v0, %v734_v10  ;;  %v7488_v10 = vld [vmem:[#allocation14_spill] sm:$0xff] }
  0xbd   : > { %4581 = vmatmul.mubr.msk.f32.gmra.mrb[6].mxu1 %vm790_vm0, %v6156_v34 }
  0xbe   : > { %4925 = vmatmul.mubr.f32.gmra.mrb[22].mxu0 %v6691_v39  ;;  %4583 = vmatprep.mubr.f32.mxu1 %v6203_v56 }
  0xbf   : > { %4927 = vmatprep.mubr.msk.f32.mxu0 %vm6326_vm2, %v6694_v24  ;;  %5210 = vmatpush3.bf16.msra.mxu1 %v5207_v14  ;;  %v731_v14 = vrot.slane %v6487_v33, 7 }
  0xc0   : > { %5212 = vmatprep.subr.bf16.mxu1 %v5211_v8 }
  0xc1   : > { %4584 = vmatmul.mubr.msk.f32.gmra.mrb[8].mxu1 %vm790_vm0, %v6182_v47 }
  0xc2   : > { %4928 = vmatmul.mubr.f32.gmra.mrb[24].mxu0 %v6713_v1  ;;  %4586 = vmatprep.mubr.f32.mxu1 %v6228_v6 }
  0xc3   : > { %4930 = vmatprep.mubr.msk.f32.mxu0 %vm6326_vm2, %v6716_v50  ;;  %5214 = vmatpush3.bf16.msra.mxu1 %v5211_v8  ;;  %v3762_v50 = vld [vmem:[%s7358_s2 + $0x1f8] sm:$0xff]  ;;  %v6849_v8 = vsel %vm681_vm1, %v6827_v46, %v731_v14 }
  0xc4   : > { %5216 = vmatprep.subr.bf16.mxu1 %v5215_v35  ;;  %7484 = vst [vmem:[#allocation49_spill] sm:$0xff] %v6849_v8  ;;  %v5223_v58 = vpack.c.bf16 %v3762_v50, %v3761_v29  ;;  %v7485_v14 = vld [vmem:[#allocation13_spill] sm:$0xff]  ;;  %v3909_v50 = vld [vmem:[%s7358_s2 + $0x410] sm:$0xff]  ;;  %v7486_v29 = vld [vmem:[#allocation15_spill] sm:$0xff] }
  0xc5   : > { %4587 = vmatmul.mubr.msk.f32.gmra.mrb[10].mxu1 %vm790_vm0, %v6207_v59 }
  0xc6   : > { %4931 = vmatmul.mubr.f32.gmra.mrb[26].mxu0 %v6735_v19  ;;  %4589 = vmatprep.mubr.f32.mxu1 %v6253_v36  ;;  %v5684_v19 = vld [vmem:[%s5851_s20 + $0x18] sm:$0xff] }
  0xc7   : > { %4933 = vmatprep.mubr.msk.f32.mxu0 %vm6326_vm2, %v6827_v46  ;;  %5218 = vmatpush3.bf16.msra.mxu1 %v5215_v35  ;;  %v3910_v35 = vld [vmem:[%s7358_s2 + $0x418] sm:$0xff]  ;;  %v3911_v46 = vld [vmem:[%s7358_s2 + $0x420] sm:$0xff] }
  0xc8   : > { %5220 = vmatprep.subr.bf16.mxu1 %v5219_v44 }
  0xc9   : > { %4590 = vmatmul.mubr.msk.f32.gmra.mrb[12].mxu1 %vm790_vm0, %v6232_v11 }
  0xca   : > { %4934 = vmatmul.mubr.f32.gmra.mrb[28].mxu0 %v6849_v8  ;;  %4592 = vmatprep.mubr.f32.mxu1 %v6278_v60  ;;  %v5683_v8 = vld [vmem:[%s5851_s20 + $0x10] sm:$0xff] }
  0xcb   : > { %4936 = vmatprep.mubr.msk.f32.mxu0 %vm6326_vm2, %v733_v0  ;;  %5222 = vmatpush3.bf16.msra.mxu1 %v5219_v44  ;;  %v5359_v44 = vpack.c.bf16 %v3910_v35, %v3909_v50  ;;  %v7487_v0 = vld [vmem:[#allocation2_spill] sm:$0xff]  ;;  %v3913_v50 = vld [vmem:[%s7358_s2 + $0x430] sm:$0xff]  ;;  %v5686_v35 = vld [vmem:[%s5851_s20 + $0x28] sm:$0xff] }
  0xcc   : > { %5224 = vmatprep.subr.bf16.mxu1 %v5223_v58 }
  0xcd   : > { %4593 = vmatmul.mubr.msk.f32.gmra.mrb[14].mxu1 %vm790_vm0, %v7485_v14 }
  0xce   : > { %4937 = vmatmul.mubr.f32.gmra.mrb[30].mxu0 %v735_v52  ;;  %4595 = vmatprep.mubr.f32.mxu1 %v7486_v29  ;;  %v3912_v52 = vld [vmem:[%s7358_s2 + $0x428] sm:$0xff] }
  0xcf   : > { %4971 = vmatprep.mubr.f32.mxu0 %v5683_v8  ;;  %5226 = vmatpush3.bf16.msra.mxu1 %v5223_v58  ;;  %v5685_v8 = vld [vmem:[%s5851_s20 + $0x20] sm:$0xff]  ;;  %v5363_v58 = vpack.c.bf16 %v3912_v52, %v3911_v46 }
  0xd0   : > { %5387 = vmatprep.subr.bf16.mxu1 %v7487_v0  ;;  %v7489_v52 = vld [vmem:[#allocation18_spill] sm:$0xff] }
  0xd1   : > { %4596 = vmatmul.mubr.msk.f32.gmra.mrb[16].mxu1 %vm790_vm0, %v7488_v10 }
  0xd2   : > { %4972 = vmatmul.mubr.f32.vlgmr.msra.gmra.mrb[0].mxu0 %v5684_v19  ;;  %4598 = vmatprep.mubr.f32.mxu1 %v6332_v32  ;;  %v3914_v19 = vld [vmem:[%s7358_s2 + $0x438] sm:$0xff] }
  0xd3   : > { %5358 = vmatpush3.bf16.msra.mxu0 %v6740_v31  ;;  %4974 = vmatprep.mubr.f32.mxu0 %v5685_v8  ;;  %v5687_v31 = vld [vmem:[%s5851_s20 + $0x30] sm:$0xff]  ;;  %v5367_v46 = vpack.c.bf16 %v3914_v19, %v3913_v50  ;;  %v3915_v8 = vld [vmem:[%s7358_s2 + $0x440] sm:$0xff]  ;;  %v5688_v32 = vld [vmem:[%s5851_s20 + $0x38] sm:$0xff] }
  0xd4   : > { %5360 = vmatprep.subr.bf16.mxu0 %v5359_v44  ;;  %v7491_v50 = vld [vmem:[#allocation21_spill] sm:$0xff]  ;;  %v3917_v19 = vld [vmem:[%s7358_s2 + $0x450] sm:$0xff] }
  0xd5   : > { %4599 = vmatmul.mubr.msk.f32.gmra.mrb[18].mxu1 %vm790_vm0, %v6307_v28  ;;  %v3916_v28 = vld [vmem:[%s7358_s2 + $0x448] sm:$0xff] }
  0xd6   : > { %4975 = vmatmul.mubr.f32.gmra.mrb[2].mxu0 %v5686_v35  ;;  %4601 = vmatprep.mubr.f32.mxu1 %v6359_v7  ;;  %v7490_v35 = vld [vmem:[#allocation24_spill] sm:$0xff]  ;;  %v5689_v7 = vld [vmem:[%s5851_s20 + $0x40] sm:$0xff] }
  0xd7   : > { %4977 = vmatprep.mubr.f32.mxu0 %v5687_v31  ;;  %5362 = vmatpush3.bf16.msra.mxu0 %v5359_v44  ;;  %v5371_v44 = vpack.c.bf16 %v3916_v28, %v3915_v8  ;;  %v3918_v31 = vld [vmem:[%s7358_s2 + $0x458] sm:$0xff]  ;;  %v3920_v8 = vld [vmem:[%s7358_s2 + $0x468] sm:$0xff] }
  0xd8   : > { %5364 = vmatprep.subr.bf16.mxu0 %v5363_v58  ;;  %v7494_v28 = vld [vmem:[#allocation25_spill] sm:$0xff] }
  0xd9   : > { %4602 = vmatmul.mubr.msk.f32.gmra.mrb[20].mxu1 %vm790_vm0, %v7489_v52  ;;  %v7492_v52 = vld [vmem:[#allocation10_spill] sm:$0xff] }
  0xda   : > { %4978 = vmatmul.mubr.f32.gmra.mrb[4].mxu0 %v5688_v32  ;;  %4604 = vmatprep.mubr.f32.mxu1 %v7490_v35  ;;  %v7493_v32 = vld [vmem:[#allocation28_spill] sm:$0xff] }
  0xdb   : > { %4980 = vmatprep.mubr.f32.mxu0 %v5689_v7  ;;  %5366 = vmatpush3.bf16.msra.mxu0 %v5363_v58  ;;  %v5375_v7 = vpack.c.bf16 %v3918_v31, %v3917_v19  ;;  %v3919_v58 = vld [vmem:[%s7358_s2 + $0x460] sm:$0xff]  ;;  %v3921_v19 = vld [vmem:[%s7358_s2 + $0x470] sm:$0xff]  ;;  %v3922_v31 = vld [vmem:[%s7358_s2 + $0x478] sm:$0xff] }
  0xdc   : > { %5368 = vmatprep.subr.bf16.mxu0 %v5367_v46 }
  0xdd   : > { %4605 = vmatmul.mubr.msk.f32.gmra.mrb[22].mxu1 %vm790_vm0, %v7491_v50  ;;  %v7495_v50 = vld [vmem:[#allocation11_spill] sm:$0xff] }
  0xde   : > { %4981 = vmatmul.mubr.f32.gmra.mrb[6].mxu0 %v7492_v52  ;;  %4607 = vmatprep.mubr.f32.mxu1 %v7493_v32  ;;  %v7496_v52 = vld [vmem:[#allocation32_spill] sm:$0xff] }
  0xdf   : > { %4983 = vmatprep.mubr.f32.mxu0 %v6058_v43  ;;  %5370 = vmatpush3.bf16.msra.mxu0 %v5367_v46  ;;  %v7497_v32 = vld [vmem:[#allocation12_spill] sm:$0xff]  ;;  %v5379_v43 = vpack.c.bf16 %v3920_v8, %v3919_v58  ;;  %v7498_v46 = vld [vmem:[#allocation29_spill] sm:$0xff]  ;;  %v7514_v8 = vld [vmem:[#allocation6_spill] sm:$0xff] }
  0xe0   : > { %5372 = vmatprep.subr.bf16.mxu0 %v5371_v44  ;;  %v7501_v58 = vld [vmem:[#allocation37_spill] sm:$0xff] }
  0xe1   : > { %4608 = vmatmul.mubr.msk.f32.gmra.mrb[24].mxu1 %vm790_vm0, %v7494_v28 }
  0xe2   : > { %4984 = vmatmul.mubr.f32.gmra.mrb[8].mxu0 %v7495_v50  ;;  %4610 = vmatprep.mubr.f32.mxu1 %v7496_v52  ;;  %v7499_v50 = vld [vmem:[#allocation36_spill] sm:$0xff] }
  0xe3   : > { %4986 = vmatprep.mubr.f32.mxu0 %v7497_v32  ;;  %5374 = vmatpush3.bf16.msra.mxu0 %v5371_v44  ;;  %v5383_v44 = vpack.c.bf16 %v3922_v31, %v3921_v19  ;;  %v7500_v32 = vld [vmem:[#allocation33_spill] sm:$0xff]  ;;  %v7516_v19 = vld [vmem:[#allocation39_spill] sm:$0xff] }
  0xe4   : > { %5376 = vmatprep.subr.bf16.mxu0 %v5375_v7  ;;  %v7517_v31 = vld [vmem:[#allocation7_spill] sm:$0xff] }
  0xe5   : > { %4611 = vmatmul.mubr.msk.f32.gmra.mrb[26].mxu1 %vm790_vm0, %v7498_v46 }
  0xe6   : > { %4987 = vmatmul.mubr.f32.gmra.mrb[10].mxu0 %v6099_v61  ;;  %4613 = vmatprep.mubr.f32.mxu1 %v7499_v50  ;;  %v7502_v61 = vld [vmem:[#allocation19_spill] sm:$0xff] }
  0xe7   : > { %4989 = vmatprep.mubr.f32.mxu0 %v6102_v62  ;;  %5378 = vmatpush3.bf16.msra.mxu0 %v5375_v7  ;;  %v7503_v62 = vld [vmem:[#allocation22_spill] sm:$0xff] }
  0xe8   : > { %5380 = vmatprep.subr.bf16.mxu0 %v5379_v43  ;;  %v7512_v7 = vld [vmem:[#allocation34_spill] sm:$0xff] }
  0xe9   : > { %4614 = vmatmul.mubr.msk.f32.gmra.mrb[28].mxu1 %vm790_vm0, %v7500_v32 }
  0xea   : > { %4990 = vmatmul.mubr.f32.gmra.mrb[12].mxu0 %v6125_v13  ;;  %4616 = vmatprep.mubr.f32.mxu1 %v6511_v42  ;;  %v7504_v13 = vld [vmem:[#allocation23_spill] sm:$0xff] }
  0xeb   : > { %4992 = vmatprep.mubr.f32.mxu0 %v6148_v25  ;;  %5382 = vmatpush3.bf16.msra.mxu0 %v5379_v43  ;;  %v7505_v25 = vld [vmem:[#allocation3_spill] sm:$0xff]  ;;  %v7515_v43 = vld [vmem:[#allocation38_spill] sm:$0xff] }
  0xec   : > { %5384 = vmatprep.subr.bf16.mxu0 %v5383_v44 }
  0xed   : > { %4617 = vmatmul.mubr.msk.f32.gmra.mrb[30].mxu1 %vm790_vm0, %v7501_v58 }
  0xee   : > { %4993 = vmatmul.mubr.f32.gmra.mrb[14].mxu0 %v6170_v40  ;;  %4651 = vmatprep.mubr.msk.f32.mxu1 %vm6326_vm2, %v7502_v61  ;;  %v7506_v40 = vld [vmem:[#allocation26_spill] sm:$0xff] }
  0xef   : > { %4995 = vmatprep.mubr.f32.mxu0 %v6174_v41  ;;  %5386 = vmatpush3.bf16.msra.mxu0 %v5383_v44  ;;  %v7507_v41 = vld [vmem:[#allocation27_spill] sm:$0xff]  ;;  %v7518_v44 = vld [vmem:[#allocation41_spill] sm:$0xff]  ;;  %v7519_v61 = vld [vmem:[#allocation42_spill] sm:$0xff] }
  0xf1   : > { %4652 = vmatmul.mubr.f32.vlgmr.msra.gmra.mrb[0].mxu1 %v7503_v62  ;;  %v7520_v62 = vld [vmem:[#allocation8_spill] sm:$0xff] }
  0xf2   : > { %4996 = vmatmul.mubr.f32.gmra.mrb[16].mxu0 %v6195_v54  ;;  %5395 = vmatpush3.bf16.msra.mxu1 %v7487_v0  ;;  %v7508_v54 = vld [vmem:[#allocation4_spill] sm:$0xff]  ;;  %v7509_v0 = vld [vmem:[#allocation30_spill] sm:$0xff] }
  0xf3   : > { %4654 = vmatprep.mubr.msk.f32.mxu1 %vm6326_vm2, %v7504_v13  ;;  %4998 = vmatprep.mubr.f32.mxu0 %v6199_v55  ;;  %v7510_v55 = vld [vmem:[#allocation31_spill] sm:$0xff]  ;;  %v7521_v13 = vld [vmem:[#allocation44_spill] sm:$0xff] }
  0xf4   : > { %5388 = vmatprep.subr.bf16.mxu1 %v7505_v25 }
  0xf5   : > { %4655 = vmatmul.mubr.f32.gmra.mrb[2].mxu1 %v7506_v40  ;;  %v7523_v40 = vld [vmem:[#allocation45_spill] sm:$0xff] }
  0xf6   : > { %4999 = vmatmul.mubr.f32.gmra.mrb[18].mxu0 %v6220_v4  ;;  %4657 = vmatprep.mubr.msk.f32.mxu1 %vm6326_vm2, %v7507_v41  ;;  %v7511_v4 = vld [vmem:[#allocation5_spill] sm:$0xff] }
  0xf7   : > { %5001 = vmatprep.mubr.f32.mxu0 %v6224_v5  ;;  %5396 = vmatpush3.bf16.msra.mxu1 %v7505_v25  ;;  %v7513_v5 = vld [vmem:[#allocation35_spill] sm:$0xff]  ;;  %v7522_v25 = vld [vmem:[#allocation9_spill] sm:$0xff] }
  0xf8   : > { %5389 = vmatprep.subr.bf16.mxu1 %v7508_v54 }
  0xf9   : > { %4658 = vmatmul.mubr.f32.gmra.mrb[4].mxu1 %v7509_v0 }
  0xfa   : > { %5002 = vmatmul.mubr.f32.gmra.mrb[20].mxu0 %v6245_v22  ;;  %4660 = vmatprep.mubr.msk.f32.mxu1 %vm6326_vm2, %v7510_v55 }
  0xfb   : > { %5004 = vmatprep.mubr.f32.mxu0 %v6249_v27  ;;  %5397 = vmatpush3.bf16.msra.mxu1 %v7508_v54 }
  0xfc   : > { %5390 = vmatprep.subr.bf16.mxu1 %v7511_v4 }
  0xfd   : > { %4661 = vmatmul.mubr.f32.gmra.mrb[6].mxu1 %v7512_v7 }
  0xfe   : > { %5005 = vmatmul.mubr.f32.gmra.mrb[22].mxu0 %v6270_v51  ;;  %4663 = vmatprep.mubr.msk.f32.mxu1 %vm6326_vm2, %v7513_v5 }
  0xff   : > { %5007 = vmatprep.mubr.f32.mxu0 %v6274_v57  ;;  %5398 = vmatpush3.bf16.msra.mxu1 %v7511_v4 }
 0x100   : > { %5391 = vmatprep.subr.bf16.mxu1 %v7514_v8 }
 0x101   : > { %4664 = vmatmul.mubr.f32.gmra.mrb[8].mxu1 %v7515_v43 }
 0x102   : > { %5008 = vmatmul.mubr.f32.gmra.mrb[24].mxu0 %v6295_v21  ;;  %4666 = vmatprep.mubr.msk.f32.mxu1 %vm6326_vm2, %v7516_v19 }
 0x103   : > { %5010 = vmatprep.mubr.f32.mxu0 %v6299_v37  ;;  %5399 = vmatpush3.bf16.msra.mxu1 %v7514_v8 }
 0x104   : > { %5392 = vmatprep.subr.bf16.mxu1 %v7517_v31 }
 0x105   : > { %4667 = vmatmul.mubr.f32.gmra.mrb[10].mxu1 %v7518_v44 }
 0x106   : > { %5011 = vmatmul.mubr.f32.gmra.mrb[26].mxu0 %v6321_v38  ;;  %4669 = vmatprep.mubr.msk.f32.mxu1 %vm6326_vm2, %v7519_v61 }
 0x107   : > { %5013 = vmatprep.mubr.f32.mxu0 %v6483_v16  ;;  %5400 = vmatpush3.bf16.msra.mxu1 %v7517_v31 }
 0x108   : > { %5393 = vmatprep.subr.bf16.mxu1 %v7520_v62 }
 0x109   : > { %4670 = vmatmul.mubr.f32.gmra.mrb[12].mxu1 %v7521_v13 }
 0x10a   : > { %5014 = vmatmul.mubr.f32.gmra.mrb[28].mxu0 %v6487_v33  ;;  %4672 = vmatprep.mubr.msk.f32.mxu1 %vm6326_vm2, %v6559_v23  ;;  %v7532_v23 = vld [vmem:[#allocation21_spill] sm:$0xff] }
 0x10b   : > { %5016 = vmatprep.mubr.f32.mxu0 %v6830_v3  ;;  %5401 = vmatpush3.bf16.msra.mxu1 %v7520_v62 }
 0x10c   : > { %5394 = vmatprep.subr.bf16.mxu1 %v7522_v25 }
 0x10d   : > { %4673 = vmatmul.mubr.f32.gmra.mrb[14].mxu1 %v7523_v40 }
 0x10e   : > { %5017 = vmatmul.mubr.f32.gmra.mrb[30].mxu0 %v6832_v53  ;;  %4675 = vmatprep.mubr.msk.f32.mxu1 %vm6326_vm2, %v6582_v9  ;;  %v5694_v9 = vld [vmem:[%s5851_s20 + $0xa0] sm:$0xff] }
 0x10f   : > { %5051 = vmatprep.mubr.f32.mxu0 %v6152_v26  ;;  %5402 = vmatpush3.bf16.msra.mxu1 %v7522_v25  ;;  %v7525_v26 = vld [vmem:[#allocation47_spill] sm:$0xff] }
 0x111   : > { %4676 = vmatmul.mubr.f32.gmra.mrb[16].mxu1 %v6602_v2  ;;  %v7533_v2 = vld [vmem:[#allocation28_spill] sm:$0xff] }
 0x112   : > { %5052 = vmatmul.mubr.msk.f32.vlgmr.msra.gmra.mrb[0].mxu0 %vm790_vm0, %v6133_v20  ;;  %4678 = vmatprep.mubr.msk.f32.mxu1 %vm6326_vm2, %v6605_v30  ;;  %v7524_v20 = vld [vmem:[#allocation46_spill] sm:$0xff]  ;;  %v5695_v30 = vld [vmem:[%s5851_s20 + $0xa8] sm:$0xff] }
 0x113   : > { %5054 = vmatprep.mubr.f32.mxu0 %v6178_v45  ;;  %v7527_v45 = vld [vmem:[#allocation17_spill] sm:$0xff] }
 0x115   : > { %4679 = vmatmul.mubr.f32.gmra.mrb[18].mxu1 %v6625_v12  ;;  %v5696_v12 = vld [vmem:[%s5851_s20 + $0xb0] sm:$0xff] }
 0x116   : > { %5055 = vmatmul.mubr.msk.f32.gmra.mrb[2].mxu0 %vm790_vm0, %v6156_v34  ;;  %4681 = vmatprep.mubr.msk.f32.mxu1 %vm6326_vm2, %v6628_v17  ;;  %v7526_v34 = vld [vmem:[#allocation48_spill] sm:$0xff]  ;;  %v842_v17 = vrot.slane %v6830_v3, 1 }
 0x117   : > { %5057 = vmatprep.mubr.f32.mxu0 %v6203_v56  ;;  %v7529_v56 = vld [vmem:[#allocation16_spill] sm:$0xff] }
 0x119   : > { %4682 = vmatmul.mubr.f32.gmra.mrb[20].mxu1 %v6647_v18 }
 0x11a   : > { %5058 = vmatmul.mubr.msk.f32.gmra.mrb[4].mxu0 %vm790_vm0, %v6182_v47  ;;  %4684 = vmatprep.mubr.msk.f32.mxu1 %vm6326_vm2, %v6650_v63  ;;  %v7528_v47 = vld [vmem:[#allocation49_spill] sm:$0xff] }
 0x11b   : > { %5060 = vmatprep.mubr.f32.mxu0 %v6228_v6  ;;  %v7530_v6 = vld [vmem:[#allocation20_spill] sm:$0xff] }
 0x11d   : > { %4685 = vmatmul.mubr.f32.gmra.mrb[22].mxu1 %v6669_v48 }
 0x11e   : > { %5061 = vmatmul.mubr.msk.f32.gmra.mrb[6].mxu0 %vm790_vm0, %v6207_v59  ;;  %4687 = vmatprep.mubr.msk.f32.mxu1 %vm6326_vm2, %v6672_v49  ;;  %v5690_v59 = vld [vmem:[%s5851_s20 + $0x80] sm:$0xff] }
 0x11f   : > { %5063 = vmatprep.mubr.f32.mxu0 %v6253_v36  ;;  %v7531_v36 = vld [vmem:[#allocation18_spill] sm:$0xff] }
 0x121   : > { %4688 = vmatmul.mubr.f32.gmra.mrb[24].mxu1 %v6691_v39 }
 0x122   : > { %5064 = vmatmul.mubr.msk.f32.gmra.mrb[8].mxu0 %vm790_vm0, %v6232_v11  ;;  %4690 = vmatprep.mubr.msk.f32.mxu1 %vm6326_vm2, %v6694_v24  ;;  %v5691_v11 = vld [vmem:[%s5851_s20 + $0x88] sm:$0xff] }
 0x123   : > { %5066 = vmatprep.mubr.f32.mxu0 %v6278_v60  ;;  %v5692_v60 = vld [vmem:[%s5851_s20 + $0x90] sm:$0xff] }
 0x125   : > { %4691 = vmatmul.mubr.f32.gmra.mrb[26].mxu1 %v6713_v1 }
 0x126   : > { %5067 = vmatmul.mubr.msk.f32.gmra.mrb[10].mxu0 %vm790_vm0, %v7485_v14  ;;  %4693 = vmatprep.mubr.msk.f32.mxu1 %vm6326_vm2, %v7524_v20 }
 0x127   : > { %5069 = vmatprep.mubr.f32.mxu0 %v7486_v29 }
 0x129   : > { %4694 = vmatmul.mubr.f32.gmra.mrb[28].mxu1 %v7525_v26 }
 0x12a   : > { %5070 = vmatmul.mubr.msk.f32.gmra.mrb[12].mxu0 %vm790_vm0, %v7488_v10  ;;  %4696 = vmatprep.mubr.msk.f32.mxu1 %vm6326_vm2, %v7526_v34 }
 0x12b   : > { %5072 = vmatprep.mubr.f32.mxu0 %v7527_v45 }
 0x12d   : > { %4697 = vmatmul.mubr.f32.gmra.mrb[30].mxu1 %v7528_v47 }
 0x12e   : > { %5073 = vmatmul.mubr.msk.f32.gmra.mrb[14].mxu0 %vm790_vm0, %v7529_v56  ;;  %4755 = vmatprep.mubr.f32.mxu1 %v5690_v59 }
 0x12f   : > { %5075 = vmatprep.mubr.f32.mxu0 %v7530_v6 }
 0x131   : > { %4756 = vmatmul.mubr.f32.vlgmr.msra.gmra.mrb[16].mxu1 %v5691_v11 }
 0x132   : > { %5076 = vmatmul.mubr.msk.f32.gmra.mrb[16].mxu0 %vm790_vm0, %v7531_v36  ;;  %4758 = vmatprep.mubr.f32.mxu1 %v5692_v60 }
 0x133   : > { %5078 = vmatprep.mubr.f32.mxu0 %v7490_v35 }
 0x135   : > { %4759 = vmatmul.mubr.f32.gmra.mrb[18].mxu1 %v5693_v15 }
 0x136   : > { %5079 = vmatmul.mubr.msk.f32.gmra.mrb[18].mxu0 %vm790_vm0, %v7532_v23  ;;  %4761 = vmatprep.mubr.f32.mxu1 %v5694_v9 }
 0x137   : > { %5081 = vmatprep.mubr.f32.mxu0 %v7533_v2 }
 0x139   : > { %4762 = vmatmul.mubr.f32.gmra.mrb[20].mxu1 %v5695_v30 }
 0x13a   : > { %5082 = vmatmul.mubr.msk.f32.gmra.mrb[20].mxu0 %vm790_vm0, %v7494_v28  ;;  %4764 = vmatprep.mubr.f32.mxu1 %v5696_v12 }
 0x13b   : > { %5084 = vmatprep.mubr.f32.mxu0 %v7496_v52 }
 0x13d   : > { %4765 = vmatmul.mubr.f32.gmra.mrb[22].mxu1 %v6245_v22  ;;  %v843_v22 = vrot.slane %v6832_v53, 1 }
 0x13e   : > { %5085 = vmatmul.mubr.msk.f32.gmra.mrb[22].mxu0 %vm790_vm0, %v7498_v46  ;;  %4767 = vmatprep.mubr.f32.mxu1 %v6249_v27  ;;  %v7534_v27 = vld [vmem:[#allocation43_spill] sm:$0xff] }
 0x13f   : > { %5087 = vmatprep.mubr.f32.mxu0 %v7499_v50 }
 0x141   : > { %4768 = vmatmul.mubr.f32.gmra.mrb[24].mxu1 %v6270_v51  ;;  %v844_v51 = vsel %vm790_vm0, %v842_v17, %v843_v22 }
 0x142   : > { %5088 = vmatmul.mubr.msk.f32.gmra.mrb[24].mxu0 %vm790_vm0, %v7500_v32  ;;  %4770 = vmatprep.mubr.f32.mxu1 %v6274_v57  ;;  %v7535_v57 = vld [vmem:[#allocation40_spill] sm:$0xff] }
 0x143   : > { %5090 = vmatprep.mubr.f32.mxu0 %v6511_v42 }
 0x145   : > { %4771 = vmatmul.mubr.f32.gmra.mrb[26].mxu1 %v6295_v21 }
 0x146   : > { %5091 = vmatmul.mubr.msk.f32.gmra.mrb[26].mxu0 %vm790_vm0, %v7501_v58  ;;  %4773 = vmatprep.mubr.f32.mxu1 %v6299_v37 }
 0x147   : > { %5093 = vmatprep.mubr.f32.mxu0 %v7534_v27 }
 0x149   : > { %4774 = vmatmul.mubr.f32.gmra.mrb[28].mxu1 %v6321_v38 }
 0x14a   : > { %5094 = vmatmul.mubr.msk.f32.gmra.mrb[28].mxu0 %vm790_vm0, %v7535_v57  ;;  %4776 = vmatprep.mubr.f32.mxu1 %v6483_v16 }
 0x14b   : > { %5096 = vmatprep.mubr.f32.mxu0 %v844_v51 }
 0x14d   : > { %4777 = vmatmul.mubr.f32.gmra.mrb[30].mxu1 %v6487_v33 }
 0x14e   : > { %5097 = vmatmul.mubr.msk.f32.gmra.mrb[30].mxu0 %vm790_vm0, %v843_v22 }
 0x1c4   : > { %v4653_v42 = vpop.f32.mrb[0].mxu1 }
 0x1c5   : > { %v1739_v21 = vpop.f32.mrb[1].mxu1 }
 0x1c8   : > { %v4656_v37 = vpop.f32.mrb[2].mxu1 }
 0x1c9   : > { %v1749_v18 = vpop.f32.mrb[3].mxu1 }
 0x1cc   : > { %v4659_v63 = vpop.f32.mrb[4].mxu1 }
 0x1cd   : > { %v1759_v48 = vpop.f32.mrb[5].mxu1 }
 0x1d0   : > { %v4662_v49 = vpop.f32.mrb[6].mxu1 }
 0x1d1   : > { %v1769_v39 = vpop.f32.mrb[7].mxu1 }
 0x1d4   : > { %v4665_v38 = vpop.f32.mrb[8].mxu1 }
 0x1d5   : > { %v1779_v24 = vpop.f32.mrb[9].mxu1 }
 0x1d8   : > { %v4668_v1 = vpop.f32.mrb[10].mxu1 }
 0x1d9   : > { %v1789_v3 = vpop.f32.mrb[11].mxu1 }
 0x1dc   : > { %v4671_v53 = vpop.f32.mrb[12].mxu1 }
 0x1dd   : > { %v1799_v16 = vpop.f32.mrb[13].mxu1 }
 0x1e0   : > { %v4674_v14 = vpop.f32.mrb[14].mxu1 }
 0x1e1   : > { %v1809_v29 = vpop.f32.mrb[15].mxu1 }
 0x1e5   : > { %v5053_v33 = vpop.f32.mrb[0].mxu0 }
 0x1e6   : > { %v7112_v10 = vadd.f32 %v5053_v33, %v4653_v42  ;;  %v3109_v35 = vpop.f32.mrb[1].mxu0 }
 0x1e7   : > { %v7114_v28 = vadd.f32 %v3109_v35, %v1739_v21 }
 0x1e8   : > { %3301 = vst [vmem:[%s7110_s16 + $0x8] sm:$0xff] %v7112_v10 }
 0x1e9   : > { %3300 = vst [vmem:[%s7110_s16] sm:$0xff] %v7114_v28  ;;  %v5056_v52 = vpop.f32.mrb[2].mxu0  ;;  %v3338_v32 = vadd.f32 %v7114_v28, %v7112_v10 }
 0x1ea   : > { %v7120_v46 = vadd.f32 %v5056_v52, %v4656_v37  ;;  %v3119_v50 = vpop.f32.mrb[3].mxu0 }
 0x1eb   : > { %v7124_v58 = vadd.f32 %v3119_v50, %v1749_v18 }
 0x1ec   : > { %3303 = vst [vmem:[%s7110_s16 + $0x18] sm:$0xff] %v7120_v46 }
 0x1ed   : > { %3302 = vst [vmem:[%s7110_s16 + $0x10] sm:$0xff] %v7124_v58  ;;  %v3339_v41 = vadd.f32 %v7124_v58, %v3338_v32  ;;  %v5059_v54 = vpop.f32.mrb[4].mxu0 }
 0x1ee   : > { %v7131_v0 = vadd.f32 %v5059_v54, %v4659_v63  ;;  %v3129_v55 = vpop.f32.mrb[5].mxu0 }
 0x1ef   : > { %v7133_v4 = vadd.f32 %v3129_v55, %v1759_v48  ;;  %v3340_v7 = vadd.f32 %v7120_v46, %v3339_v41 }
 0x1f0   : > { %3305 = vst [vmem:[%s7110_s16 + $0x28] sm:$0xff] %v7131_v0 }
 0x1f1   : > { %3304 = vst [vmem:[%s7110_s16 + $0x20] sm:$0xff] %v7133_v4  ;;  %v3341_v5 = vadd.f32 %v7133_v4, %v3340_v7  ;;  %v5062_v8 = vpop.f32.mrb[6].mxu0 }
 0x1f2   : > { %v7141_v43 = vadd.f32 %v5062_v8, %v4662_v49  ;;  %v3139_v19 = vpop.f32.mrb[7].mxu0 }
 0x1f3   : > { %v7143_v31 = vadd.f32 %v3139_v19, %v1769_v39  ;;  %v3342_v44 = vadd.f32 %v7131_v0, %v3341_v5 }
 0x1f4   : > { %3307 = vst [vmem:[%s7110_s16 + $0x38] sm:$0xff] %v7141_v43 }
 0x1f5   : > { %3306 = vst [vmem:[%s7110_s16 + $0x30] sm:$0xff] %v7143_v31  ;;  %v3343_v61 = vadd.f32 %v7143_v31, %v3342_v44  ;;  %v5065_v62 = vpop.f32.mrb[8].mxu0 }
 0x1f6   : > { %v7151_v13 = vadd.f32 %v5065_v62, %v4665_v38  ;;  %v3149_v25 = vpop.f32.mrb[9].mxu0 }
 0x1f7   : > { %v7153_v40 = vadd.f32 %v3149_v25, %v1779_v24  ;;  %v3344_v20 = vadd.f32 %v7141_v43, %v3343_v61 }
 0x1f8   : > { %3309 = vst [vmem:[%s7110_s16 + $0x48] sm:$0xff] %v7151_v13 }
 0x1f9   : > { %3308 = vst [vmem:[%s7110_s16 + $0x40] sm:$0xff] %v7153_v40  ;;  %v3345_v26 = vadd.f32 %v7153_v40, %v3344_v20  ;;  %v5068_v34 = vpop.f32.mrb[10].mxu0 }
 0x1fa   : > { %v7161_v45 = vadd.f32 %v5068_v34, %v4668_v1  ;;  %v3159_v47 = vpop.f32.mrb[11].mxu0 }
 0x1fb   : > { %v7163_v56 = vadd.f32 %v3159_v47, %v1789_v3  ;;  %v3346_v59 = vadd.f32 %v7151_v13, %v3345_v26 }
 0x1fc   : > { %3311 = vst [vmem:[%s7110_s16 + $0x58] sm:$0xff] %v7161_v45 }
 0x1fd   : > { %3310 = vst [vmem:[%s7110_s16 + $0x50] sm:$0xff] %v7163_v56  ;;  %v3347_v6 = vadd.f32 %v7163_v56, %v3346_v59  ;;  %v5071_v11 = vpop.f32.mrb[12].mxu0 }
 0x1fe   : > { %v7171_v36 = vadd.f32 %v5071_v11, %v4671_v53  ;;  %v3169_v60 = vpop.f32.mrb[13].mxu0 }
 0x1ff   : > { %v7173_v15 = vadd.f32 %v3169_v60, %v1799_v16  ;;  %v3348_v23 = vadd.f32 %v7161_v45, %v3347_v6 }
 0x200   : > { %3313 = vst [vmem:[%s7110_s16 + $0x68] sm:$0xff] %v7171_v36 }
 0x201   : > { %3312 = vst [vmem:[%s7110_s16 + $0x60] sm:$0xff] %v7173_v15  ;;  %v3349_v9 = vadd.f32 %v7173_v15, %v3348_v23  ;;  %v5074_v2 = vpop.f32.mrb[14].mxu0 }
 0x202   : > { %v7181_v30 = vadd.f32 %v5074_v2, %v4674_v14  ;;  %v3179_v12 = vpop.f32.mrb[15].mxu0 }
 0x203   : > { %v7183_v17 = vadd.f32 %v3179_v12, %v1809_v29  ;;  %v3350_v22 = vadd.f32 %v7171_v36, %v3349_v9 }
 0x204   : > { %3315 = vst [vmem:[%s7110_s16 + $0x78] sm:$0xff] %v7181_v30  ;;  %v4757_v27 = vpop.f32.mrb[16].mxu1 }
 0x205   : > { %3314 = vst [vmem:[%s7110_s16 + $0x70] sm:$0xff] %v7183_v17  ;;  %v3351_v51 = vadd.f32 %v7183_v17, %v3350_v22  ;;  %v5077_v57 = vpop.f32.mrb[16].mxu0  ;;  %v2093_v42 = vpop.f32.mrb[17].mxu1 }
 0x206   : > { %v7191_v21 = vadd.f32 %v5077_v57, %v4757_v27  ;;  %v3189_v37 = vpop.f32.mrb[17].mxu0 }
 0x207   : > { %v7193_v18 = vadd.f32 %v3189_v37, %v2093_v42  ;;  %v3352_v63 = vadd.f32 %v7181_v30, %v3351_v51 }
 0x208   : > { %3317 = vst [vmem:[%s7110_s16 + $0x88] sm:$0xff] %v7191_v21  ;;  %v4760_v48 = vpop.f32.mrb[18].mxu1 }
 0x209   : > { %3316 = vst [vmem:[%s7110_s16 + $0x80] sm:$0xff] %v7193_v18  ;;  %v3353_v49 = vadd.f32 %v7193_v18, %v3352_v63  ;;  %v5080_v39 = vpop.f32.mrb[18].mxu0  ;;  %v2103_v38 = vpop.f32.mrb[19].mxu1 }
 0x20a   : > { %v7201_v24 = vadd.f32 %v5080_v39, %v4760_v48  ;;  %v3199_v1 = vpop.f32.mrb[19].mxu0 }
 0x20b   : > { %v7203_v3 = vadd.f32 %v3199_v1, %v2103_v38  ;;  %v3354_v53 = vadd.f32 %v7191_v21, %v3353_v49 }
 0x20c   : > { %3319 = vst [vmem:[%s7110_s16 + $0x98] sm:$0xff] %v7201_v24  ;;  %v4763_v16 = vpop.f32.mrb[20].mxu1 }
 0x20d   : > { %3318 = vst [vmem:[%s7110_s16 + $0x90] sm:$0xff] %v7203_v3  ;;  %v3355_v14 = vadd.f32 %v7203_v3, %v3354_v53  ;;  %v5083_v29 = vpop.f32.mrb[20].mxu0  ;;  %v2113_v33 = vpop.f32.mrb[21].mxu1 }
 0x20e   : > { %v7211_v35 = vadd.f32 %v5083_v29, %v4763_v16  ;;  %v3209_v52 = vpop.f32.mrb[21].mxu0 }
 0x20f   : > { %v7213_v50 = vadd.f32 %v3209_v52, %v2113_v33  ;;  %v3356_v32 = vadd.f32 %v7201_v24, %v3355_v14 }
 0x210   : > { %3321 = vst [vmem:[%s7110_s16 + $0xa8] sm:$0xff] %v7211_v35  ;;  %v4766_v41 = vpop.f32.mrb[22].mxu1 }
 0x211   : > { %3320 = vst [vmem:[%s7110_s16 + $0xa0] sm:$0xff] %v7213_v50  ;;  %v3357_v54 = vadd.f32 %v7213_v50, %v3356_v32  ;;  %v5086_v55 = vpop.f32.mrb[22].mxu0  ;;  %v2123_v7 = vpop.f32.mrb[23].mxu1 }
 0x212   : > { %v7221_v5 = vadd.f32 %v5086_v55, %v4766_v41  ;;  %v3219_v8 = vpop.f32.mrb[23].mxu0 }
 0x213   : > { %v7223_v19 = vadd.f32 %v3219_v8, %v2123_v7  ;;  %v3358_v44 = vadd.f32 %v7211_v35, %v3357_v54 }
 0x214   : > { %3323 = vst [vmem:[%s7110_s16 + $0xb8] sm:$0xff] %v7221_v5  ;;  %v4769_v61 = vpop.f32.mrb[24].mxu1 }
 0x215   : > { %3322 = vst [vmem:[%s7110_s16 + $0xb0] sm:$0xff] %v7223_v19  ;;  %v3359_v62 = vadd.f32 %v7223_v19, %v3358_v44  ;;  %v5089_v25 = vpop.f32.mrb[24].mxu0  ;;  %v2133_v20 = vpop.f32.mrb[25].mxu1 }
 0x216   : > { %v7231_v26 = vadd.f32 %v5089_v25, %v4769_v61  ;;  %v3229_v34 = vpop.f32.mrb[25].mxu0 }
 0x217   : > { %v7233_v47 = vadd.f32 %v3229_v34, %v2133_v20  ;;  %v3360_v59 = vadd.f32 %v7221_v5, %v3359_v62 }
 0x218   : > { %3325 = vst [vmem:[%s7110_s16 + $0xc8] sm:$0xff] %v7231_v26  ;;  %v4772_v6 = vpop.f32.mrb[26].mxu1 }
 0x219   : > { %3324 = vst [vmem:[%s7110_s16 + $0xc0] sm:$0xff] %v7233_v47  ;;  %v3361_v11 = vadd.f32 %v7233_v47, %v3360_v59  ;;  %v5092_v60 = vpop.f32.mrb[26].mxu0  ;;  %v2143_v23 = vpop.f32.mrb[27].mxu1 }
 0x21a   : > { %v7241_v9 = vadd.f32 %v5092_v60, %v4772_v6  ;;  %v3239_v2 = vpop.f32.mrb[27].mxu0 }
 0x21b   : > { %v7243_v12 = vadd.f32 %v3239_v2, %v2143_v23  ;;  %v3362_v22 = vadd.f32 %v7231_v26, %v3361_v11 }
 0x21c   : > { %3327 = vst [vmem:[%s7110_s16 + $0xd8] sm:$0xff] %v7241_v9  ;;  %v4775_v27 = vpop.f32.mrb[28].mxu1 }
 0x21d   : > { %3326 = vst [vmem:[%s7110_s16 + $0xd0] sm:$0xff] %v7243_v12  ;;  %v3363_v51 = vadd.f32 %v7243_v12, %v3362_v22  ;;  %v5095_v57 = vpop.f32.mrb[28].mxu0  ;;  %v2153_v42 = vpop.f32.mrb[29].mxu1 }
 0x21e   : > { %v7251_v37 = vadd.f32 %v5095_v57, %v4775_v27  ;;  %v3249_v63 = vpop.f32.mrb[29].mxu0 }
 0x21f   : > { %v7253_v48 = vadd.f32 %v3249_v63, %v2153_v42  ;;  %v3364_v49 = vadd.f32 %v7241_v9, %v3363_v51 }
 0x220   : > { %3329 = vst [vmem:[%s7110_s16 + $0xe8] sm:$0xff] %v7251_v37  ;;  %v4778_v39 = vpop.f32.mrb[30].mxu1 }
 0x221   : > { %3328 = vst [vmem:[%s7110_s16 + $0xe0] sm:$0xff] %v7253_v48  ;;  %v3365_v38 = vadd.f32 %v7253_v48, %v3364_v49  ;;  %v5098_v1 = vpop.f32.mrb[30].mxu0  ;;  %v2163_v53 = vpop.f32.mrb[31].mxu1 }
 0x222   : > { %v7261_v16 = vadd.f32 %v5098_v1, %v4778_v39  ;;  %v3259_v14 = vpop.f32.mrb[31].mxu0 }
 0x223   : > { %v7263_v29 = vadd.f32 %v3259_v14, %v2163_v53  ;;  %v3366_v33 = vadd.f32 %v7251_v37, %v3365_v38 }
 0x224   : > { %3331 = vst [vmem:[%s7110_s16 + $0xf8] sm:$0xff] %v7261_v16 }
 0x225   : > { %3330 = vst [vmem:[%s7110_s16 + $0xf0] sm:$0xff] %v7263_v29  ;;  %v3367_v52 = vadd.f32 %v7263_v29, %v3366_v33 }
 0x227   : > { %v3368_v32 = vadd.f32 %v7261_v16, %v3367_v52 }
 0x229   : > { %v3369_v41 = vrot.slane %v3368_v32, 4 }
 0x22b   : > { %v3370_v54 = vadd.f32 %v3369_v41, %v3368_v32 }
 0x22d   : > { %v3371_v55 = vrot.slane %v3370_v54, 2 }
 0x22f   : > { %v3372_v7 = vadd.f32 %v3371_v55, %v3370_v54 }
 0x231   : > { %v3373_v8 = vrot.slane %v3372_v7, 1 }
 0x233   : > { %v7272_v44 = vadd.f32 %v3373_v8, %v3372_v7 }
 0x235   : > { %v7275_v61 = vmul.f32 0.00390625, %v7272_v44 }
 0x237   : > { %v3378_v62 = vsub.f32 %v7114_v28, %v7275_v61  ;;  %v3379_v25 = vsub.f32 %v7112_v10, %v7275_v61  ;;  %v3380_v20 = vsub.f32 %v7124_v58, %v7275_v61  ;;  %v3381_v6 = vsub.f32 %v7120_v46, %v7275_v61 }
 0x238   : > { %v3382_v11 = vsub.f32 %v7133_v4, %v7275_v61  ;;  %v3383_v2 = vsub.f32 %v7131_v0, %v7275_v61  ;;  %v3384_v10 = vsub.f32 %v7143_v31, %v7275_v61  ;;  %v3385_v51 = vsub.f32 %v7141_v43, %v7275_v61 }
 0x239   : > { %v3410_v34 = vmul.f32 %v3378_v62, %v3378_v62  ;;  %v3411_v59 = vmul.f32 %v3379_v25, %v3379_v25  ;;  %v3412_v60 = vmul.f32 %v3380_v20, %v3380_v20  ;;  %v3413_v28 = vmul.f32 %v3381_v6, %v3381_v6 }
 0x23a   : > { %v3414_v27 = vmul.f32 %v3382_v11, %v3382_v11  ;;  %v3415_v57 = vmul.f32 %v3383_v2, %v3383_v2  ;;  %v3386_v4 = vsub.f32 %v7153_v40, %v7275_v61  ;;  %v3416_v42 = vmul.f32 %v3384_v10, %v3384_v10 }
 0x23b   : > { %v3442_v23 = vadd.f32 %v3411_v59, %v3410_v34  ;;  %v3387_v0 = vsub.f32 %v7151_v13, %v7275_v61  ;;  %v3417_v49 = vmul.f32 %v3385_v51, %v3385_v51  ;;  %v3388_v31 = vsub.f32 %v7163_v56, %v7275_v61 }
 0x23c   : > { %v3418_v38 = vmul.f32 %v3386_v4, %v3386_v4  ;;  %v3389_v43 = vsub.f32 %v7161_v45, %v7275_v61  ;;  %v3390_v40 = vsub.f32 %v7173_v15, %v7275_v61  ;;  %v3391_v13 = vsub.f32 %v7171_v36, %v7275_v61 }
 0x23d   : > { %v3443_v22 = vadd.f32 %v3442_v23, %v3412_v60  ;;  %v3419_v53 = vmul.f32 %v3387_v0, %v3387_v0  ;;  %v3420_v33 = vmul.f32 %v3388_v31, %v3388_v31  ;;  %v3392_v56 = vsub.f32 %v7183_v17, %v7275_v61 }
 0x23e   : > { %v3421_v32 = vmul.f32 %v3389_v43, %v3389_v43  ;;  %v3422_v54 = vmul.f32 %v3390_v40, %v3390_v40  ;;  %v3393_v45 = vsub.f32 %v7181_v30, %v7275_v61  ;;  %v3423_v7 = vmul.f32 %v3391_v13, %v3391_v13 }
 0x23f   : > { %v3444_v58 = vadd.f32 %v3443_v22, %v3413_v28  ;;  %v3394_v15 = vsub.f32 %v7193_v18, %v7275_v61  ;;  %v3424_v62 = vmul.f32 %v3392_v56, %v3392_v56  ;;  %v3395_v36 = vsub.f32 %v7191_v21, %v7275_v61 }
 0x240   : > { %v3425_v20 = vmul.f32 %v3393_v45, %v3393_v45  ;;  %v3396_v17 = vsub.f32 %v7203_v3, %v7275_v61  ;;  %v3397_v30 = vsub.f32 %v7201_v24, %v7275_v61  ;;  %v3398_v18 = vsub.f32 %v7213_v50, %v7275_v61 }
 0x241   : > { %v3445_v46 = vadd.f32 %v3444_v58, %v3414_v27  ;;  %v3426_v59 = vmul.f32 %v3394_v15, %v3394_v15  ;;  %v3427_v11 = vmul.f32 %v3395_v36, %v3395_v36  ;;  %v3399_v21 = vsub.f32 %v7211_v35, %v7275_v61 }
 0x242   : > { %v3428_v23 = vmul.f32 %v3396_v17, %v3396_v17  ;;  %v3429_v28 = vmul.f32 %v3397_v30, %v3397_v30  ;;  %v3400_v3 = vsub.f32 %v7223_v19, %v7275_v61  ;;  %v3430_v10 = vmul.f32 %v3398_v18, %v3398_v18 }
 0x243   : > { %v3446_v63 = vadd.f32 %v3445_v46, %v3415_v57  ;;  %v3401_v24 = vsub.f32 %v7221_v5, %v7275_v61  ;;  %v3431_v58 = vmul.f32 %v3399_v21, %v3399_v21  ;;  %v3402_v50 = vsub.f32 %v7233_v47, %v7275_v61 }
 0x244   : > { %v3432_v57 = vmul.f32 %v3400_v3, %v3400_v3  ;;  %v3403_v35 = vsub.f32 %v7231_v26, %v7275_v61  ;;  %v3404_v19 = vsub.f32 %v7243_v12, %v7275_v61  ;;  %v3405_v5 = vsub.f32 %v7241_v9, %v7275_v61 }
 0x245   : > { %v3447_v39 = vadd.f32 %v3446_v63, %v3416_v42  ;;  %v3433_v4 = vmul.f32 %v3401_v24, %v3401_v24  ;;  %v3434_v63 = vmul.f32 %v3402_v50, %v3402_v50  ;;  %v3406_v47 = vsub.f32 %v7253_v48, %v7275_v61 }
 0x246   : > { %v3436_v31 = vmul.f32 %v3404_v19, %v3404_v19  ;;  %v3407_v26 = vsub.f32 %v7251_v37, %v7275_v61  ;;  %v3408_v12 = vsub.f32 %v7263_v29, %v7275_v61  ;;  %v3409_v9 = vsub.f32 %v7261_v16, %v7275_v61 }
 0x247   : > { %v3448_v1 = vadd.f32 %v3447_v39, %v3417_v49  ;;  %v3435_v49 = vmul.f32 %v3403_v35, %v3403_v35 }
 0x248   : > { %v3439_v40 = vmul.f32 %v3407_v26, %v3407_v26  ;;  %v3441_v13 = vmul.f32 %v3409_v9, %v3409_v9 }
 0x249   : > { %v3449_v14 = vadd.f32 %v3448_v1, %v3418_v38  ;;  %v3437_v1 = vmul.f32 %v3405_v5, %v3405_v5 }
 0x24b   : > { %v3450_v52 = vadd.f32 %v3449_v14, %v3419_v53  ;;  %v3438_v53 = vmul.f32 %v3406_v47, %v3406_v47 }
 0x24d   : > { %v3451_v41 = vadd.f32 %v3450_v52, %v3420_v33  ;;  %v3440_v52 = vmul.f32 %v3408_v12, %v3408_v12 }
 0x24f   : > { %v3452_v55 = vadd.f32 %v3451_v41, %v3421_v32 }
 0x251   : > { %v3453_v8 = vadd.f32 %v3452_v55, %v3422_v54 }
 0x253   : > { %v3454_v25 = vadd.f32 %v3453_v8, %v3423_v7 }
 0x255   : > { %v3455_v34 = vadd.f32 %v3454_v25, %v3424_v62 }
 0x257   : > { %v3456_v6 = vadd.f32 %v3455_v34, %v3425_v20 }
 0x259   : > { %v3457_v60 = vadd.f32 %v3456_v6, %v3426_v59 }
 0x25b   : > { %v3458_v2 = vadd.f32 %v3457_v60, %v3427_v11 }
 0x25d   : > { %v3459_v22 = vadd.f32 %v3458_v2, %v3428_v23 }
 0x25f   : > { %v3460_v27 = vadd.f32 %v3459_v22, %v3429_v28 }
 0x261   : > { %v3461_v51 = vadd.f32 %v3460_v27, %v3430_v10 }
 0x263   : > { %v3462_v46 = vadd.f32 %v3461_v51, %v3431_v58 }
 0x265   : > { %v3463_v42 = vadd.f32 %v3462_v46, %v3432_v57 }
 0x267   : > { %v3464_v0 = vadd.f32 %v3463_v42, %v3433_v4 }
 0x269   : > { %v3465_v39 = vadd.f32 %v3464_v0, %v3434_v63 }
 0x26b   : > { %v3466_v38 = vadd.f32 %v3465_v39, %v3435_v49 }
 0x26d   : > { %v3467_v43 = vadd.f32 %v3466_v38, %v3436_v31 }
 0x26f   : > { %v3468_v14 = vadd.f32 %v3467_v43, %v3437_v1 }
 0x271   : > { %v3469_v33 = vadd.f32 %v3468_v14, %v3438_v53 }
 0x273   : > { %v3470_v48 = vadd.f32 %v3469_v33, %v3439_v40 }
 0x275   : > { %v3471_v32 = vadd.f32 %v3470_v48, %v3440_v52 }
 0x277   : > { %v3472_v41 = vadd.f32 %v3471_v32, %v3441_v13 }
 0x279   : > { %v3473_v56 = vrot.slane %v3472_v41, 4 }
 0x27b   : > { %v3474_v37 = vadd.f32 %v3473_v56, %v3472_v41 }
 0x27d   : > { %v3475_v54 = vrot.slane %v3474_v37, 2 }
 0x27f   : > { %v3476_v55 = vadd.f32 %v3475_v54, %v3474_v37 }
 0x281   : > { %v3477_v45 = vrot.slane %v3476_v55, 1 }
 0x283   : > { %v3478_v29 = vadd.f32 %v3477_v45, %v3476_v55 }
 0x285   : > { %v3479_v16 = vsel %vm681_vm1, %v7272_v44, %v3478_v29 }
 0x286   : > { %3480 = vst [vmem:[%s461_s21] sm:$0x3] %v3479_v16 }
 0x287 PF: > { %s18_s24 = sadd.s32 1, %s5719_s24   ;;  %s7536_s23 = smov %s5715_s1 }
 0x288   : > { %p15_p5 = scmp.ge.s32.totalorder %s18_s24, 4   ;;  %s7537_s1 = smov %s7539_s25 }
 0x28a   :  { %17 = sbr.rel (!%p15_p5) target bundleno = 2 (0x2), region = 100 }

// kernel: double_conv.4
= control target key start
LH: loop header
LB: loop body
LE: loop exit
PB: predicated region body
PF: predicated region fallthrough
CT: control target
= control target key end

     0   :  { %s5871_s24 = smov 0   ;;  %s5873_s25 = smov 0   ;;  %s7585_s0 = inlined_call_operand.vmem [shape: f32[1,128], index: 0, kind: input, shape index: {}]   ;;  %s7586_s1 = inlined_call_operand.vmem [shape: f32[1,128], index: 1, kind: input, shape index: {}]   ;;  %s7587_s2 = inlined_call_operand.vmem [shape: f32[9,128,128], index: 2, kind: input, shape index: {}]   ;;  %s7588_s3 = inlined_call_operand.vmem [shape: f32[2,16,16,128], index: 3, kind: input, shape index: {}, may-alias: {3,4,5}]   ;;  %s7589_s4 = inlined_call_operand.vmem [shape: f32[2,16,16,128], index: 4, kind: input, shape index: {}, may-alias: {3,4,5}]   ;;  %s7590_s5 = inlined_call_operand.vmem [shape: f32[2,16,16,128], index: 5, kind: input, shape index: {}, may-alias: {3,4,5}]   ;;  %s7591_s6 = inlined_call_operand.vmem [shape: f32[2,16,16,128], index: 6, kind: output, shape index: {0}]   ;;  %s7592_s7 = inlined_call_operand.vmem [shape: f32[2,2,128], index: 7, kind: output, shape index: {1}]  }
   0x1   :  { %s5875_s26 = smov 0  }
   0x2 LB: > { %s30_s27 = sadd.s32 1, %s5825_s25  ;;  %p3779_p0 = scmp.ge.s32.totalorder %s5829_s26, 1  ;;  %s5829_s26 = sphi %s5875_s26, %s18_s26   ;;  %s5825_s25 = sphi %s5873_s25, %s7794_s25   ;;  %s5821_s24 = sphi %s5871_s24, %s7793_s24  }
   0x3   : > { %p32_p1 = scmp.ge.s32.totalorder %s30_s27, 2  ;;  %p328_p2 = scmp.lt.s32.totalorder %s5829_s26, 3 }
   0x5   : > { %s7796_s27 = smov (%p32_p1, %s30_s27), 0  ;;  %p329_p3 = pnand %p3779_p0, %p328_p2 }
   0x7   : > { %332 = sbr.rel (%p329_p3) target bundleno = 647 (0x287), region = 44 }
   0xe   : > { %v3791_v0 = vld [vmem:[%s7587_s2 + $0x80] sm:$0xff]  ;;  %v3792_v1 = vld [vmem:[%s7587_s2 + $0x88] sm:$0xff]  ;;  %p402_p4 = scmp.lt.s32.totalorder %s5821_s24, 1  ;;  %v3793_v5 = vld [vmem:[%s7587_s2 + $0x90] sm:$0xff]  ;;  %vm912_vm0 = vcmask 1046528   ;;  %vm803_vm1 = vcmask 1040384  }
   0xf   : > { %v3919_v2 = vld [vmem:[%s7587_s2 + $0x200] sm:$0xff]  ;;  %v5223_v3 = vpack.c.bf16 %v3792_v1, %v3791_v0  ;;  %v3920_v4 = vld [vmem:[%s7587_s2 + $0x208] sm:$0xff]  ;;  %v3794_v6 = vld [vmem:[%s7587_s2 + $0x98] sm:$0xff] }
  0x10   : > { %v5907_v7 = vpack.c.bf16 %v3920_v4, %v3919_v2  ;;  %v5227_v8 = vpack.c.bf16 %v3794_v6, %v3793_v5  ;;  %v3921_v9 = vld [vmem:[%s7587_s2 + $0x210] sm:$0xff]  ;;  %v3922_v10 = vld [vmem:[%s7587_s2 + $0x218] sm:$0xff]  ;;  %v3795_v11 = vld [vmem:[%s7587_s2 + $0xa0] sm:$0xff]  ;;  %s7798_s24 = smov (!%p402_p4, %s5821_s24), 1 }
  0x11   : > { %5224 = vmatprep.subr.bf16.mxu1 %v5223_v3  ;;  %v5920_v12 = vpack.c.bf16 %v3922_v10, %v3921_v9  ;;  %v3796_v13 = vld [vmem:[%s7587_s2 + $0xa8] sm:$0xff]  ;;  %v3923_v14 = vld [vmem:[%s7587_s2 + $0x220] sm:$0xff]  ;;  %s5933_s10 = sshll.u32 %s7798_s24, 8  ;;  %v3797_v18 = vld [vmem:[%s7587_s2 + $0xb0] sm:$0xff] }
  0x12   : > { %7675 = vst [vmem:[#allocation2_spill] sm:$0xff] %v5907_v7  ;;  %v3924_v15 = vld [vmem:[%s7587_s2 + $0x228] sm:$0xff]  ;;  %5352 = vmatprep.subr.bf16.mxu0 %v5907_v7  ;;  %5226 = vmatpush3.bf16.msra.mxu1 %v5223_v3  ;;  %v5231_v16 = vpack.c.bf16 %v3796_v13, %v3795_v11  ;;  %v3798_v19 = vld [vmem:[%s7587_s2 + $0xb8] sm:$0xff]  ;;  %v3925_v20 = vld [vmem:[%s7587_s2 + $0x230] sm:$0xff]  ;;  %s5955_s21 = scalar_lea.vmem %s7589_s4, %s5933_s10  ;;  %s5961_s28 = scalar_lea.vmem %s7588_s3, %s5933_s10 }
  0x13   : > { %7676 = vst [vmem:[#allocation3_spill] sm:$0xff] %v5920_v12  ;;  %5354 = vmatpush3.bf16.msra.mxu0 %v5907_v7  ;;  %5228 = vmatprep.subr.bf16.mxu1 %v5227_v8  ;;  %v5937_v17 = vpack.c.bf16 %v3924_v15, %v3923_v14  ;;  %v3926_v21 = vld [vmem:[%s7587_s2 + $0x238] sm:$0xff]  ;;  %v5235_v22 = vpack.c.bf16 %v3798_v19, %v3797_v18  ;;  %v3799_v23 = vld [vmem:[%s7587_s2 + $0xc0] sm:$0xff]  ;;  %v3800_v24 = vld [vmem:[%s7587_s2 + $0xc8] sm:$0xff]  ;;  %s4068_s17 = sadd.s32 240, %s5933_s10  ;;  %s7339_s9 = scalar_lea.vmem %s7591_s6, %s5933_s10 }
  0x14   : > { %5356 = vmatprep.subr.bf16.mxu0 %v5920_v12  ;;  %v5971_v25 = vpack.c.bf16 %v3926_v21, %v3925_v20  ;;  %v3927_v26 = vld [vmem:[%s7587_s2 + $0x240] sm:$0xff]  ;;  %v3928_v27 = vld [vmem:[%s7587_s2 + $0x248] sm:$0xff]  ;;  %v5239_v34 = vpack.c.bf16 %v3800_v24, %v3799_v23  ;;  %v3801_v36 = vld [vmem:[%s7587_s2 + $0xd0] sm:$0xff]  ;;  %s441_s29 = scalar_lea.vmem %s7590_s5, %s4068_s17  ;;  %s3788_s10 = sshll.u32 %s7798_s24, 1 }
  0x15   : > { %7677 = vst [vmem:[#allocation4_spill] sm:$0xff] %v5937_v17  ;;  %v464_v28 = vld [vmem:[%s5955_s21] sm:$0xff]  ;;  %v5995_v35 = vpack.c.bf16 %v3928_v27, %v3927_v26  ;;  %v3802_v37 = vld [vmem:[%s7587_s2 + $0xd8] sm:$0xff]  ;;  %v3929_v40 = vld [vmem:[%s7587_s2 + $0x250] sm:$0xff]  ;;  %s461_s13 = scalar_lea.vmem %s7592_s7, %s3788_s10 }
  0x16   : > { %5230 = vmatpush3.bf16.msra.mxu1 %v5227_v8  ;;  %7678 = vst [vmem:[#allocation5_spill] sm:$0xff] %v5971_v25  ;;  %v5983_v29 = vld [vmem:[%s7585_s0] ss:$0 sm:$0xff]  ;;  %v3930_v41 = vld [vmem:[%s7587_s2 + $0x258] sm:$0xff]  ;;  %v465_v44 = vld [vmem:[%s5955_s21 + $0x8] sm:$0xff]  ;;  %v5243_v45 = vpack.c.bf16 %v3802_v37, %v3801_v36 }
  0x17   : > { %5358 = vmatpush3.bf16.msra.mxu0 %v5920_v12  ;;  %5232 = vmatprep.subr.bf16.mxu1 %v5231_v16  ;;  %v5988_v30 = vld [vmem:[%s7586_s1] ss:$0 sm:$0xff]  ;;  %v507_v32 = vmul.f32 %v5983_v29, %v464_v28  ;;  %7679 = vst [vmem:[#allocation6_spill] sm:$0xff] %v5995_v35  ;;  %v6016_v46 = vpack.c.bf16 %v3930_v41, %v3929_v40  ;;  %v3804_v48 = vld [vmem:[%s7587_s2 + $0xe8] sm:$0xff]  ;;  %v3805_v56 = vld [vmem:[%s7587_s2 + $0xf0] sm:$0xff] }
  0x18   : > { %5360 = vmatprep.subr.bf16.mxu0 %v5937_v17  ;;  %v466_v31 = vld [vmem:[%s5961_s28] sm:$0xff]  ;;  %v3932_v51 = vld [vmem:[%s7587_s2 + $0x268] sm:$0xff]  ;;  %v508_v52 = vmul.f32 %v5983_v29, %v465_v44  ;;  %v3806_v57 = vld [vmem:[%s7587_s2 + $0xf8] sm:$0xff] }
  0x19   : > { %v509_v33 = vmul.f32 %v5983_v29, %v466_v31  ;;  %v550_v38 = vadd.f32 %v5988_v30, %v507_v32  ;;  %7680 = vst [vmem:[#allocation7_spill] sm:$0xff] %v6016_v46  ;;  %v3803_v47 = vld [vmem:[%s7587_s2 + $0xe0] sm:$0xff]  ;;  %v467_v54 = vld [vmem:[%s5961_s28 + $0x8] sm:$0xff]  ;;  %v3933_v58 = vld [vmem:[%s7587_s2 + $0x270] sm:$0xff]  ;;  %v5251_v63 = vpack.c.bf16 %v3806_v57, %v3805_v56 }
  0x1a   : > { %5234 = vmatpush3.bf16.msra.mxu1 %v5231_v16  ;;  %v3931_v50 = vld [vmem:[%s7587_s2 + $0x260] sm:$0xff]  ;;  %v5247_v53 = vpack.c.bf16 %v3804_v48, %v3803_v47  ;;  %v3934_v59 = vld [vmem:[%s7587_s2 + $0x278] sm:$0xff]  ;;  %v551_v60 = vadd.f32 %v5988_v30, %v508_v52  ;;  %v468_v61 = vld [vmem:[%s5961_s28 + $0x10] sm:$0xff]  ;;  %v510_v62 = vmul.f32 %v5983_v29, %v467_v54 }
  0x1b   : > { %5362 = vmatpush3.bf16.msra.mxu0 %v5937_v17  ;;  %5236 = vmatprep.subr.bf16.mxu1 %v5235_v22  ;;  %v552_v39 = vadd.f32 %v5988_v30, %v509_v33  ;;  %v586_v42 = vmax.f32 %v550_v38, 0.0  ;;  %v6038_v55 = vpack.c.bf16 %v3932_v51, %v3931_v50  ;;  %v469_v0 = vld [vmem:[%s5961_s28 + $0x18] sm:$0xff]  ;;  %v6058_v1 = vpack.c.bf16 %v3934_v59, %v3933_v58  ;;  %v1021_v2 = vld [vmem:[%s7587_s2] sm:$0xff]  ;;  %v1022_v3 = vld [vmem:[%s7587_s2 + $0x8] sm:$0xff] }
  0x1c   : > { %5364 = vmatprep.subr.bf16.mxu0 %v5971_v25  ;;  %v511_v4 = vmul.f32 %v5983_v29, %v468_v61  ;;  %v470_v5 = vld [vmem:[%s5961_s28 + $0x20] sm:$0xff]  ;;  %v587_v6 = vmax.f32 %v551_v60, 0.0  ;;  %v3936_v9 = vld [vmem:[%s7587_s2 + $0x288] sm:$0xff]  ;;  %v553_v10 = vadd.f32 %v5988_v30, %v510_v62  ;;  %v512_v11 = vmul.f32 %v5983_v29, %v469_v0  ;;  %v472_v19 = vld [vmem:[%s5961_s28 + $0x30] sm:$0xff] }
  0x1d   : > { %v6011_v43 = vmax.f32 %v552_v39, 0.0  ;;  %v6024_v49 = vmul.f32 0.0, %v586_v42  ;;  %7681 = vst [vmem:[#allocation8_spill] sm:$0xff] %v6038_v55  ;;  %7682 = vst [vmem:[#allocation9_spill] sm:$0xff] %v6058_v1  ;;  %v3935_v8 = vld [vmem:[%s7587_s2 + $0x280] sm:$0xff]  ;;  %v5255_v13 = vpack.c.bf16 %v1022_v3, %v1021_v2  ;;  %v513_v14 = vmul.f32 %v5983_v29, %v470_v5  ;;  %v471_v15 = vld [vmem:[%s5961_s28 + $0x28] sm:$0xff] }
  0x1e   : > { %5238 = vmatpush3.bf16.msra.mxu1 %v5235_v22  ;;  %v5383_v16 = vpack.c.bf16 %v3936_v9, %v3935_v8  ;;  %v554_v18 = vadd.f32 %v5988_v30, %v511_v4  ;;  %v6082_v20 = vmul.f32 0.0, %v587_v6  ;;  %v3937_v21 = vld [vmem:[%s7587_s2 + $0x290] sm:$0xff]  ;;  %v3938_v22 = vld [vmem:[%s7587_s2 + $0x298] sm:$0xff]  ;;  %v6090_v23 = vmax.f32 %v553_v10, 0.0  ;;  %v3939_v37 = vld [vmem:[%s7587_s2 + $0x2a0] sm:$0xff] }
  0x1f   : > { %5366 = vmatpush3.bf16.msra.mxu0 %v5971_v25  ;;  %5240 = vmatprep.subr.bf16.mxu1 %v5239_v34  ;;  %v555_v24 = vadd.f32 %v5988_v30, %v512_v11  ;;  %v1023_v26 = vld [vmem:[%s7587_s2 + $0x10] sm:$0xff]  ;;  %v1024_v27 = vld [vmem:[%s7587_s2 + $0x18] sm:$0xff]  ;;  %v514_v28 = vmul.f32 %v5983_v29, %v471_v15  ;;  %v556_v31 = vadd.f32 %v5988_v30, %v513_v14  ;;  %v474_v38 = vld [vmem:[%s5961_s28 + $0x40] sm:$0xff] }
  0x20   : > { %5368 = vmatprep.subr.bf16.mxu0 %v5995_v35  ;;  %4855 = vmatprep.mubr.f32.mxu0 %v6011_v43  ;;  %v515_v32 = vmul.f32 %v5983_v29, %v472_v19  ;;  %v473_v33 = vld [vmem:[%s5961_s28 + $0x38] sm:$0xff]  ;;  %v5387_v36 = vpack.c.bf16 %v3938_v22, %v3937_v21  ;;  %v5259_v39 = vpack.c.bf16 %v1024_v27, %v1023_v26  ;;  %v3940_v40 = vld [vmem:[%s7587_s2 + $0x2a8] sm:$0xff]  ;;  %v3941_v41 = vld [vmem:[%s7587_s2 + $0x2b0] sm:$0xff]  ;;  %v805_v7 = vrot.slane %v6082_v20, 7 }
  0x21   : > { %4535 = vmatprep.mubr.f32.mxu1 %v6024_v49  ;;  %v489_v42 = vld [vmem:[%s5961_s28 + $0xb8] sm:$0xff]  ;;  %v6119_v44 = vmax.f32 %v555_v24, 0.0  ;;  %v516_v47 = vmul.f32 %v5983_v29, %v473_v33  ;;  %v1025_v50 = vld [vmem:[%s7587_s2 + $0x20] sm:$0xff]  ;;  %v1026_v51 = vld [vmem:[%s7587_s2 + $0x28] sm:$0xff]  ;;  %v6133_v52 = vmax.f32 %v556_v31, 0.0  ;;  %v517_v54 = vmul.f32 %v5983_v29, %v474_v38 }
  0x22   : > { %5242 = vmatpush3.bf16.msra.mxu1 %v5239_v34  ;;  %v6104_v34 = vmax.f32 %v554_v18, 0.0  ;;  %v3942_v48 = vld [vmem:[%s7587_s2 + $0x2b8] sm:$0xff]  ;;  %v475_v56 = vld [vmem:[%s5961_s28 + $0x48] sm:$0xff]  ;;  %v5391_v57 = vpack.c.bf16 %v3940_v40, %v3939_v37  ;;  %v476_v58 = vld [vmem:[%s5961_s28 + $0x50] sm:$0xff]  ;;  %v532_v59 = vmul.f32 %v5983_v29, %v489_v42  ;;  %v5263_v62 = vpack.c.bf16 %v1026_v51, %v1025_v50 }
  0x23   : > { %5370 = vmatpush3.bf16.msra.mxu0 %v5995_v35  ;;  %5244 = vmatprep.subr.bf16.mxu1 %v5243_v45  ;;  %v490_v60 = vld [vmem:[%s5961_s28 + $0xc0] sm:$0xff]  ;;  %v6143_v61 = vpack.c.bf16 %v3942_v48, %v3941_v41  ;;  %v491_v0 = vld [vmem:[%s5961_s28 + $0xc8] sm:$0xff]  ;;  %v492_v2 = vld [vmem:[%s5961_s28 + $0xd0] sm:$0xff]  ;;  %v559_v4 = vadd.f32 %v5988_v30, %v516_v47  ;;  %v518_v5 = vmul.f32 %v5983_v29, %v475_v56 }
  0x24   : > { %5372 = vmatprep.subr.bf16.mxu0 %v6016_v46  ;;  %v1027_v6 = vld [vmem:[%s7587_s2 + $0x30] sm:$0xff]  ;;  %v1028_v8 = vld [vmem:[%s7587_s2 + $0x38] sm:$0xff]  ;;  %v6161_v9 = vadd.f32 %v5988_v30, %v532_v59  ;;  %v519_v14 = vmul.f32 %v5983_v29, %v476_v58  ;;  %v533_v15 = vmul.f32 %v5983_v29, %v490_v60  ;;  %v478_v18 = vld [vmem:[%s5961_s28 + $0x60] sm:$0xff]  ;;  %v534_v19 = vmul.f32 %v5983_v29, %v491_v0 }
  0x25   : > { %v493_v10 = vld [vmem:[%s5961_s28 + $0xd8] sm:$0xff]  ;;  %v535_v21 = vmul.f32 %v5983_v29, %v492_v2  ;;  %v3943_v22 = vld [vmem:[%s7587_s2 + $0x2c0] sm:$0xff]  ;;  %v3944_v24 = vld [vmem:[%s7587_s2 + $0x2c8] sm:$0xff]  ;;  %v5267_v26 = vpack.c.bf16 %v1028_v8, %v1027_v6  ;;  %v561_v33 = vadd.f32 %v5988_v30, %v518_v5 }
  0x26   : > { %5246 = vmatpush3.bf16.msra.mxu1 %v5243_v45  ;;  %v557_v45 = vadd.f32 %v5988_v30, %v514_v28  ;;  %v6182_v27 = vadd.f32 %v5988_v30, %v533_v15  ;;  %v536_v28 = vmul.f32 %v5983_v29, %v493_v10  ;;  %v494_v31 = vld [vmem:[%s5961_s28 + $0xe0] sm:$0xff]  ;;  %v1030_v37 = vld [vmem:[%s7587_s2 + $0x48] sm:$0xff]  ;;  %v6198_v38 = vadd.f32 %v5988_v30, %v534_v19  ;;  %v480_v51 = vld [vmem:[%s5961_s28 + $0x70] sm:$0xff] }
  0x27   : > { %5374 = vmatpush3.bf16.msra.mxu0 %v6016_v46  ;;  %5248 = vmatprep.subr.bf16.mxu1 %v5247_v53  ;;  %v495_v40 = vld [vmem:[%s5961_s28 + $0xe8] sm:$0xff]  ;;  %v562_v42 = vadd.f32 %v5988_v30, %v519_v14  ;;  %v5399_v50 = vpack.c.bf16 %v3944_v24, %v3943_v22  ;;  %v3946_v56 = vld [vmem:[%s7587_s2 + $0x2d8] sm:$0xff]  ;;  %v6226_v59 = vmax.f32 %v561_v33, 0.0  ;;  %v523_v6 = vmul.f32 %v5983_v29, %v480_v51  ;;  %v3949_v33 = vld [vmem:[%s7587_s2 + $0x2f0] sm:$0xff] }
  0x28   : > { %5376 = vmatprep.subr.bf16.mxu0 %v6038_v55  ;;  %v6150_v3 = vmax.f32 %v557_v45, 0.0  ;;  %v521_v45 = vmul.f32 %v5983_v29, %v478_v18  ;;  %v479_v47 = vld [vmem:[%s5961_s28 + $0x68] sm:$0xff]  ;;  %v6211_v48 = vadd.f32 %v5988_v30, %v536_v28  ;;  %v538_v58 = vmul.f32 %v5983_v29, %v495_v40  ;;  %v1032_v0 = vld [vmem:[%s7587_s2 + $0x58] sm:$0xff]  ;;  %v482_v28 = vld [vmem:[%s5961_s28 + $0x80] sm:$0xff] }
  0x29   : > { %7687 = vst [vmem:[#allocation14_spill] sm:$0xff] %v6226_v59  ;;  %v481_v8 = vld [vmem:[%s5961_s28 + $0x78] sm:$0xff]  ;;  %v3948_v14 = vld [vmem:[%s7587_s2 + $0x2e8] sm:$0xff]  ;;  %vm6557_vm2 = vmneg %vm803_vm1 }
  0x2a   : > { %5250 = vmatpush3.bf16.msra.mxu1 %v5247_v53  ;;  %v558_v53 = vadd.f32 %v5988_v30, %v515_v32  ;;  %7683 = vst [vmem:[#allocation10_spill] sm:$0xff] %v6150_v3  ;;  %v6188_v32 = vmax.f32 %v559_v4, 0.0  ;;  %v6241_v4 = vmax.f32 %v562_v42, 0.0  ;;  %v564_v5 = vadd.f32 %v5988_v30, %v521_v45  ;;  %v1034_v22 = vld [vmem:[%s7587_s2 + $0x68] sm:$0xff]  ;;  %v1036_v51 = vld [vmem:[%s7587_s2 + $0x78] sm:$0xff] }
  0x2b   : > { %5378 = vmatpush3.bf16.msra.mxu0 %v6038_v55  ;;  %5252 = vmatprep.subr.bf16.mxu1 %v5251_v63  ;;  %v6247_v10 = vadd.f32 %v5988_v30, %v538_v58  ;;  %v524_v19 = vmul.f32 %v5983_v29, %v481_v8  ;;  %v6427_v55 = vrot.slane %v6226_v59, 1  ;;  %v6517_v17 = vmax.f32 %v6211_v48, 0.0 }
  0x2c   : > { %5380 = vmatprep.subr.bf16.mxu0 %v6058_v1  ;;  %v6165_v11 = vmax.f32 %v558_v53, 0.0  ;;  %7685 = vst [vmem:[#allocation12_spill] sm:$0xff] %v6188_v32  ;;  %v537_v53 = vmul.f32 %v5983_v29, %v494_v31  ;;  %v6269_v24 = vmax.f32 %v564_v5, 0.0 }
  0x2d   : > { %v567_v45 = vadd.f32 %v5988_v30, %v524_v19  ;;  %7690 = vst [vmem:[#allocation17_spill] sm:$0xff] %v6427_v55 }
  0x2e   : > { %5254 = vmatpush3.bf16.msra.mxu1 %v5251_v63  ;;  %v477_v63 = vld [vmem:[%s5961_s28 + $0x58] sm:$0xff]  ;;  %7684 = vst [vmem:[#allocation11_spill] sm:$0xff] %v6165_v11  ;;  %v6237_v2 = vadd.f32 %v5988_v30, %v537_v53  ;;  %7689 = vst [vmem:[#allocation16_spill] sm:$0xff] %v6269_v24 }
  0x2f   : > { %5382 = vmatpush3.bf16.msra.mxu0 %v6058_v1  ;;  %5256 = vmatprep.subr.bf16.mxu1 %v5255_v13  ;;  %v6313_v8 = vmax.f32 %v567_v45, 0.0  ;;  %v3969_v45 = vld [vmem:[%s7587_s2 + $0x310] sm:$0xff] }
  0x30   : > { %5384 = vmatprep.subr.bf16.mxu0 %v5383_v16 }
  0x31   : > { %4536 = vmatmul.mubr.f32.vlgmr.msra.gmra.mrb[0].mxu1 %v6082_v20 }
  0x32   : > { %4856 = vmatmul.mubr.f32.vlgmr.msra.gmra.mrb[0].mxu0 %v6090_v23  ;;  %5258 = vmatpush3.bf16.msra.mxu1 %v5255_v13  ;;  %v560_v13 = vadd.f32 %v5988_v30, %v517_v54  ;;  %v3945_v54 = vld [vmem:[%s7587_s2 + $0x2d0] sm:$0xff] }
  0x33   : > { %5386 = vmatpush3.bf16.msra.mxu0 %v5383_v16  ;;  %4538 = vmatprep.mubr.f32.mxu1 %v6011_v43  ;;  %v520_v16 = vmul.f32 %v5983_v29, %v477_v63  ;;  %v1031_v63 = vld [vmem:[%s7587_s2 + $0x50] sm:$0xff] }
  0x34   : > { %4858 = vmatprep.mubr.f32.mxu0 %v6104_v34  ;;  %5388 = vmatprep.subr.bf16.mxu0 %v5387_v36  ;;  %v6205_v41 = vmax.f32 %v560_v13, 0.0  ;;  %v5403_v13 = vpack.c.bf16 %v3946_v56, %v3945_v54  ;;  %v5275_v15 = vpack.c.bf16 %v1032_v0, %v1031_v63  ;;  %v916_v54 = vrot.slane %v6011_v43, 1  ;;  %v496_v0 = vld [vmem:[%s5961_s28 + $0xf0] sm:$0xff] }
  0x35   : > { %4539 = vmatmul.mubr.f32.gmra.mrb[2].mxu1 %v6090_v23  ;;  %5260 = vmatprep.subr.bf16.mxu1 %v5259_v39  ;;  %v563_v60 = vadd.f32 %v5988_v30, %v520_v16  ;;  %v6298_v56 = vrot.slane %v6090_v23, 1 }
  0x36   : > { %4859 = vmatmul.mubr.f32.gmra.mrb[2].mxu0 %v6119_v44  ;;  %4541 = vmatprep.mubr.f32.mxu1 %v6104_v34  ;;  %7686 = vst [vmem:[#allocation13_spill] sm:$0xff] %v6205_v41 }
  0x37   : > { %5390 = vmatpush3.bf16.msra.mxu0 %v5387_v36  ;;  %4861 = vmatprep.mubr.f32.mxu0 %v6133_v52  ;;  %v1029_v36 = vld [vmem:[%s7587_s2 + $0x40] sm:$0xff]  ;;  %v6258_v16 = vmax.f32 %v563_v60, 0.0  ;;  %v6327_v19 = vsel %vm912_vm0, %v916_v54, %v6298_v56 }
  0x38   : > { %5392 = vmatprep.subr.bf16.mxu0 %v5391_v57  ;;  %5262 = vmatpush3.bf16.msra.mxu1 %v5259_v39  ;;  %v6201_v39 = vadd.f32 %v5988_v30, %v535_v21  ;;  %v1033_v21 = vld [vmem:[%s7587_s2 + $0x60] sm:$0xff] }
  0x39   : > { %4542 = vmatmul.mubr.f32.gmra.mrb[4].mxu1 %v6119_v44  ;;  %5264 = vmatprep.subr.bf16.mxu1 %v5263_v62  ;;  %7688 = vst [vmem:[#allocation15_spill] sm:$0xff] %v6258_v16  ;;  %v5279_v40 = vpack.c.bf16 %v1034_v22, %v1033_v21  ;;  %v3967_v60 = vld [vmem:[%s7587_s2 + $0x300] sm:$0xff] }
  0x3a   : > { %4862 = vmatmul.mubr.f32.gmra.mrb[4].mxu0 %v6150_v3  ;;  %4544 = vmatprep.mubr.f32.mxu1 %v6133_v52  ;;  %v486_v22 = vld [vmem:[%s5961_s28 + $0xa0] sm:$0xff] }
  0x3b   : > { %5394 = vmatpush3.bf16.msra.mxu0 %v5391_v57  ;;  %4864 = vmatprep.mubr.f32.mxu0 %v6165_v11  ;;  %v5271_v57 = vpack.c.bf16 %v1030_v37, %v1029_v36  ;;  %v3950_v36 = vld [vmem:[%s7587_s2 + $0x2f8] sm:$0xff]  ;;  %v483_v37 = vld [vmem:[%s5961_s28 + $0x88] sm:$0xff] }
  0x3c   : > { %5396 = vmatprep.subr.bf16.mxu0 %v6143_v61  ;;  %5266 = vmatpush3.bf16.msra.mxu1 %v5263_v62  ;;  %v522_v62 = vmul.f32 %v5983_v29, %v479_v47  ;;  %v525_v47 = vmul.f32 %v5983_v29, %v482_v28  ;;  %v5411_v58 = vpack.c.bf16 %v3950_v36, %v3949_v33  ;;  %v919_v28 = vrot.slane %v6104_v34, 1 }
  0x3d   : > { %4545 = vmatmul.mubr.f32.gmra.mrb[6].mxu1 %v6150_v3  ;;  %5268 = vmatprep.subr.bf16.mxu1 %v5267_v26  ;;  %v526_v63 = vmul.f32 %v5983_v29, %v483_v37  ;;  %v6333_v33 = vrot.slane %v6119_v44, 1 }
  0x3e   : > { %4865 = vmatmul.mubr.f32.gmra.mrb[6].mxu0 %v6188_v32  ;;  %4547 = vmatprep.mubr.f32.mxu1 %v6165_v11  ;;  %v565_v18 = vadd.f32 %v5988_v30, %v522_v62  ;;  %v3968_v62 = vld [vmem:[%s7587_s2 + $0x308] sm:$0xff] }
  0x3f   : > { %5398 = vmatpush3.bf16.msra.mxu0 %v6143_v61  ;;  %4867 = vmatprep.mubr.f32.mxu0 %v6205_v41  ;;  %v3947_v61 = vld [vmem:[%s7587_s2 + $0x2e0] sm:$0xff]  ;;  %v5415_v21 = vpack.c.bf16 %v3968_v62, %v3967_v60  ;;  %v569_v36 = vadd.f32 %v5988_v30, %v526_v63  ;;  %v487_v60 = vld [vmem:[%s5961_s28 + $0xa8] sm:$0xff]  ;;  %v488_v63 = vld [vmem:[%s5961_s28 + $0xb0] sm:$0xff] }
  0x40   : > { %5400 = vmatprep.subr.bf16.mxu0 %v5399_v50  ;;  %5270 = vmatpush3.bf16.msra.mxu1 %v5267_v26  ;;  %v566_v26 = vadd.f32 %v5988_v30, %v523_v6  ;;  %v5407_v31 = vpack.c.bf16 %v3948_v14, %v3947_v61  ;;  %v6283_v42 = vmax.f32 %v565_v18, 0.0  ;;  %v497_v6 = vld [vmem:[%s5961_s28 + $0xf8] sm:$0xff]  ;;  %v3840_v18 = vld [vmem:[%s7587_s2 + $0x108] sm:$0xff] }
  0x41   : > { %4548 = vmatmul.mubr.f32.gmra.mrb[8].mxu1 %v6188_v32  ;;  %5272 = vmatprep.subr.bf16.mxu1 %v5271_v57  ;;  %v485_v14 = vld [vmem:[%s5961_s28 + $0x98] sm:$0xff] }
  0x42   : > { %4868 = vmatmul.mubr.f32.gmra.mrb[8].mxu0 %v6226_v59  ;;  %4550 = vmatprep.mubr.f32.mxu1 %v6205_v41  ;;  %v6294_v53 = vmax.f32 %v566_v26, 0.0  ;;  %v539_v26 = vmul.f32 %v5983_v29, %v496_v0  ;;  %v528_v37 = vmul.f32 %v5983_v29, %v485_v14  ;;  %v6365_v0 = vsel %vm912_vm0, %v919_v28, %v6333_v33 }
  0x43   : > { %5402 = vmatpush3.bf16.msra.mxu0 %v5399_v50  ;;  %4870 = vmatprep.mubr.f32.mxu0 %v6241_v4  ;;  %v1035_v50 = vld [vmem:[%s7587_s2 + $0x70] sm:$0xff]  ;;  %v6372_v14 = vmax.f32 %v569_v36, 0.0  ;;  %v531_v28 = vmul.f32 %v5983_v29, %v488_v63 }
  0x44   : > { %5404 = vmatprep.subr.bf16.mxu0 %v5403_v13  ;;  %5274 = vmatpush3.bf16.msra.mxu1 %v5271_v57  ;;  %v484_v57 = vld [vmem:[%s5961_s28 + $0x90] sm:$0xff]  ;;  %v5283_v5 = vpack.c.bf16 %v1036_v51, %v1035_v50 }
  0x45   : > { %4551 = vmatmul.mubr.f32.gmra.mrb[10].mxu1 %v6226_v59  ;;  %5276 = vmatprep.subr.bf16.mxu1 %v5275_v15  ;;  %v527_v61 = vmul.f32 %v5983_v29, %v484_v57  ;;  %v529_v57 = vmul.f32 %v5983_v29, %v486_v22  ;;  %v3972_v22 = vld [vmem:[%s7587_s2 + $0x328] sm:$0xff] }
  0x46   : > { %4871 = vmatmul.mubr.f32.gmra.mrb[10].mxu0 %v6258_v16  ;;  %4553 = vmatprep.mubr.f32.mxu1 %v6241_v4 }
  0x47   : > { %5406 = vmatpush3.bf16.msra.mxu0 %v5403_v13  ;;  %4873 = vmatprep.mubr.f32.mxu0 %v6269_v24  ;;  %v568_v13 = vadd.f32 %v5988_v30, %v525_v47  ;;  %v3970_v47 = vld [vmem:[%s7587_s2 + $0x318] sm:$0xff]  ;;  %v570_v54 = vadd.f32 %v5988_v30, %v527_v61 }
  0x48   : > { %5408 = vmatprep.subr.bf16.mxu0 %v5407_v31  ;;  %5278 = vmatpush3.bf16.msra.mxu1 %v5275_v15  ;;  %v3839_v15 = vld [vmem:[%s7587_s2 + $0x100] sm:$0xff]  ;;  %v5419_v61 = vpack.c.bf16 %v3970_v47, %v3969_v45 }
  0x49   : > { %4554 = vmatmul.mubr.f32.gmra.mrb[12].mxu1 %v6258_v16  ;;  %5280 = vmatprep.subr.bf16.mxu1 %v5279_v40  ;;  %v6345_v50 = vpack.c.bf16 %v3840_v18, %v3839_v15  ;;  %v6352_v51 = vmax.f32 %v568_v13, 0.0  ;;  %v6369_v13 = vrot.slane %v6150_v3, 1  ;;  %v530_v15 = vmul.f32 %v5983_v29, %v487_v60  ;;  %v3971_v18 = vld [vmem:[%s7587_s2 + $0x320] sm:$0xff] }
  0x4a   : > { %4874 = vmatmul.mubr.f32.gmra.mrb[12].mxu0 %v6283_v42  ;;  %4556 = vmatprep.mubr.f32.mxu1 %v6269_v24  ;;  %v5423_v45 = vpack.c.bf16 %v3972_v22, %v3971_v18  ;;  %v913_v60 = vrot.slane %v6024_v49, 1  ;;  %v499_v18 = vld [vmem:[%s441_s29 + $0x8] sm:$0xff]  ;;  %v928_v22 = vrot.slane %v6205_v41, 1 }
  0x4b   : > { %5410 = vmatpush3.bf16.msra.mxu0 %v5407_v31  ;;  %4876 = vmatprep.mubr.f32.mxu0 %v6294_v53  ;;  %v540_v31 = vmul.f32 %v5983_v29, %v497_v6  ;;  %v922_v6 = vrot.slane %v6133_v52, 1  ;;  %v573_v47 = vadd.f32 %v5988_v30, %v530_v15  ;;  %v498_v15 = vld [vmem:[%s441_s29] sm:$0xff] }
  0x4c   : > { %5412 = vmatprep.subr.bf16.mxu0 %v5411_v58  ;;  %5282 = vmatpush3.bf16.msra.mxu1 %v5279_v40  ;;  %v6348_v40 = vadd.f32 %v5988_v30, %v539_v26  ;;  %v572_v26 = vadd.f32 %v5988_v30, %v529_v57  ;;  %v3974_v57 = vld [vmem:[%s7587_s2 + $0x338] sm:$0xff]  ;;  %v541_v35 = vmul.f32 %v5983_v29, %v498_v15 }
  0x4d   : > { %4557 = vmatmul.mubr.f32.gmra.mrb[14].mxu1 %v6283_v42  ;;  %5284 = vmatprep.subr.bf16.mxu1 %v5283_v5  ;;  %v6358_v62 = vadd.f32 %v5988_v30, %v540_v31  ;;  %v6396_v36 = vsel %vm912_vm0, %v922_v6, %v6369_v13  ;;  %v925_v31 = vrot.slane %v6165_v11, 1  ;;  %v574_v6 = vadd.f32 %v5988_v30, %v531_v28 }
  0x4e   : > { %4877 = vmatmul.mubr.f32.gmra.mrb[14].mxu0 %v6313_v8  ;;  %4559 = vmatprep.mubr.f32.mxu1 %v6294_v53  ;;  %v6416_v63 = vmax.f32 %v572_v26, 0.0  ;;  %v6435_v46 = vmax.f32 %v573_v47, 0.0  ;;  %v6452_v47 = vadd.f32 %v5988_v30, %v541_v35  ;;  %v6459_v15 = vsel %vm912_vm0, %v928_v22, %v6427_v55  ;;  %v3978_v35 = vld [vmem:[%s7587_s2 + $0x358] sm:$0xff] }
  0x4f   : > { %5414 = vmatpush3.bf16.msra.mxu0 %v5411_v58  ;;  %4935 = vmatprep.mubr.f32.mxu0 %v6327_v19  ;;  %v571_v58 = vadd.f32 %v5988_v30, %v528_v37  ;;  %v6400_v37 = vrot.slane %v6188_v32, 1  ;;  %v6479_v22 = vmax.f32 %v6182_v27, 0.0  ;;  %v3979_v27 = vld [vmem:[%s7587_s2 + $0x360] sm:$0xff] }
  0x50   : > { %5416 = vmatprep.subr.bf16.mxu0 %v5415_v21  ;;  %5286 = vmatpush3.bf16.msra.mxu1 %v5283_v5  ;;  %v6386_v5 = vmax.f32 %v570_v54, 0.0  ;;  %v3973_v54 = vld [vmem:[%s7587_s2 + $0x330] sm:$0xff] }
  0x51   : > { %4560 = vmatmul.mubr.f32.gmra.mrb[16].mxu1 %v6313_v8  ;;  %5288 = vmatprep.subr.bf16.mxu1 %v6345_v50  ;;  %v6424_v1 = vsel %vm912_vm0, %v925_v31, %v6400_v37  ;;  %v5427_v26 = vpack.c.bf16 %v3974_v57, %v3973_v54  ;;  %v3976_v31 = vld [vmem:[%s7587_s2 + $0x348] sm:$0xff]  ;;  %v542_v54 = vmul.f32 %v5983_v29, %v499_v18  ;;  %v6448_v57 = vmax.f32 %v574_v6, 0.0 }
  0x52   : > { %4936 = vmatmul.mubr.msk.f32.vlgmr.msra.gmra.mrb[0].mxu0 %vm912_vm0, %v6298_v56  ;;  %4562 = vmatprep.mubr.f32.mxu1 %v6352_v51  ;;  %v931_v29 = vrot.slane %v6241_v4, 1  ;;  %v6463_v18 = vrot.slane %v6258_v16, 1 }
  0x53   : > { %5418 = vmatpush3.bf16.msra.mxu0 %v5415_v21  ;;  %4938 = vmatprep.mubr.f32.mxu0 %v6365_v0  ;;  %v6403_v21 = vmax.f32 %v571_v58, 0.0  ;;  %v7601_v58 = vrot.slane %v6082_v20, 1 }
  0x54   : > { %5420 = vmatprep.subr.bf16.mxu0 %v5419_v61  ;;  %7691 = vst [vmem:[#allocation18_spill] sm:$0xff] %v6463_v18 }
  0x55   : > { %4563 = vmatmul.mubr.f32.gmra.mrb[18].mxu1 %v6372_v14  ;;  %v6432_v28 = vsel %vm912_vm0, %v913_v60, %v7601_v58  ;;  %v6455_v60 = vadd.f32 %v5988_v30, %v542_v54  ;;  %v3977_v30 = vld [vmem:[%s7587_s2 + $0x350] sm:$0xff]  ;;  %v6492_v58 = vmax.f32 %v6198_v38, 0.0 }
  0x56   : > { %4939 = vmatmul.mubr.msk.f32.gmra.mrb[2].mxu0 %vm912_vm0, %v6333_v33  ;;  %4565 = vmatprep.mubr.f32.mxu1 %v6386_v5  ;;  %v5435_v54 = vpack.c.bf16 %v3978_v35, %v3977_v30  ;;  %v937_v30 = vrot.slane %v6294_v53, 1  ;;  %v6513_v35 = vrot.slane %v6313_v8, 1 }
  0x57   : > { %4941 = vmatprep.mubr.f32.mxu0 %v6396_v36  ;;  %5422 = vmatpush3.bf16.msra.mxu0 %v5419_v61  ;;  %v3975_v61 = vld [vmem:[%s7587_s2 + $0x340] sm:$0xff] }
  0x58   : > { %5424 = vmatprep.subr.bf16.mxu0 %v5423_v45  ;;  %v5431_v6 = vpack.c.bf16 %v3976_v31, %v3975_v61  ;;  %v934_v61 = vrot.slane %v6269_v24, 1  ;;  %v6488_v31 = vrot.slane %v6283_v42, 1  ;;  %7695 = vst [vmem:[#allocation22_spill] sm:$0xff] %v6513_v35  ;;  %v6534_v48 = vsel %vm912_vm0, %v937_v30, %v6513_v35  ;;  %v4016_v30 = vld [vmem:[%s7587_s2 + $0x388] sm:$0xff] }
  0x59   : > { %4566 = vmatmul.mubr.f32.gmra.mrb[20].mxu1 %v6403_v21  ;;  %7696 = vst [vmem:[#allocation23_spill] sm:$0xff] %v6534_v48 }
  0x5a   : > { %4942 = vmatmul.mubr.msk.f32.gmra.mrb[4].mxu0 %vm912_vm0, %v6369_v13  ;;  %4568 = vmatprep.mubr.f32.mxu1 %v6416_v63  ;;  %7693 = vst [vmem:[#allocation20_spill] sm:$0xff] %v6488_v31  ;;  %v6509_v38 = vsel %vm912_vm0, %v934_v61, %v6488_v31  ;;  %v6529_v61 = vmax.f32 %v6237_v2, 0.0  ;;  %v6542_v2 = vmax.f32 %v6247_v10, 0.0 }
  0x5b   : > { %4944 = vmatprep.mubr.f32.mxu0 %v6424_v1  ;;  %5426 = vmatpush3.bf16.msra.mxu0 %v5423_v45  ;;  %v6467_v45 = vmax.f32 %v6161_v9, 0.0  ;;  %v6484_v9 = vsel %vm912_vm0, %v931_v29, %v6463_v18  ;;  %v6504_v29 = vmax.f32 %v6201_v39, 0.0  ;;  %7694 = vst [vmem:[#allocation21_spill] sm:$0xff] %v6509_v38  ;;  %v3981_v39 = vld [vmem:[%s7587_s2 + $0x370] sm:$0xff] }
  0x5c   : > { %5428 = vmatprep.subr.bf16.mxu0 %v5427_v26  ;;  %7692 = vst [vmem:[#allocation19_spill] sm:$0xff] %v6484_v9 }
  0x5d   : > { %4569 = vmatmul.mubr.f32.gmra.mrb[22].mxu1 %v6435_v46 }
  0x5e   : > { %4945 = vmatmul.mubr.msk.f32.gmra.mrb[6].mxu0 %vm912_vm0, %v6400_v37  ;;  %4571 = vmatprep.mubr.f32.mxu1 %v6448_v57 }
  0x5f   : > { %4947 = vmatprep.mubr.f32.mxu0 %v6459_v15  ;;  %5430 = vmatpush3.bf16.msra.mxu0 %v5427_v26  ;;  %v3980_v26 = vld [vmem:[%s7587_s2 + $0x368] sm:$0xff] }
  0x60   : > { %5432 = vmatprep.subr.bf16.mxu0 %v5431_v6  ;;  %v5439_v25 = vpack.c.bf16 %v3980_v26, %v3979_v27  ;;  %v940_v27 = vrot.slane %v6352_v51, 1  ;;  %v6538_v26 = vrot.slane %v6372_v14, 1 }
  0x61   : > { %4572 = vmatmul.mubr.f32.gmra.mrb[24].mxu1 %v6467_v45 }
  0x62   : > { %4948 = vmatmul.mubr.msk.f32.gmra.mrb[8].mxu0 %vm912_vm0, %v6427_v55  ;;  %4574 = vmatprep.mubr.f32.mxu1 %v6479_v22  ;;  %7697 = vst [vmem:[#allocation24_spill] sm:$0xff] %v6538_v26 }
  0x63   : > { %4950 = vmatprep.mubr.f32.mxu0 %v6484_v9  ;;  %5434 = vmatpush3.bf16.msra.mxu0 %v5431_v6  ;;  %v3982_v6 = vld [vmem:[%s7587_s2 + $0x378] sm:$0xff]  ;;  %v946_v9 = vrot.slane %v6416_v63, 1 }
  0x64   : > { %5436 = vmatprep.subr.bf16.mxu0 %v5435_v54  ;;  %v5443_v12 = vpack.c.bf16 %v3982_v6, %v3981_v39  ;;  %v804_v39 = vrot.slane %v6024_v49, 7  ;;  %v6563_v6 = vsel %vm912_vm0, %v940_v27, %v6538_v26  ;;  %v3841_v49 = vld [vmem:[%s7587_s2 + $0x110] sm:$0xff] }
  0x65   : > { %4575 = vmatmul.mubr.f32.gmra.mrb[26].mxu1 %v6492_v58 }
  0x66   : > { %4951 = vmatmul.mubr.msk.f32.gmra.mrb[10].mxu0 %vm912_vm0, %v6463_v18  ;;  %4577 = vmatprep.mubr.f32.mxu1 %v6504_v29  ;;  %v806_v27 = vsel %vm803_vm1, %v804_v39, %v805_v7  ;;  %v3843_v7 = vld [vmem:[%s7587_s2 + $0x120] sm:$0xff] }
  0x67   : > { %4953 = vmatprep.mubr.f32.mxu0 %v6509_v38  ;;  %5438 = vmatpush3.bf16.msra.mxu0 %v5435_v54  ;;  %v4015_v54 = vld [vmem:[%s7587_s2 + $0x380] sm:$0xff]  ;;  %v943_v38 = vrot.slane %v6386_v5, 1 }
  0x68   : > { %5440 = vmatprep.subr.bf16.mxu0 %v5439_v25  ;;  %v6569_v18 = vpack.c.bf16 %v4016_v30, %v4015_v54  ;;  %v6584_v54 = vrot.slane %v6011_v43, 7  ;;  %v808_v30 = vrot.slane %v6090_v23, 7  ;;  %v6611_v23 = vrot.slane %v6104_v34, 7 }
  0x69   : > { %4578 = vmatmul.mubr.f32.gmra.mrb[28].mxu1 %v6517_v17 }
  0x6a   : > { %4954 = vmatmul.mubr.msk.f32.gmra.mrb[12].mxu0 %vm912_vm0, %v6488_v31  ;;  %4580 = vmatprep.mubr.f32.mxu1 %v6529_v61  ;;  %v6567_v31 = vrot.slane %v6403_v21, 1  ;;  %7701 = vst [vmem:[#allocation26_spill] sm:$0xff] %v6584_v54  ;;  %v6608_v43 = vsel %vm803_vm1, %v6584_v54, %v808_v30  ;;  %7705 = vst [vmem:[#allocation30_spill] sm:$0xff] %v6611_v23  ;;  %v3846_v30 = vld [vmem:[%s7587_s2 + $0x138] sm:$0xff] }
  0x6b   : > { %4956 = vmatprep.mubr.f32.mxu0 %v6534_v48  ;;  %5442 = vmatpush3.bf16.msra.mxu0 %v5439_v25  ;;  %v3842_v25 = vld [vmem:[%s7587_s2 + $0x118] sm:$0xff]  ;;  %7704 = vst [vmem:[#allocation29_spill] sm:$0xff] %v6608_v43 }
  0x6c   : > { %7700 = vst [vmem:[#allocation25_spill] sm:$0xff] %v6567_v31  ;;  %5444 = vmatprep.subr.bf16.mxu0 %v5443_v12  ;;  %v6590_v48 = vsel %vm912_vm0, %v943_v38, %v6567_v31  ;;  %v5291_v55 = vpack.c.bf16 %v3842_v25, %v3841_v49  ;;  %v811_v38 = vrot.slane %v6119_v44, 7  ;;  %v6624_v49 = vrot.slane %v6467_v45, 1 }
  0x6d   : > { %4581 = vmatmul.mubr.f32.gmra.mrb[30].mxu1 %v6542_v2  ;;  %7702 = vst [vmem:[#allocation27_spill] sm:$0xff] %v6590_v48 }
  0x6e   : > { %4957 = vmatmul.mubr.msk.f32.gmra.mrb[14].mxu0 %vm912_vm0, %v6513_v35  ;;  %4615 = vmatprep.mubr.msk.f32.mxu1 %vm6557_vm2, %v804_v39  ;;  %v6594_v35 = vrot.slane %v6435_v46, 1  ;;  %7707 = vst [vmem:[#allocation32_spill] sm:$0xff] %v6624_v49 }
  0x6f   : > { %4959 = vmatprep.mubr.f32.mxu0 %v6563_v6  ;;  %5446 = vmatpush3.bf16.msra.mxu0 %v5443_v12  ;;  %v3844_v12 = vld [vmem:[%s7587_s2 + $0x128] sm:$0xff] }
  0x70   : > { %7703 = vst [vmem:[#allocation28_spill] sm:$0xff] %v6594_v35  ;;  %5448 = vmatprep.subr.bf16.mxu0 %v6569_v18  ;;  %v6620_v39 = vsel %vm912_vm0, %v946_v9, %v6594_v35  ;;  %v5295_v25 = vpack.c.bf16 %v3844_v12, %v3843_v7  ;;  %v6640_v9 = vsel %vm803_vm1, %v6611_v23, %v811_v38  ;;  %v6643_v7 = vrot.slane %v6133_v52, 7 }
  0x71   : > { %4616 = vmatmul.mubr.f32.vlgmr.msra.gmra.mrb[0].mxu1 %v806_v27  ;;  %7706 = vst [vmem:[#allocation31_spill] sm:$0xff] %v6620_v39  ;;  %v3845_v27 = vld [vmem:[%s7587_s2 + $0x130] sm:$0xff]  ;;  %7708 = vst [vmem:[#allocation33_spill] sm:$0xff] %v6640_v9  ;;  %v814_v12 = vrot.slane %v6150_v3, 7  ;;  %v6682_v3 = vrot.slane %v6517_v17, 1 }
  0x72   : > { %4960 = vmatmul.mubr.msk.f32.gmra.mrb[16].mxu0 %vm912_vm0, %v6538_v26  ;;  %5290 = vmatpush3.bf16.msra.mxu1 %v6345_v50  ;;  %v949_v50 = vrot.slane %v6448_v57, 1  ;;  %7709 = vst [vmem:[#allocation34_spill] sm:$0xff] %v6643_v7  ;;  %v5299_v38 = vpack.c.bf16 %v3846_v30, %v3845_v27  ;;  %v6672_v27 = vrot.slane %v6165_v11, 7  ;;  %v817_v30 = vrot.slane %v6188_v32, 7  ;;  %v3849_v32 = vld [vmem:[%s7587_s2 + $0x150] sm:$0xff] }
  0x73   : > { %4618 = vmatprep.mubr.msk.f32.mxu1 %vm6557_vm2, %v6584_v54  ;;  %4962 = vmatprep.mubr.f32.mxu0 %v6590_v48  ;;  %v952_v54 = vrot.slane %v6479_v22, 1  ;;  %v3847_v48 = vld [vmem:[%s7587_s2 + $0x140] sm:$0xff]  ;;  %7715 = vst [vmem:[#allocation40_spill] sm:$0xff] %v6682_v3  ;;  %v6707_v11 = vrot.slane %v6542_v2, 1 }
  0x74   : > { %5292 = vmatprep.subr.bf16.mxu1 %v5291_v55  ;;  %7713 = vst [vmem:[#allocation38_spill] sm:$0xff] %v6672_v27 }
  0x75   : > { %4619 = vmatmul.mubr.f32.gmra.mrb[2].mxu1 %v6608_v43  ;;  %v6649_v43 = vsel %vm912_vm0, %v949_v50, %v6624_v49  ;;  %v6669_v50 = vsel %vm803_vm1, %v6643_v7, %v814_v12  ;;  %7718 = vst [vmem:[#allocation43_spill] sm:$0xff] %v6707_v11 }
  0x76   : > { %4963 = vmatmul.mubr.msk.f32.gmra.mrb[18].mxu0 %vm912_vm0, %v6567_v31  ;;  %4621 = vmatprep.mubr.msk.f32.mxu1 %vm6557_vm2, %v6611_v23  ;;  %7710 = vst [vmem:[#allocation35_spill] sm:$0xff] %v6649_v43  ;;  %v6653_v31 = vrot.slane %v6492_v58, 1  ;;  %7712 = vst [vmem:[#allocation37_spill] sm:$0xff] %v6669_v50 }
  0x77   : > { %4965 = vmatprep.mubr.f32.mxu0 %v6620_v39  ;;  %5294 = vmatpush3.bf16.msra.mxu1 %v5291_v55  ;;  %v3848_v55 = vld [vmem:[%s7587_s2 + $0x148] sm:$0xff]  ;;  %v7789_v10 = vld [vmem:[#allocation28_spill] sm:$0xff] }
  0x78   : > { %7711 = vst [vmem:[#allocation36_spill] sm:$0xff] %v6653_v31  ;;  %5296 = vmatprep.subr.bf16.mxu1 %v5295_v25  ;;  %v6678_v39 = vsel %vm912_vm0, %v952_v54, %v6653_v31  ;;  %v5303_v12 = vpack.c.bf16 %v3848_v55, %v3847_v48  ;;  %v6698_v48 = vsel %vm803_vm1, %v6672_v27, %v817_v30  ;;  %v6701_v54 = vrot.slane %v6205_v41, 7 }
  0x79   : > { %4622 = vmatmul.mubr.f32.gmra.mrb[4].mxu1 %v6640_v9  ;;  %7714 = vst [vmem:[#allocation39_spill] sm:$0xff] %v6678_v39  ;;  %7716 = vst [vmem:[#allocation41_spill] sm:$0xff] %v6698_v48  ;;  %v820_v55 = vrot.slane %v6226_v59, 7  ;;  %v6714_v30 = vmax.f32 %v6348_v40, 0.0  ;;  %v6717_v41 = vmax.f32 %v6358_v62, 0.0  ;;  %v6736_v40 = vrot.slane %v6241_v4, 7 }
  0x7a   : > { %4966 = vmatmul.mubr.msk.f32.gmra.mrb[20].mxu0 %vm912_vm0, %v6594_v35  ;;  %4624 = vmatprep.mubr.msk.f32.mxu1 %vm6557_vm2, %v6643_v7  ;;  %v955_v35 = vrot.slane %v6504_v29, 1  ;;  %7717 = vst [vmem:[#allocation42_spill] sm:$0xff] %v6701_v54  ;;  %v823_v62 = vrot.slane %v6258_v16, 7  ;;  %v3853_v16 = vld [vmem:[%s7587_s2 + $0x170] sm:$0xff] }
  0x7b   : > { %4968 = vmatprep.mubr.f32.mxu0 %v6649_v43  ;;  %5298 = vmatpush3.bf16.msra.mxu1 %v5295_v25  ;;  %v3850_v25 = vld [vmem:[%s7587_s2 + $0x158] sm:$0xff]  ;;  %v958_v43 = vrot.slane %v6529_v61, 1  ;;  %7721 = vst [vmem:[#allocation46_spill] sm:$0xff] %v6736_v40 }
  0x7c   : > { %5300 = vmatprep.subr.bf16.mxu1 %v5299_v38  ;;  %v5307_v59 = vpack.c.bf16 %v3850_v25, %v3849_v32  ;;  %v6733_v32 = vsel %vm803_vm1, %v6701_v54, %v820_v55  ;;  %v961_v25 = vrot.slane %v6714_v30, 1 }
  0x7d   : > { %4625 = vmatmul.mubr.f32.gmra.mrb[6].mxu1 %v6669_v50  ;;  %7720 = vst [vmem:[#allocation45_spill] sm:$0xff] %v6733_v32 }
  0x7e   : > { %4969 = vmatmul.mubr.msk.f32.gmra.mrb[22].mxu0 %vm912_vm0, %v6624_v49  ;;  %4627 = vmatprep.mubr.msk.f32.mxu1 %vm6557_vm2, %v6672_v27  ;;  %v6711_v49 = vsel %vm912_vm0, %v955_v35, %v6682_v3  ;;  %v6742_v35 = vsel %vm912_vm0, %v958_v43, %v6707_v11  ;;  %v6762_v43 = vsel %vm803_vm1, %v6736_v40, %v823_v62  ;;  %v3871_v62 = vld [vmem:[%s7587_s2 + $0x180] sm:$0xff] }
  0x7f   : > { %4971 = vmatprep.mubr.f32.mxu0 %v6678_v39  ;;  %5302 = vmatpush3.bf16.msra.mxu1 %v5299_v38  ;;  %7719 = vst [vmem:[#allocation44_spill] sm:$0xff] %v6711_v49  ;;  %v3851_v39 = vld [vmem:[%s7587_s2 + $0x160] sm:$0xff]  ;;  %v3852_v38 = vld [vmem:[%s7587_s2 + $0x168] sm:$0xff]  ;;  %7723 = vst [vmem:[#allocation48_spill] sm:$0xff] %v6762_v43 }
  0x80   : > { %5304 = vmatprep.subr.bf16.mxu1 %v5303_v12  ;;  %v5311_v55 = vpack.c.bf16 %v3852_v38, %v3851_v39  ;;  %v6765_v39 = vrot.slane %v6269_v24, 7  ;;  %v826_v38 = vrot.slane %v6283_v42, 7  ;;  %v3872_v24 = vld [vmem:[%s7587_s2 + $0x188] sm:$0xff] }
  0x81   : > { %4628 = vmatmul.mubr.f32.gmra.mrb[8].mxu1 %v6698_v48 }
  0x82   : > { %4972 = vmatmul.mubr.msk.f32.gmra.mrb[24].mxu0 %vm912_vm0, %v6653_v31  ;;  %4630 = vmatprep.mubr.msk.f32.mxu1 %vm6557_vm2, %v6701_v54  ;;  %v6746_v31 = vrot.slane %v6717_v41, 1  ;;  %7724 = vst [vmem:[#allocation49_spill] sm:$0xff] %v6765_v39 }
  0x83   : > { %4974 = vmatprep.mubr.f32.mxu0 %v6711_v49  ;;  %5306 = vmatpush3.bf16.msra.mxu1 %v5303_v12  ;;  %v3854_v12 = vld [vmem:[%s7587_s2 + $0x178] sm:$0xff] }
  0x84   : > { %7722 = vst [vmem:[#allocation47_spill] sm:$0xff] %v6746_v31  ;;  %5308 = vmatprep.subr.bf16.mxu1 %v5307_v59  ;;  %v6771_v49 = vsel %vm912_vm0, %v961_v25, %v6746_v31  ;;  %v829_v25 = vrot.slane %v6313_v8, 7 }
  0x85   : > { %4631 = vmatmul.mubr.f32.gmra.mrb[10].mxu1 %v6733_v32  ;;  %7725 = vst [vmem:[#allocation50_spill] sm:$0xff] %v6771_v49 }
  0x86   : > { %4975 = vmatmul.mubr.msk.f32.gmra.mrb[26].mxu0 %vm912_vm0, %v6682_v3  ;;  %4633 = vmatprep.mubr.msk.f32.mxu1 %vm6557_vm2, %v6736_v40  ;;  %v5315_v3 = vpack.c.bf16 %v3854_v12, %v3853_v16  ;;  %v6790_v16 = vrot.slane %v6294_v53, 7  ;;  %v6794_v12 = vpack.c.bf16 %v3872_v24, %v3871_v62  ;;  %v832_v62 = vrot.slane %v6372_v14, 7 }
  0x87   : > { %4977 = vmatprep.mubr.f32.mxu0 %v6742_v35  ;;  %5310 = vmatpush3.bf16.msra.mxu1 %v5307_v59  ;;  %v6787_v59 = vsel %vm803_vm1, %v6765_v39, %v826_v38  ;;  %v4018_v38 = vld [vmem:[%s7587_s2 + $0x398] sm:$0xff] }
  0x88   : > { %5312 = vmatprep.subr.bf16.mxu1 %v5311_v55  ;;  %7726 = vst [vmem:[#allocation51_spill] sm:$0xff] %v6787_v59  ;;  %v6810_v24 = vsel %vm803_vm1, %v6790_v16, %v829_v25  ;;  %v4019_v25 = vld [vmem:[%s7587_s2 + $0x3a0] sm:$0xff] }
  0x89   : > { %4634 = vmatmul.mubr.f32.gmra.mrb[12].mxu1 %v6762_v43  ;;  %7727 = vst [vmem:[#allocation52_spill] sm:$0xff] %v6810_v24 }
  0x8a   : > { %4978 = vmatmul.mubr.msk.f32.gmra.mrb[28].mxu0 %vm912_vm0, %v6707_v11  ;;  %4636 = vmatprep.mubr.msk.f32.mxu1 %vm6557_vm2, %v6765_v39  ;;  %v4017_v11 = vld [vmem:[%s7587_s2 + $0x390] sm:$0xff] }
  0x8b   : > { %4980 = vmatprep.mubr.f32.mxu0 %v6771_v49  ;;  %5314 = vmatpush3.bf16.msra.mxu1 %v5311_v55  ;;  %v6813_v55 = vrot.slane %v6352_v51, 7  ;;  %v5451_v49 = vpack.c.bf16 %v4018_v38, %v4017_v11  ;;  %v6836_v11 = vrot.slane %v6386_v5, 7  ;;  %v835_v38 = vrot.slane %v6403_v21, 7 }
  0x8c   : > { %5316 = vmatprep.subr.bf16.mxu1 %v5315_v3 }
  0x8d   : > { %4637 = vmatmul.mubr.f32.gmra.mrb[14].mxu1 %v6787_v59 }
  0x8e   : > { %4981 = vmatmul.mubr.msk.f32.gmra.mrb[30].mxu0 %vm912_vm0, %v6746_v31  ;;  %4639 = vmatprep.mubr.msk.f32.mxu1 %vm6557_vm2, %v6790_v16  ;;  %v4020_v31 = vld [vmem:[%s7587_s2 + $0x3a8] sm:$0xff] }
  0x8f   : > { %5015 = vmatprep.mubr.msk.f32.mxu0 %vm6557_vm2, %v6611_v23  ;;  %5318 = vmatpush3.bf16.msra.mxu1 %v5315_v3  ;;  %v6833_v3 = vsel %vm803_vm1, %v6813_v55, %v832_v62  ;;  %v4021_v62 = vld [vmem:[%s7587_s2 + $0x3b0] sm:$0xff]  ;;  %v4022_v23 = vld [vmem:[%s7587_s2 + $0x3b8] sm:$0xff] }
  0x90   : > { %5320 = vmatprep.subr.bf16.mxu1 %v6794_v12 }
  0x91   : > { %4640 = vmatmul.mubr.f32.gmra.mrb[16].mxu1 %v6810_v24 }
  0x92   : > { %5016 = vmatmul.mubr.f32.vlgmr.msra.gmra.mrb[0].mxu0 %v6640_v9  ;;  %4642 = vmatprep.mubr.msk.f32.mxu1 %vm6557_vm2, %v6813_v55  ;;  %v5455_v9 = vpack.c.bf16 %v4020_v31, %v4019_v25  ;;  %v6859_v31 = vrot.slane %v6416_v63, 7  ;;  %v838_v25 = vrot.slane %v6435_v46, 7 }
  0x93   : > { %5450 = vmatpush3.bf16.msra.mxu0 %v6569_v18  ;;  %5018 = vmatprep.mubr.msk.f32.mxu0 %vm6557_vm2, %v6643_v7  ;;  %v6856_v18 = vsel %vm803_vm1, %v6836_v11, %v835_v38  ;;  %v4023_v7 = vld [vmem:[%s7587_s2 + $0x3c0] sm:$0xff]  ;;  %v4024_v38 = vld [vmem:[%s7587_s2 + $0x3c8] sm:$0xff] }
  0x94   : > { %5452 = vmatprep.subr.bf16.mxu0 %v5451_v49 }
  0x95   : > { %4643 = vmatmul.mubr.f32.gmra.mrb[18].mxu1 %v6833_v3 }
  0x96   : > { %5019 = vmatmul.mubr.f32.gmra.mrb[2].mxu0 %v6669_v50  ;;  %4645 = vmatprep.mubr.msk.f32.mxu1 %vm6557_vm2, %v6836_v11  ;;  %v5459_v50 = vpack.c.bf16 %v4022_v23, %v4021_v62  ;;  %v6881_v23 = vrot.slane %v6448_v57, 7  ;;  %v841_v62 = vrot.slane %v6467_v45, 7 }
  0x97   : > { %5021 = vmatprep.mubr.msk.f32.mxu0 %vm6557_vm2, %v6672_v27  ;;  %5454 = vmatpush3.bf16.msra.mxu0 %v5451_v49  ;;  %v6878_v49 = vsel %vm803_vm1, %v6859_v31, %v838_v25  ;;  %v4025_v27 = vld [vmem:[%s7587_s2 + $0x3d0] sm:$0xff]  ;;  %v4026_v25 = vld [vmem:[%s7587_s2 + $0x3d8] sm:$0xff] }
  0x98   : > { %5456 = vmatprep.subr.bf16.mxu0 %v5455_v9 }
  0x99   : > { %4646 = vmatmul.mubr.f32.gmra.mrb[20].mxu1 %v6856_v18 }
  0x9a   : > { %5022 = vmatmul.mubr.f32.gmra.mrb[4].mxu0 %v6698_v48  ;;  %4648 = vmatprep.mubr.msk.f32.mxu1 %vm6557_vm2, %v6859_v31  ;;  %v5463_v48 = vpack.c.bf16 %v4024_v38, %v4023_v7  ;;  %v6903_v7 = vrot.slane %v6479_v22, 7  ;;  %v844_v38 = vrot.slane %v6492_v58, 7 }
  0x9b   : > { %5024 = vmatprep.mubr.msk.f32.mxu0 %vm6557_vm2, %v6701_v54  ;;  %5458 = vmatpush3.bf16.msra.mxu0 %v5455_v9  ;;  %v6900_v9 = vsel %vm803_vm1, %v6881_v23, %v841_v62  ;;  %v4027_v54 = vld [vmem:[%s7587_s2 + $0x3e0] sm:$0xff]  ;;  %v4028_v62 = vld [vmem:[%s7587_s2 + $0x3e8] sm:$0xff] }
  0x9c   : > { %5460 = vmatprep.subr.bf16.mxu0 %v5459_v50 }
  0x9d   : > { %4649 = vmatmul.mubr.f32.gmra.mrb[22].mxu1 %v6878_v49 }
  0x9e   : > { %5025 = vmatmul.mubr.f32.gmra.mrb[6].mxu0 %v6733_v32  ;;  %4651 = vmatprep.mubr.msk.f32.mxu1 %vm6557_vm2, %v6881_v23  ;;  %v5467_v32 = vpack.c.bf16 %v4026_v25, %v4025_v27  ;;  %v6925_v27 = vrot.slane %v6504_v29, 7  ;;  %v847_v25 = vrot.slane %v6517_v17, 7 }
  0x9f   : > { %5027 = vmatprep.mubr.msk.f32.mxu0 %vm6557_vm2, %v6736_v40  ;;  %5462 = vmatpush3.bf16.msra.mxu0 %v5459_v50  ;;  %v6922_v50 = vsel %vm803_vm1, %v6903_v7, %v844_v38  ;;  %v4029_v40 = vld [vmem:[%s7587_s2 + $0x3f0] sm:$0xff]  ;;  %v4030_v38 = vld [vmem:[%s7587_s2 + $0x3f8] sm:$0xff] }
  0xa0   : > { %5464 = vmatprep.subr.bf16.mxu0 %v5463_v48 }
  0xa1   : > { %4652 = vmatmul.mubr.f32.gmra.mrb[24].mxu1 %v6900_v9 }
  0xa2   : > { %5028 = vmatmul.mubr.f32.gmra.mrb[8].mxu0 %v6762_v43  ;;  %4654 = vmatprep.mubr.msk.f32.mxu1 %vm6557_vm2, %v6903_v7  ;;  %v5471_v43 = vpack.c.bf16 %v4028_v62, %v4027_v54  ;;  %v6947_v54 = vrot.slane %v6529_v61, 7  ;;  %v850_v62 = vrot.slane %v6542_v2, 7 }
  0xa3   : > { %5030 = vmatprep.mubr.msk.f32.mxu0 %vm6557_vm2, %v6765_v39  ;;  %5466 = vmatpush3.bf16.msra.mxu0 %v5463_v48  ;;  %v6944_v48 = vsel %vm803_vm1, %v6925_v27, %v847_v25  ;;  %v4031_v39 = vld [vmem:[%s7587_s2 + $0x400] sm:$0xff]  ;;  %v4032_v25 = vld [vmem:[%s7587_s2 + $0x408] sm:$0xff] }
  0xa4   : > { %5468 = vmatprep.subr.bf16.mxu0 %v5467_v32  ;;  %7728 = vst [vmem:[#allocation53_spill] sm:$0xff] %v6947_v54 }
  0xa5   : > { %4655 = vmatmul.mubr.f32.gmra.mrb[26].mxu1 %v6922_v50 }
  0xa6   : > { %5031 = vmatmul.mubr.f32.gmra.mrb[10].mxu0 %v6787_v59  ;;  %4657 = vmatprep.mubr.msk.f32.mxu1 %vm6557_vm2, %v6925_v27  ;;  %v5475_v59 = vpack.c.bf16 %v4030_v38, %v4029_v40  ;;  %v6971_v40 = vpack.c.bf16 %v4032_v25, %v4031_v39  ;;  %v3873_v38 = vld [vmem:[%s7587_s2 + $0x190] sm:$0xff]  ;;  %v7730_v39 = vrot.slane %v6082_v20, 1 }
  0xa7   : > { %5033 = vmatprep.mubr.msk.f32.mxu0 %vm6557_vm2, %v6790_v16  ;;  %5470 = vmatpush3.bf16.msra.mxu0 %v5467_v32  ;;  %v6966_v32 = vsel %vm803_vm1, %v6947_v54, %v850_v62  ;;  %v3875_v62 = vld [vmem:[%s7587_s2 + $0x1a0] sm:$0xff] }
  0xa8   : > { %5472 = vmatprep.subr.bf16.mxu0 %v5471_v43  ;;  %7729 = vst [vmem:[#allocation54_spill] sm:$0xff] %v6966_v32 }
  0xa9   : > { %4658 = vmatmul.mubr.f32.gmra.mrb[28].mxu1 %v6944_v48 }
  0xaa   : > { %5034 = vmatmul.mubr.f32.gmra.mrb[12].mxu0 %v6810_v24  ;;  %4660 = vmatprep.mubr.msk.f32.mxu1 %vm6557_vm2, %v6947_v54  ;;  %v3874_v24 = vld [vmem:[%s7587_s2 + $0x198] sm:$0xff] }
  0xab   : > { %5036 = vmatprep.mubr.msk.f32.mxu0 %vm6557_vm2, %v6813_v55  ;;  %5474 = vmatpush3.bf16.msra.mxu0 %v5471_v43  ;;  %v5323_v43 = vpack.c.bf16 %v3874_v24, %v3873_v38  ;;  %v3878_v24 = vld [vmem:[%s7587_s2 + $0x1b8] sm:$0xff]  ;;  %v3881_v38 = vld [vmem:[%s7587_s2 + $0x1d0] sm:$0xff] }
  0xac   : > { %5476 = vmatprep.subr.bf16.mxu0 %v5475_v59 }
  0xad   : > { %4661 = vmatmul.mubr.f32.gmra.mrb[30].mxu1 %v6966_v32 }
  0xae   : > { %5037 = vmatmul.mubr.f32.gmra.mrb[14].mxu0 %v6833_v3  ;;  %4695 = vmatprep.mubr.f32.mxu1 %v6432_v28  ;;  %v3876_v28 = vld [vmem:[%s7587_s2 + $0x1a8] sm:$0xff] }
  0xaf   : > { %5039 = vmatprep.mubr.msk.f32.mxu0 %vm6557_vm2, %v6836_v11  ;;  %5478 = vmatpush3.bf16.msra.mxu0 %v5475_v59  ;;  %v5327_v20 = vpack.c.bf16 %v3876_v28, %v3875_v62  ;;  %v3877_v59 = vld [vmem:[%s7587_s2 + $0x1b0] sm:$0xff]  ;;  %v621_v62 = vmax.f32 %v6455_v60, 0.0  ;;  %v853_v60 = vrot.slane %v6717_v41, 7 }
  0xb0   : > { %5480 = vmatprep.subr.bf16.mxu0 %v6971_v40 }
  0xb1   : > { %4696 = vmatmul.mubr.msk.f32.vlgmr.msra.gmra.mrb[0].mxu1 %vm912_vm0, %v7730_v39  ;;  %v620_v39 = vmax.f32 %v6452_v47, 0.0  ;;  %v7056_v47 = vrot.slane %v6714_v30, 7 }
  0xb2   : > { %5040 = vmatmul.mubr.f32.gmra.mrb[16].mxu0 %v6856_v18  ;;  %5322 = vmatpush3.bf16.msra.mxu1 %v6794_v12  ;;  %v3880_v12 = vld [vmem:[%s7587_s2 + $0x1c8] sm:$0xff] }
  0xb3   : > { %4698 = vmatprep.mubr.f32.mxu1 %v6327_v19  ;;  %5042 = vmatprep.mubr.msk.f32.mxu0 %vm6557_vm2, %v6859_v31  ;;  %v5331_v19 = vpack.c.bf16 %v3878_v24, %v3877_v59  ;;  %v3884_v59 = vld [vmem:[%s7587_s2 + $0x1e8] sm:$0xff]  ;;  %7731 = vst [vmem:[#allocation55_spill] sm:$0xff] %v7056_v47  ;;  %v7059_v24 = vmul.f32 0.0, %v620_v39 }
  0xb4   : > { %5324 = vmatprep.subr.bf16.mxu1 %v5323_v43  ;;  %v7733_v39 = vld [vmem:[#allocation19_spill] sm:$0xff] }
  0xb5   : > { %4699 = vmatmul.mubr.msk.f32.gmra.mrb[2].mxu1 %vm912_vm0, %v6298_v56  ;;  %v3879_v56 = vld [vmem:[%s7587_s2 + $0x1c0] sm:$0xff] }
  0xb6   : > { %5043 = vmatmul.mubr.f32.gmra.mrb[18].mxu0 %v6878_v49  ;;  %4701 = vmatprep.mubr.f32.mxu1 %v6365_v0  ;;  %v5335_v25 = vpack.c.bf16 %v3880_v12, %v3879_v56  ;;  %v7732_v12 = vld [vmem:[#allocation17_spill] sm:$0xff] }
  0xb7   : > { %5045 = vmatprep.mubr.msk.f32.mxu0 %vm6557_vm2, %v6881_v23  ;;  %5326 = vmatpush3.bf16.msra.mxu1 %v5323_v43  ;;  %v3882_v43 = vld [vmem:[%s7587_s2 + $0x1d8] sm:$0xff] }
  0xb8   : > { %5328 = vmatprep.subr.bf16.mxu1 %v5327_v20  ;;  %v5339_v28 = vpack.c.bf16 %v3882_v43, %v3881_v38  ;;  %v3885_v38 = vld [vmem:[%s7587_s2 + $0x1f0] sm:$0xff]  ;;  %v3886_v43 = vld [vmem:[%s7587_s2 + $0x1f8] sm:$0xff] }
  0xb9   : > { %4702 = vmatmul.mubr.msk.f32.gmra.mrb[4].mxu1 %vm912_vm0, %v6333_v33 }
  0xba   : > { %5046 = vmatmul.mubr.f32.gmra.mrb[20].mxu0 %v6900_v9  ;;  %4704 = vmatprep.mubr.f32.mxu1 %v6396_v36 }
  0xbb   : > { %5048 = vmatprep.mubr.msk.f32.mxu0 %vm6557_vm2, %v6903_v7  ;;  %5330 = vmatpush3.bf16.msra.mxu1 %v5327_v20  ;;  %v3883_v20 = vld [vmem:[%s7587_s2 + $0x1e0] sm:$0xff] }
  0xbc   : > { %5332 = vmatprep.subr.bf16.mxu1 %v5331_v19  ;;  %v5343_v56 = vpack.c.bf16 %v3884_v59, %v3883_v20  ;;  %v5347_v59 = vpack.c.bf16 %v3886_v43, %v3885_v38  ;;  %v4034_v38 = vld [vmem:[%s7587_s2 + $0x418] sm:$0xff]  ;;  %v7738_v43 = vld [vmem:[#allocation23_spill] sm:$0xff] }
  0xbd   : > { %4705 = vmatmul.mubr.msk.f32.gmra.mrb[6].mxu1 %vm912_vm0, %v6369_v13 }
  0xbe   : > { %5049 = vmatmul.mubr.f32.gmra.mrb[22].mxu0 %v6922_v50  ;;  %4707 = vmatprep.mubr.f32.mxu1 %v6424_v1 }
  0xbf   : > { %5051 = vmatprep.mubr.msk.f32.mxu0 %vm6557_vm2, %v6925_v27  ;;  %5334 = vmatpush3.bf16.msra.mxu1 %v5331_v19  ;;  %v7061_v19 = vmul.f32 0.0, %v621_v62  ;;  %v855_v62 = vrot.slane %v7059_v24, 7 }
  0xc0   : > { %5336 = vmatprep.subr.bf16.mxu1 %v5335_v25 }
  0xc1   : > { %4708 = vmatmul.mubr.msk.f32.gmra.mrb[8].mxu1 %vm912_vm0, %v6400_v37  ;;  %v856_v20 = vrot.slane %v7061_v19, 7 }
  0xc2   : > { %5052 = vmatmul.mubr.f32.gmra.mrb[24].mxu0 %v6944_v48  ;;  %4710 = vmatprep.mubr.f32.mxu1 %v6459_v15 }
  0xc3   : > { %5054 = vmatprep.mubr.msk.f32.mxu0 %vm6557_vm2, %v6947_v54  ;;  %5338 = vmatpush3.bf16.msra.mxu1 %v5335_v25  ;;  %v7078_v25 = vsel %vm803_vm1, %v7056_v47, %v853_v60  ;;  %v7735_v54 = vld [vmem:[#allocation18_spill] sm:$0xff]  ;;  %v857_v60 = vsel %vm803_vm1, %v855_v62, %v856_v20 }
  0xc4   : > { %5340 = vmatprep.subr.bf16.mxu1 %v5339_v28  ;;  %7734 = vst [vmem:[#allocation17_spill] sm:$0xff] %v7078_v25  ;;  %v7740_v20 = vld [vmem:[#allocation22_spill] sm:$0xff] }
  0xc5   : > { %4711 = vmatmul.mubr.msk.f32.gmra.mrb[10].mxu1 %vm912_vm0, %v7732_v12 }
  0xc6   : > { %5055 = vmatmul.mubr.f32.gmra.mrb[26].mxu0 %v6966_v32  ;;  %4713 = vmatprep.mubr.f32.mxu1 %v7733_v39  ;;  %v7736_v32 = vld [vmem:[#allocation21_spill] sm:$0xff] }
  0xc7   : > { %5057 = vmatprep.mubr.msk.f32.mxu0 %vm6557_vm2, %v7056_v47  ;;  %5342 = vmatpush3.bf16.msra.mxu1 %v5339_v28  ;;  %v7737_v47 = vld [vmem:[#allocation20_spill] sm:$0xff] }
  0xc8   : > { %5344 = vmatprep.subr.bf16.mxu1 %v5343_v56  ;;  %v4033_v28 = vld [vmem:[%s7587_s2 + $0x410] sm:$0xff] }
  0xc9   : > { %4714 = vmatmul.mubr.msk.f32.gmra.mrb[12].mxu1 %vm912_vm0, %v7735_v54 }
  0xca   : > { %5058 = vmatmul.mubr.f32.gmra.mrb[28].mxu0 %v7078_v25  ;;  %4716 = vmatprep.mubr.f32.mxu1 %v7736_v32  ;;  %v4035_v25 = vld [vmem:[%s7587_s2 + $0x420] sm:$0xff] }
  0xcb   : > { %5060 = vmatprep.mubr.msk.f32.mxu0 %vm6557_vm2, %v855_v62  ;;  %5346 = vmatpush3.bf16.msra.mxu1 %v5343_v56  ;;  %v5483_v62 = vpack.c.bf16 %v4034_v38, %v4033_v28  ;;  %v7739_v56 = vld [vmem:[#allocation2_spill] sm:$0xff]  ;;  %v7742_v28 = vld [vmem:[#allocation27_spill] sm:$0xff] }
  0xcc   : > { %5348 = vmatprep.subr.bf16.mxu1 %v5347_v59  ;;  %v4040_v38 = vld [vmem:[%s7587_s2 + $0x448] sm:$0xff] }
  0xcd   : > { %4717 = vmatmul.mubr.msk.f32.gmra.mrb[14].mxu1 %vm912_vm0, %v7737_v47  ;;  %v4036_v47 = vld [vmem:[%s7587_s2 + $0x428] sm:$0xff] }
  0xce   : > { %5061 = vmatmul.mubr.f32.gmra.mrb[30].mxu0 %v857_v60  ;;  %4719 = vmatprep.mubr.f32.mxu1 %v7738_v43  ;;  %v4038_v60 = vld [vmem:[%s7587_s2 + $0x438] sm:$0xff] }
  0xcf   : > { %5095 = vmatprep.mubr.f32.mxu0 %v6104_v34  ;;  %5350 = vmatpush3.bf16.msra.mxu1 %v5347_v59  ;;  %v5487_v34 = vpack.c.bf16 %v4036_v47, %v4035_v25  ;;  %v4037_v59 = vld [vmem:[%s7587_s2 + $0x430] sm:$0xff]  ;;  %v7744_v47 = vld [vmem:[#allocation25_spill] sm:$0xff]  ;;  %v4039_v25 = vld [vmem:[%s7587_s2 + $0x440] sm:$0xff] }
  0xd0   : > { %5511 = vmatprep.subr.bf16.mxu1 %v7739_v56 }
  0xd1   : > { %4720 = vmatmul.mubr.msk.f32.gmra.mrb[16].mxu1 %vm912_vm0, %v7740_v20 }
  0xd2   : > { %5096 = vmatmul.mubr.f32.vlgmr.msra.gmra.mrb[0].mxu0 %v6119_v44  ;;  %4722 = vmatprep.mubr.f32.mxu1 %v6563_v6  ;;  %v7741_v44 = vld [vmem:[#allocation10_spill] sm:$0xff] }
  0xd3   : > { %5482 = vmatpush3.bf16.msra.mxu0 %v6971_v40  ;;  %5098 = vmatprep.mubr.f32.mxu0 %v6133_v52  ;;  %v7743_v40 = vld [vmem:[#allocation11_spill] sm:$0xff]  ;;  %v5491_v52 = vpack.c.bf16 %v4038_v60, %v4037_v59  ;;  %v7748_v59 = vld [vmem:[#allocation28_spill] sm:$0xff] }
  0xd4   : > { %5484 = vmatprep.subr.bf16.mxu0 %v5483_v62  ;;  %v4041_v60 = vld [vmem:[%s7587_s2 + $0x450] sm:$0xff] }
  0xd5   : > { %4723 = vmatmul.mubr.msk.f32.gmra.mrb[18].mxu1 %vm912_vm0, %v6538_v26  ;;  %v7745_v26 = vld [vmem:[#allocation12_spill] sm:$0xff] }
  0xd6   : > { %5099 = vmatmul.mubr.f32.gmra.mrb[2].mxu0 %v7741_v44  ;;  %4725 = vmatprep.mubr.f32.mxu1 %v7742_v28  ;;  %v7746_v44 = vld [vmem:[#allocation31_spill] sm:$0xff]  ;;  %v7747_v28 = vld [vmem:[#allocation13_spill] sm:$0xff] }
  0xd7   : > { %5101 = vmatprep.mubr.f32.mxu0 %v7743_v40  ;;  %5486 = vmatpush3.bf16.msra.mxu0 %v5483_v62  ;;  %v5495_v62 = vpack.c.bf16 %v4040_v38, %v4039_v25  ;;  %v4042_v40 = vld [vmem:[%s7587_s2 + $0x458] sm:$0xff]  ;;  %v4043_v25 = vld [vmem:[%s7587_s2 + $0x460] sm:$0xff]  ;;  %v4044_v38 = vld [vmem:[%s7587_s2 + $0x468] sm:$0xff] }
  0xd8   : > { %5488 = vmatprep.subr.bf16.mxu0 %v5487_v34 }
  0xd9   : > { %4726 = vmatmul.mubr.msk.f32.gmra.mrb[20].mxu1 %vm912_vm0, %v7744_v47  ;;  %v7749_v47 = vld [vmem:[#allocation14_spill] sm:$0xff] }
  0xda   : > { %5102 = vmatmul.mubr.f32.gmra.mrb[4].mxu0 %v7745_v26  ;;  %4728 = vmatprep.mubr.f32.mxu1 %v7746_v44  ;;  %v7750_v26 = vld [vmem:[#allocation35_spill] sm:$0xff] }
  0xdb   : > { %5104 = vmatprep.mubr.f32.mxu0 %v7747_v28  ;;  %5490 = vmatpush3.bf16.msra.mxu0 %v5487_v34  ;;  %v5499_v34 = vpack.c.bf16 %v4042_v40, %v4041_v60  ;;  %v7751_v28 = vld [vmem:[#allocation32_spill] sm:$0xff]  ;;  %v4046_v40 = vld [vmem:[%s7587_s2 + $0x478] sm:$0xff] }
  0xdc   : > { %5492 = vmatprep.subr.bf16.mxu0 %v5491_v52  ;;  %v4045_v60 = vld [vmem:[%s7587_s2 + $0x470] sm:$0xff] }
  0xdd   : > { %4729 = vmatmul.mubr.msk.f32.gmra.mrb[22].mxu1 %vm912_vm0, %v7748_v59  ;;  %v7752_v59 = vld [vmem:[#allocation15_spill] sm:$0xff] }
  0xde   : > { %5105 = vmatmul.mubr.f32.gmra.mrb[6].mxu0 %v7749_v47  ;;  %4731 = vmatprep.mubr.f32.mxu1 %v7750_v26  ;;  %v7753_v47 = vld [vmem:[#allocation39_spill] sm:$0xff]  ;;  %v7754_v26 = vld [vmem:[#allocation16_spill] sm:$0xff] }
  0xdf   : > { %5107 = vmatprep.mubr.f32.mxu0 %v6241_v4  ;;  %5494 = vmatpush3.bf16.msra.mxu0 %v5491_v52  ;;  %v5503_v4 = vpack.c.bf16 %v4044_v38, %v4043_v25  ;;  %v7755_v52 = vld [vmem:[#allocation36_spill] sm:$0xff]  ;;  %v7758_v25 = vld [vmem:[#allocation43_spill] sm:$0xff]  ;;  %v7763_v38 = vld [vmem:[#allocation33_spill] sm:$0xff] }
  0xe0   : > { %5496 = vmatprep.subr.bf16.mxu0 %v5495_v62 }
  0xe1   : > { %4732 = vmatmul.mubr.msk.f32.gmra.mrb[24].mxu1 %vm912_vm0, %v7751_v28 }
  0xe2   : > { %5108 = vmatmul.mubr.f32.gmra.mrb[8].mxu0 %v7752_v59  ;;  %4734 = vmatprep.mubr.f32.mxu1 %v7753_v47  ;;  %v7756_v59 = vld [vmem:[#allocation44_spill] sm:$0xff] }
  0xe3   : > { %5110 = vmatprep.mubr.f32.mxu0 %v7754_v26  ;;  %5498 = vmatpush3.bf16.msra.mxu0 %v5495_v62  ;;  %v5507_v62 = vpack.c.bf16 %v4046_v40, %v4045_v60  ;;  %v7757_v26 = vld [vmem:[#allocation40_spill] sm:$0xff]  ;;  %v7766_v60 = vld [vmem:[#allocation37_spill] sm:$0xff]  ;;  %v7767_v40 = vld [vmem:[#allocation38_spill] sm:$0xff] }
  0xe4   : > { %5500 = vmatprep.subr.bf16.mxu0 %v5499_v34 }
  0xe5   : > { %4735 = vmatmul.mubr.msk.f32.gmra.mrb[26].mxu1 %vm912_vm0, %v7755_v52 }
  0xe6   : > { %5111 = vmatmul.mubr.f32.gmra.mrb[10].mxu0 %v6283_v42  ;;  %4737 = vmatprep.mubr.f32.mxu1 %v7756_v59  ;;  %v7759_v42 = vld [vmem:[#allocation26_spill] sm:$0xff] }
  0xe7   : > { %5113 = vmatprep.mubr.f32.mxu0 %v6294_v53  ;;  %5502 = vmatpush3.bf16.msra.mxu0 %v5499_v34  ;;  %v7760_v53 = vld [vmem:[#allocation29_spill] sm:$0xff]  ;;  %v7762_v34 = vld [vmem:[#allocation3_spill] sm:$0xff] }
  0xe8   : > { %5504 = vmatprep.subr.bf16.mxu0 %v5503_v4 }
  0xe9   : > { %4738 = vmatmul.mubr.msk.f32.gmra.mrb[28].mxu1 %vm912_vm0, %v7757_v26 }
  0xea   : > { %5114 = vmatmul.mubr.f32.gmra.mrb[12].mxu0 %v6313_v8  ;;  %4740 = vmatprep.mubr.f32.mxu1 %v6742_v35  ;;  %v7761_v8 = vld [vmem:[#allocation30_spill] sm:$0xff] }
  0xeb   : > { %5116 = vmatprep.mubr.f32.mxu0 %v6352_v51  ;;  %5506 = vmatpush3.bf16.msra.mxu0 %v5503_v4  ;;  %v7764_v4 = vld [vmem:[#allocation34_spill] sm:$0xff] }
  0xec   : > { %5508 = vmatprep.subr.bf16.mxu0 %v5507_v62 }
  0xed   : > { %4741 = vmatmul.mubr.msk.f32.gmra.mrb[30].mxu1 %vm912_vm0, %v7758_v25 }
  0xee   : > { %5117 = vmatmul.mubr.f32.gmra.mrb[14].mxu0 %v6372_v14  ;;  %4775 = vmatprep.mubr.msk.f32.mxu1 %vm6557_vm2, %v7759_v42  ;;  %v7769_v42 = vld [vmem:[#allocation41_spill] sm:$0xff] }
  0xef   : > { %5119 = vmatprep.mubr.f32.mxu0 %v6386_v5  ;;  %5510 = vmatpush3.bf16.msra.mxu0 %v5507_v62  ;;  %v7768_v62 = vld [vmem:[#allocation5_spill] sm:$0xff] }
  0xf1   : > { %4776 = vmatmul.mubr.f32.vlgmr.msra.gmra.mrb[0].mxu1 %v7760_v53  ;;  %v7770_v53 = vld [vmem:[#allocation42_spill] sm:$0xff] }
  0xf2   : > { %5120 = vmatmul.mubr.f32.gmra.mrb[16].mxu0 %v6403_v21  ;;  %5519 = vmatpush3.bf16.msra.mxu1 %v7739_v56  ;;  %v7765_v56 = vld [vmem:[#allocation4_spill] sm:$0xff] }
  0xf3   : > { %4778 = vmatprep.mubr.msk.f32.mxu1 %vm6557_vm2, %v7761_v8  ;;  %5122 = vmatprep.mubr.f32.mxu0 %v6416_v63  ;;  %v7771_v8 = vld [vmem:[#allocation6_spill] sm:$0xff] }
  0xf4   : > { %5512 = vmatprep.subr.bf16.mxu1 %v7762_v34 }
  0xf5   : > { %4779 = vmatmul.mubr.f32.gmra.mrb[2].mxu1 %v7763_v38  ;;  %v7773_v38 = vld [vmem:[#allocation46_spill] sm:$0xff] }
  0xf6   : > { %5123 = vmatmul.mubr.f32.gmra.mrb[18].mxu0 %v6435_v46  ;;  %4781 = vmatprep.mubr.msk.f32.mxu1 %vm6557_vm2, %v7764_v4  ;;  %v7774_v4 = vld [vmem:[#allocation7_spill] sm:$0xff] }
  0xf7   : > { %5125 = vmatprep.mubr.f32.mxu0 %v6448_v57  ;;  %5520 = vmatpush3.bf16.msra.mxu1 %v7762_v34  ;;  %v7772_v34 = vld [vmem:[#allocation45_spill] sm:$0xff] }
  0xf8   : > { %5513 = vmatprep.subr.bf16.mxu1 %v7765_v56 }
  0xf9   : > { %4782 = vmatmul.mubr.f32.gmra.mrb[4].mxu1 %v7766_v60  ;;  %v7776_v60 = vld [vmem:[#allocation49_spill] sm:$0xff] }
  0xfa   : > { %5126 = vmatmul.mubr.f32.gmra.mrb[20].mxu0 %v6467_v45  ;;  %4784 = vmatprep.mubr.msk.f32.mxu1 %vm6557_vm2, %v7767_v40  ;;  %v7777_v40 = vld [vmem:[#allocation8_spill] sm:$0xff] }
  0xfb   : > { %5128 = vmatprep.mubr.f32.mxu0 %v6479_v22  ;;  %5521 = vmatpush3.bf16.msra.mxu1 %v7765_v56  ;;  %v7775_v56 = vld [vmem:[#allocation48_spill] sm:$0xff] }
  0xfc   : > { %5514 = vmatprep.subr.bf16.mxu1 %v7768_v62 }
  0xfd   : > { %4785 = vmatmul.mubr.f32.gmra.mrb[6].mxu1 %v7769_v42  ;;  %v7779_v42 = vld [vmem:[#allocation9_spill] sm:$0xff] }
  0xfe   : > { %5129 = vmatmul.mubr.f32.gmra.mrb[22].mxu0 %v6492_v58  ;;  %4787 = vmatprep.mubr.msk.f32.mxu1 %vm6557_vm2, %v7770_v53  ;;  %v7780_v53 = vld [vmem:[#allocation52_spill] sm:$0xff] }
  0xff   : > { %5131 = vmatprep.mubr.f32.mxu0 %v6504_v29  ;;  %5522 = vmatpush3.bf16.msra.mxu1 %v7768_v62  ;;  %v7778_v62 = vld [vmem:[#allocation51_spill] sm:$0xff] }
 0x100   : > { %5515 = vmatprep.subr.bf16.mxu1 %v7771_v8 }
 0x101   : > { %4788 = vmatmul.mubr.f32.gmra.mrb[8].mxu1 %v7772_v34 }
 0x102   : > { %5132 = vmatmul.mubr.f32.gmra.mrb[24].mxu0 %v6517_v17  ;;  %4790 = vmatprep.mubr.msk.f32.mxu1 %vm6557_vm2, %v7773_v38 }
 0x103   : > { %5134 = vmatprep.mubr.f32.mxu0 %v6529_v61  ;;  %5523 = vmatpush3.bf16.msra.mxu1 %v7771_v8 }
 0x104   : > { %5516 = vmatprep.subr.bf16.mxu1 %v7774_v4 }
 0x105   : > { %4791 = vmatmul.mubr.f32.gmra.mrb[10].mxu1 %v7775_v56 }
 0x106   : > { %5135 = vmatmul.mubr.f32.gmra.mrb[26].mxu0 %v6542_v2  ;;  %4793 = vmatprep.mubr.msk.f32.mxu1 %vm6557_vm2, %v7776_v60 }
 0x107   : > { %5137 = vmatprep.mubr.f32.mxu0 %v6714_v30  ;;  %5524 = vmatpush3.bf16.msra.mxu1 %v7774_v4 }
 0x108   : > { %5517 = vmatprep.subr.bf16.mxu1 %v7777_v40 }
 0x109   : > { %4794 = vmatmul.mubr.f32.gmra.mrb[12].mxu1 %v7778_v62 }
 0x10a   : > { %5138 = vmatmul.mubr.f32.gmra.mrb[28].mxu0 %v6717_v41  ;;  %4796 = vmatprep.mubr.msk.f32.mxu1 %vm6557_vm2, %v6790_v16  ;;  %v7788_v16 = vld [vmem:[#allocation25_spill] sm:$0xff] }
 0x10b   : > { %5140 = vmatprep.mubr.f32.mxu0 %v7059_v24  ;;  %5525 = vmatpush3.bf16.msra.mxu1 %v7777_v40 }
 0x10c   : > { %5518 = vmatprep.subr.bf16.mxu1 %v7779_v42 }
 0x10d   : > { %4797 = vmatmul.mubr.f32.gmra.mrb[14].mxu1 %v7780_v53 }
 0x10e   : > { %5141 = vmatmul.mubr.f32.gmra.mrb[30].mxu0 %v7061_v19  ;;  %4799 = vmatprep.mubr.msk.f32.mxu1 %vm6557_vm2, %v6813_v55 }
 0x10f   : > { %5175 = vmatprep.mubr.f32.mxu0 %v6365_v0  ;;  %5526 = vmatpush3.bf16.msra.mxu1 %v7779_v42  ;;  %v7783_v0 = vld [vmem:[#allocation54_spill] sm:$0xff] }
 0x111   : > { %4800 = vmatmul.mubr.f32.gmra.mrb[16].mxu1 %v6833_v3 }
 0x112   : > { %5176 = vmatmul.mubr.msk.f32.vlgmr.msra.gmra.mrb[0].mxu0 %vm912_vm0, %v6333_v33  ;;  %4802 = vmatprep.mubr.msk.f32.mxu1 %vm6557_vm2, %v6836_v11  ;;  %v7782_v33 = vld [vmem:[#allocation53_spill] sm:$0xff] }
 0x113   : > { %5178 = vmatprep.mubr.f32.mxu0 %v6396_v36  ;;  %v7785_v36 = vld [vmem:[#allocation17_spill] sm:$0xff] }
 0x115   : > { %4803 = vmatmul.mubr.f32.gmra.mrb[18].mxu1 %v6856_v18 }
 0x116   : > { %5179 = vmatmul.mubr.msk.f32.gmra.mrb[2].mxu0 %vm912_vm0, %v6369_v13  ;;  %4805 = vmatprep.mubr.msk.f32.mxu1 %vm6557_vm2, %v6859_v31  ;;  %v7784_v13 = vld [vmem:[#allocation55_spill] sm:$0xff] }
 0x117   : > { %5181 = vmatprep.mubr.f32.mxu0 %v6424_v1  ;;  %v7781_v1 = vld [vmem:[#allocation20_spill] sm:$0xff] }
 0x119   : > { %4806 = vmatmul.mubr.f32.gmra.mrb[20].mxu1 %v6878_v49 }
 0x11a   : > { %5182 = vmatmul.mubr.msk.f32.gmra.mrb[4].mxu0 %vm912_vm0, %v6400_v37  ;;  %4808 = vmatprep.mubr.msk.f32.mxu1 %vm6557_vm2, %v6881_v23  ;;  %v7786_v37 = vld [vmem:[#allocation24_spill] sm:$0xff] }
 0x11b   : > { %5184 = vmatprep.mubr.f32.mxu0 %v6459_v15  ;;  %v7787_v15 = vld [vmem:[#allocation27_spill] sm:$0xff] }
 0x11d   : > { %4809 = vmatmul.mubr.f32.gmra.mrb[22].mxu1 %v6900_v9 }
 0x11e   : > { %5185 = vmatmul.mubr.msk.f32.gmra.mrb[6].mxu0 %vm912_vm0, %v7732_v12  ;;  %4811 = vmatprep.mubr.msk.f32.mxu1 %vm6557_vm2, %v6903_v7 }
 0x11f   : > { %5187 = vmatprep.mubr.f32.mxu0 %v7733_v39 }
 0x121   : > { %4812 = vmatmul.mubr.f32.gmra.mrb[24].mxu1 %v6922_v50 }
 0x122   : > { %5188 = vmatmul.mubr.msk.f32.gmra.mrb[8].mxu0 %vm912_vm0, %v7735_v54  ;;  %4814 = vmatprep.mubr.msk.f32.mxu1 %vm6557_vm2, %v6925_v27 }
 0x123   : > { %5190 = vmatprep.mubr.f32.mxu0 %v7736_v32 }
 0x125   : > { %4815 = vmatmul.mubr.f32.gmra.mrb[26].mxu1 %v6944_v48 }
 0x126   : > { %5191 = vmatmul.mubr.msk.f32.gmra.mrb[10].mxu0 %vm912_vm0, %v7781_v1  ;;  %4817 = vmatprep.mubr.msk.f32.mxu1 %vm6557_vm2, %v7782_v33 }
 0x127   : > { %5193 = vmatprep.mubr.f32.mxu0 %v7738_v43 }
 0x129   : > { %4818 = vmatmul.mubr.f32.gmra.mrb[28].mxu1 %v7783_v0 }
 0x12a   : > { %5194 = vmatmul.mubr.msk.f32.gmra.mrb[12].mxu0 %vm912_vm0, %v7740_v20  ;;  %4820 = vmatprep.mubr.msk.f32.mxu1 %vm6557_vm2, %v7784_v13 }
 0x12b   : > { %5196 = vmatprep.mubr.f32.mxu0 %v6563_v6  ;;  %v7790_v6 = vld [vmem:[#allocation35_spill] sm:$0xff] }
 0x12d   : > { %4821 = vmatmul.mubr.f32.gmra.mrb[30].mxu1 %v7785_v36 }
 0x12e   : > { %5197 = vmatmul.mubr.msk.f32.gmra.mrb[14].mxu0 %vm912_vm0, %v7786_v37  ;;  %4879 = vmatprep.mubr.f32.mxu1 %v6352_v51  ;;  %v965_v51 = vrot.slane %v7061_v19, 1 }
 0x12f   : > { %5199 = vmatprep.mubr.f32.mxu0 %v7787_v15 }
 0x131   : > { %4880 = vmatmul.mubr.f32.vlgmr.msra.gmra.mrb[16].mxu1 %v6372_v14  ;;  %v7791_v14 = vld [vmem:[#allocation50_spill] sm:$0xff] }
 0x132   : > { %5200 = vmatmul.mubr.msk.f32.gmra.mrb[16].mxu0 %vm912_vm0, %v7788_v16  ;;  %4882 = vmatprep.mubr.f32.mxu1 %v6386_v5 }
 0x133   : > { %5202 = vmatprep.mubr.f32.mxu0 %v7746_v44 }
 0x135   : > { %4883 = vmatmul.mubr.f32.gmra.mrb[18].mxu1 %v6403_v21  ;;  %v7792_v21 = vld [vmem:[#allocation47_spill] sm:$0xff] }
 0x136   : > { %5203 = vmatmul.mubr.msk.f32.gmra.mrb[18].mxu0 %vm912_vm0, %v7789_v10  ;;  %4885 = vmatprep.mubr.f32.mxu1 %v6416_v63 }
 0x137   : > { %5205 = vmatprep.mubr.f32.mxu0 %v7790_v6 }
 0x139   : > { %4886 = vmatmul.mubr.f32.gmra.mrb[20].mxu1 %v6435_v46  ;;  %v964_v46 = vrot.slane %v7059_v24, 1 }
 0x13a   : > { %5206 = vmatmul.mubr.msk.f32.gmra.mrb[20].mxu0 %vm912_vm0, %v7751_v28  ;;  %4888 = vmatprep.mubr.f32.mxu1 %v6448_v57 }
 0x13b   : > { %5208 = vmatprep.mubr.f32.mxu0 %v7753_v47  ;;  %v966_v5 = vsel %vm912_vm0, %v964_v46, %v965_v51 }
 0x13d   : > { %4889 = vmatmul.mubr.f32.gmra.mrb[22].mxu1 %v6467_v45 }
 0x13e   : > { %5209 = vmatmul.mubr.msk.f32.gmra.mrb[22].mxu0 %vm912_vm0, %v7755_v52  ;;  %4891 = vmatprep.mubr.f32.mxu1 %v6479_v22 }
 0x13f   : > { %5211 = vmatprep.mubr.f32.mxu0 %v7756_v59 }
 0x141   : > { %4892 = vmatmul.mubr.f32.gmra.mrb[24].mxu1 %v6492_v58 }
 0x142   : > { %5212 = vmatmul.mubr.msk.f32.gmra.mrb[24].mxu0 %vm912_vm0, %v7757_v26  ;;  %4894 = vmatprep.mubr.f32.mxu1 %v6504_v29 }
 0x143   : > { %5214 = vmatprep.mubr.f32.mxu0 %v6742_v35 }
 0x145   : > { %4895 = vmatmul.mubr.f32.gmra.mrb[26].mxu1 %v6517_v17 }
 0x146   : > { %5215 = vmatmul.mubr.msk.f32.gmra.mrb[26].mxu0 %vm912_vm0, %v7758_v25  ;;  %4897 = vmatprep.mubr.f32.mxu1 %v6529_v61 }
 0x147   : > { %5217 = vmatprep.mubr.f32.mxu0 %v7791_v14 }
 0x149   : > { %4898 = vmatmul.mubr.f32.gmra.mrb[28].mxu1 %v6542_v2 }
 0x14a   : > { %5218 = vmatmul.mubr.msk.f32.gmra.mrb[28].mxu0 %vm912_vm0, %v7792_v21  ;;  %4900 = vmatprep.mubr.f32.mxu1 %v6714_v30 }
 0x14b   : > { %5220 = vmatprep.mubr.f32.mxu0 %v966_v5 }
 0x14d   : > { %4901 = vmatmul.mubr.f32.gmra.mrb[30].mxu1 %v6717_v41 }
 0x14e   : > { %5221 = vmatmul.mubr.msk.f32.gmra.mrb[30].mxu0 %vm912_vm0, %v965_v51 }
 0x1c4   : > { %v4777_v17 = vpop.f32.mrb[0].mxu1 }
 0x1c5   : > { %v1861_v63 = vpop.f32.mrb[1].mxu1 }
 0x1c8   : > { %v4780_v58 = vpop.f32.mrb[2].mxu1 }
 0x1c9   : > { %v1871_v57 = vpop.f32.mrb[3].mxu1 }
 0x1cc   : > { %v4783_v45 = vpop.f32.mrb[4].mxu1 }
 0x1cd   : > { %v1881_v22 = vpop.f32.mrb[5].mxu1 }
 0x1d0   : > { %v4786_v29 = vpop.f32.mrb[6].mxu1 }
 0x1d1   : > { %v1891_v61 = vpop.f32.mrb[7].mxu1 }
 0x1d4   : > { %v4789_v2 = vpop.f32.mrb[8].mxu1 }
 0x1d5   : > { %v1901_v35 = vpop.f32.mrb[9].mxu1 }
 0x1d8   : > { %v4792_v55 = vpop.f32.mrb[10].mxu1 }
 0x1d9   : > { %v1911_v3 = vpop.f32.mrb[11].mxu1 }
 0x1dc   : > { %v4795_v11 = vpop.f32.mrb[12].mxu1 }
 0x1dd   : > { %v1921_v30 = vpop.f32.mrb[13].mxu1 }
 0x1e0   : > { %v4798_v18 = vpop.f32.mrb[14].mxu1 }
 0x1e1   : > { %v1931_v31 = vpop.f32.mrb[15].mxu1 }
 0x1e5   : > { %v5177_v41 = vpop.f32.mrb[0].mxu0 }
 0x1e6   : > { %v7341_v49 = vadd.f32 %v5177_v41, %v4777_v17  ;;  %v3231_v23 = vpop.f32.mrb[1].mxu0 }
 0x1e7   : > { %v7343_v9 = vadd.f32 %v3231_v23, %v1861_v63 }
 0x1e8   : > { %3423 = vst [vmem:[%s7339_s9 + $0x8] sm:$0xff] %v7341_v49 }
 0x1e9   : > { %3422 = vst [vmem:[%s7339_s9] sm:$0xff] %v7343_v9  ;;  %v5180_v7 = vpop.f32.mrb[2].mxu0  ;;  %v3460_v48 = vadd.f32 %v7343_v9, %v7341_v49 }
 0x1ea   : > { %v7349_v50 = vadd.f32 %v5180_v7, %v4780_v58  ;;  %v3241_v27 = vpop.f32.mrb[3].mxu0 }
 0x1eb   : > { %v7353_v54 = vadd.f32 %v3241_v27, %v1871_v57 }
 0x1ec   : > { %3425 = vst [vmem:[%s7339_s9 + $0x18] sm:$0xff] %v7349_v50 }
 0x1ed   : > { %3424 = vst [vmem:[%s7339_s9 + $0x10] sm:$0xff] %v7353_v54  ;;  %v3461_v32 = vadd.f32 %v7353_v54, %v3460_v48  ;;  %v5183_v24 = vpop.f32.mrb[4].mxu0 }
 0x1ee   : > { %v7360_v19 = vadd.f32 %v5183_v24, %v4783_v45  ;;  %v3251_v12 = vpop.f32.mrb[5].mxu0 }
 0x1ef   : > { %v7362_v39 = vadd.f32 %v3251_v12, %v1881_v22  ;;  %v3462_v43 = vadd.f32 %v7349_v50, %v3461_v32 }
 0x1f0   : > { %3427 = vst [vmem:[%s7339_s9 + $0x28] sm:$0xff] %v7360_v19 }
 0x1f1   : > { %3426 = vst [vmem:[%s7339_s9 + $0x20] sm:$0xff] %v7362_v39  ;;  %v3463_v20 = vadd.f32 %v7362_v39, %v3462_v43  ;;  %v5186_v44 = vpop.f32.mrb[6].mxu0 }
 0x1f2   : > { %v7370_v28 = vadd.f32 %v5186_v44, %v4786_v29  ;;  %v3261_v47 = vpop.f32.mrb[7].mxu0 }
 0x1f3   : > { %v7372_v52 = vadd.f32 %v3261_v47, %v1891_v61  ;;  %v3464_v59 = vadd.f32 %v7360_v19, %v3463_v20 }
 0x1f4   : > { %3429 = vst [vmem:[%s7339_s9 + $0x38] sm:$0xff] %v7370_v28 }
 0x1f5   : > { %3428 = vst [vmem:[%s7339_s9 + $0x30] sm:$0xff] %v7372_v52  ;;  %v3465_v26 = vadd.f32 %v7372_v52, %v3464_v59  ;;  %v5189_v25 = vpop.f32.mrb[8].mxu0 }
 0x1f6   : > { %v7380_v8 = vadd.f32 %v5189_v25, %v4789_v2  ;;  %v3271_v34 = vpop.f32.mrb[9].mxu0 }
 0x1f7   : > { %v7382_v38 = vadd.f32 %v3271_v34, %v1901_v35  ;;  %v3466_v4 = vadd.f32 %v7370_v28, %v3465_v26 }
 0x1f8   : > { %3431 = vst [vmem:[%s7339_s9 + $0x48] sm:$0xff] %v7380_v8 }
 0x1f9   : > { %3430 = vst [vmem:[%s7339_s9 + $0x40] sm:$0xff] %v7382_v38  ;;  %v3467_v56 = vadd.f32 %v7382_v38, %v3466_v4  ;;  %v5192_v60 = vpop.f32.mrb[10].mxu0 }
 0x1fa   : > { %v7390_v40 = vadd.f32 %v5192_v60, %v4792_v55  ;;  %v3281_v62 = vpop.f32.mrb[11].mxu0 }
 0x1fb   : > { %v7392_v42 = vadd.f32 %v3281_v62, %v1911_v3  ;;  %v3468_v53 = vadd.f32 %v7380_v8, %v3467_v56 }
 0x1fc   : > { %3433 = vst [vmem:[%s7339_s9 + $0x58] sm:$0xff] %v7390_v40 }
 0x1fd   : > { %3432 = vst [vmem:[%s7339_s9 + $0x50] sm:$0xff] %v7392_v42  ;;  %v3469_v1 = vadd.f32 %v7392_v42, %v3468_v53  ;;  %v5195_v33 = vpop.f32.mrb[12].mxu0 }
 0x1fe   : > { %v7400_v0 = vadd.f32 %v5195_v33, %v4795_v11  ;;  %v3291_v13 = vpop.f32.mrb[13].mxu0 }
 0x1ff   : > { %v7402_v36 = vadd.f32 %v3291_v13, %v1921_v30  ;;  %v3470_v37 = vadd.f32 %v7390_v40, %v3469_v1 }
 0x200   : > { %3435 = vst [vmem:[%s7339_s9 + $0x68] sm:$0xff] %v7400_v0 }
 0x201   : > { %3434 = vst [vmem:[%s7339_s9 + $0x60] sm:$0xff] %v7402_v36  ;;  %v3471_v15 = vadd.f32 %v7402_v36, %v3470_v37  ;;  %v5198_v16 = vpop.f32.mrb[14].mxu0 }
 0x202   : > { %v7410_v10 = vadd.f32 %v5198_v16, %v4798_v18  ;;  %v3301_v6 = vpop.f32.mrb[15].mxu0 }
 0x203   : > { %v7412_v46 = vadd.f32 %v3301_v6, %v1931_v31  ;;  %v3472_v51 = vadd.f32 %v7400_v0, %v3471_v15 }
 0x204   : > { %3437 = vst [vmem:[%s7339_s9 + $0x78] sm:$0xff] %v7410_v10  ;;  %v4881_v14 = vpop.f32.mrb[16].mxu1 }
 0x205   : > { %3436 = vst [vmem:[%s7339_s9 + $0x70] sm:$0xff] %v7412_v46  ;;  %v3473_v5 = vadd.f32 %v7412_v46, %v3472_v51  ;;  %v5201_v21 = vpop.f32.mrb[16].mxu0  ;;  %v2215_v17 = vpop.f32.mrb[17].mxu1 }
 0x206   : > { %v7420_v63 = vadd.f32 %v5201_v21, %v4881_v14  ;;  %v3311_v58 = vpop.f32.mrb[17].mxu0 }
 0x207   : > { %v7422_v57 = vadd.f32 %v3311_v58, %v2215_v17  ;;  %v3474_v45 = vadd.f32 %v7410_v10, %v3473_v5 }
 0x208   : > { %3439 = vst [vmem:[%s7339_s9 + $0x88] sm:$0xff] %v7420_v63  ;;  %v4884_v22 = vpop.f32.mrb[18].mxu1 }
 0x209   : > { %3438 = vst [vmem:[%s7339_s9 + $0x80] sm:$0xff] %v7422_v57  ;;  %v3475_v29 = vadd.f32 %v7422_v57, %v3474_v45  ;;  %v5204_v61 = vpop.f32.mrb[18].mxu0  ;;  %v2225_v2 = vpop.f32.mrb[19].mxu1 }
 0x20a   : > { %v7430_v35 = vadd.f32 %v5204_v61, %v4884_v22  ;;  %v3321_v55 = vpop.f32.mrb[19].mxu0 }
 0x20b   : > { %v7432_v3 = vadd.f32 %v3321_v55, %v2225_v2  ;;  %v3476_v11 = vadd.f32 %v7420_v63, %v3475_v29 }
 0x20c   : > { %3441 = vst [vmem:[%s7339_s9 + $0x98] sm:$0xff] %v7430_v35  ;;  %v4887_v30 = vpop.f32.mrb[20].mxu1 }
 0x20d   : > { %3440 = vst [vmem:[%s7339_s9 + $0x90] sm:$0xff] %v7432_v3  ;;  %v3477_v18 = vadd.f32 %v7432_v3, %v3476_v11  ;;  %v5207_v31 = vpop.f32.mrb[20].mxu0  ;;  %v2235_v41 = vpop.f32.mrb[21].mxu1 }
 0x20e   : > { %v7440_v23 = vadd.f32 %v5207_v31, %v4887_v30  ;;  %v3331_v7 = vpop.f32.mrb[21].mxu0 }
 0x20f   : > { %v7442_v27 = vadd.f32 %v3331_v7, %v2235_v41  ;;  %v3478_v48 = vadd.f32 %v7430_v35, %v3477_v18 }
 0x210   : > { %3443 = vst [vmem:[%s7339_s9 + $0xa8] sm:$0xff] %v7440_v23  ;;  %v4890_v32 = vpop.f32.mrb[22].mxu1 }
 0x211   : > { %3442 = vst [vmem:[%s7339_s9 + $0xa0] sm:$0xff] %v7442_v27  ;;  %v3479_v24 = vadd.f32 %v7442_v27, %v3478_v48  ;;  %v5210_v12 = vpop.f32.mrb[22].mxu0  ;;  %v2245_v43 = vpop.f32.mrb[23].mxu1 }
 0x212   : > { %v7450_v20 = vadd.f32 %v5210_v12, %v4890_v32  ;;  %v3341_v44 = vpop.f32.mrb[23].mxu0 }
 0x213   : > { %v7452_v47 = vadd.f32 %v3341_v44, %v2245_v43  ;;  %v3480_v59 = vadd.f32 %v7440_v23, %v3479_v24 }
 0x214   : > { %3445 = vst [vmem:[%s7339_s9 + $0xb8] sm:$0xff] %v7450_v20  ;;  %v4893_v26 = vpop.f32.mrb[24].mxu1 }
 0x215   : > { %3444 = vst [vmem:[%s7339_s9 + $0xb0] sm:$0xff] %v7452_v47  ;;  %v3481_v25 = vadd.f32 %v7452_v47, %v3480_v59  ;;  %v5213_v34 = vpop.f32.mrb[24].mxu0  ;;  %v2255_v4 = vpop.f32.mrb[25].mxu1 }
 0x216   : > { %v7460_v56 = vadd.f32 %v5213_v34, %v4893_v26  ;;  %v3351_v60 = vpop.f32.mrb[25].mxu0 }
 0x217   : > { %v7462_v62 = vadd.f32 %v3351_v60, %v2255_v4  ;;  %v3482_v53 = vadd.f32 %v7450_v20, %v3481_v25 }
 0x218   : > { %3447 = vst [vmem:[%s7339_s9 + $0xc8] sm:$0xff] %v7460_v56  ;;  %v4896_v1 = vpop.f32.mrb[26].mxu1 }
 0x219   : > { %3446 = vst [vmem:[%s7339_s9 + $0xc0] sm:$0xff] %v7462_v62  ;;  %v3483_v33 = vadd.f32 %v7462_v62, %v3482_v53  ;;  %v5216_v13 = vpop.f32.mrb[26].mxu0  ;;  %v2265_v37 = vpop.f32.mrb[27].mxu1 }
 0x21a   : > { %v7470_v15 = vadd.f32 %v5216_v13, %v4896_v1  ;;  %v3361_v16 = vpop.f32.mrb[27].mxu0 }
 0x21b   : > { %v7472_v6 = vadd.f32 %v3361_v16, %v2265_v37  ;;  %v3484_v51 = vadd.f32 %v7460_v56, %v3483_v33 }
 0x21c   : > { %3449 = vst [vmem:[%s7339_s9 + $0xd8] sm:$0xff] %v7470_v15  ;;  %v4899_v14 = vpop.f32.mrb[28].mxu1 }
 0x21d   : > { %3448 = vst [vmem:[%s7339_s9 + $0xd0] sm:$0xff] %v7472_v6  ;;  %v3485_v5 = vadd.f32 %v7472_v6, %v3484_v51  ;;  %v5219_v21 = vpop.f32.mrb[28].mxu0  ;;  %v2275_v17 = vpop.f32.mrb[29].mxu1 }
 0x21e   : > { %v7480_v58 = vadd.f32 %v5219_v21, %v4899_v14  ;;  %v3371_v45 = vpop.f32.mrb[29].mxu0 }
 0x21f   : > { %v7482_v22 = vadd.f32 %v3371_v45, %v2275_v17  ;;  %v3486_v29 = vadd.f32 %v7470_v15, %v3485_v5 }
 0x220   : > { %3451 = vst [vmem:[%s7339_s9 + $0xe8] sm:$0xff] %v7480_v58  ;;  %v4902_v61 = vpop.f32.mrb[30].mxu1 }
 0x221   : > { %3450 = vst [vmem:[%s7339_s9 + $0xe0] sm:$0xff] %v7482_v22  ;;  %v3487_v2 = vadd.f32 %v7482_v22, %v3486_v29  ;;  %v5222_v55 = vpop.f32.mrb[30].mxu0  ;;  %v2285_v11 = vpop.f32.mrb[31].mxu1 }
 0x222   : > { %v7490_v30 = vadd.f32 %v5222_v55, %v4902_v61  ;;  %v3381_v18 = vpop.f32.mrb[31].mxu0 }
 0x223   : > { %v7492_v31 = vadd.f32 %v3381_v18, %v2285_v11  ;;  %v3488_v41 = vadd.f32 %v7480_v58, %v3487_v2 }
 0x224   : > { %3453 = vst [vmem:[%s7339_s9 + $0xf8] sm:$0xff] %v7490_v30 }
 0x225   : > { %3452 = vst [vmem:[%s7339_s9 + $0xf0] sm:$0xff] %v7492_v31  ;;  %v3489_v7 = vadd.f32 %v7492_v31, %v3488_v41 }
 0x227   : > { %v3490_v48 = vadd.f32 %v7490_v30, %v3489_v7 }
 0x229   : > { %v3491_v32 = vrot.slane %v3490_v48, 4 }
 0x22b   : > { %v3492_v24 = vadd.f32 %v3491_v32, %v3490_v48 }
 0x22d   : > { %v3493_v12 = vrot.slane %v3492_v24, 2 }
 0x22f   : > { %v3494_v43 = vadd.f32 %v3493_v12, %v3492_v24 }
 0x231   : > { %v3495_v44 = vrot.slane %v3494_v43, 1 }
 0x233   : > { %v7501_v59 = vadd.f32 %v3495_v44, %v3494_v43 }
 0x235   : > { %v7504_v26 = vmul.f32 0.00390625, %v7501_v59 }
 0x237   : > { %v3500_v25 = vsub.f32 %v7343_v9, %v7504_v26  ;;  %v3501_v34 = vsub.f32 %v7341_v49, %v7504_v26  ;;  %v3502_v4 = vsub.f32 %v7353_v54, %v7504_v26  ;;  %v3503_v1 = vsub.f32 %v7349_v50, %v7504_v26 }
 0x238   : > { %v3504_v33 = vsub.f32 %v7362_v39, %v7504_v26  ;;  %v3505_v16 = vsub.f32 %v7360_v19, %v7504_v26  ;;  %v3506_v49 = vsub.f32 %v7372_v52, %v7504_v26  ;;  %v3507_v5 = vsub.f32 %v7370_v28, %v7504_v26 }
 0x239   : > { %v3532_v60 = vmul.f32 %v3500_v25, %v3500_v25  ;;  %v3533_v53 = vmul.f32 %v3501_v34, %v3501_v34  ;;  %v3534_v13 = vmul.f32 %v3502_v4, %v3502_v4  ;;  %v3535_v9 = vmul.f32 %v3503_v1, %v3503_v1 }
 0x23a   : > { %v3536_v14 = vmul.f32 %v3504_v33, %v3504_v33  ;;  %v3537_v21 = vmul.f32 %v3505_v16, %v3505_v16  ;;  %v3508_v39 = vsub.f32 %v7382_v38, %v7504_v26  ;;  %v3538_v17 = vmul.f32 %v3506_v49, %v3506_v49 }
 0x23b   : > { %v3564_v37 = vadd.f32 %v3533_v53, %v3532_v60  ;;  %v3509_v19 = vsub.f32 %v7380_v8, %v7504_v26  ;;  %v3539_v29 = vmul.f32 %v3507_v5, %v3507_v5  ;;  %v3510_v52 = vsub.f32 %v7392_v42, %v7504_v26 }
 0x23c   : > { %v3540_v2 = vmul.f32 %v3508_v39, %v3508_v39  ;;  %v3511_v28 = vsub.f32 %v7390_v40, %v7504_v26  ;;  %v3512_v38 = vsub.f32 %v7402_v36, %v7504_v26  ;;  %v3513_v8 = vsub.f32 %v7400_v0, %v7504_v26 }
 0x23d   : > { %v3565_v51 = vadd.f32 %v3564_v37, %v3534_v13  ;;  %v3541_v11 = vmul.f32 %v3509_v19, %v3509_v19  ;;  %v3542_v41 = vmul.f32 %v3510_v52, %v3510_v52  ;;  %v3514_v42 = vsub.f32 %v7412_v46, %v7504_v26 }
 0x23e   : > { %v3543_v48 = vmul.f32 %v3511_v28, %v3511_v28  ;;  %v3544_v24 = vmul.f32 %v3512_v38, %v3512_v38  ;;  %v3515_v40 = vsub.f32 %v7410_v10, %v7504_v26  ;;  %v3545_v43 = vmul.f32 %v3513_v8, %v3513_v8 }
 0x23f   : > { %v3566_v54 = vadd.f32 %v3565_v51, %v3535_v9  ;;  %v3516_v36 = vsub.f32 %v7422_v57, %v7504_v26  ;;  %v3546_v25 = vmul.f32 %v3514_v42, %v3514_v42  ;;  %v3517_v0 = vsub.f32 %v7420_v63, %v7504_v26 }
 0x240   : > { %v3547_v4 = vmul.f32 %v3515_v40, %v3515_v40  ;;  %v3518_v46 = vsub.f32 %v7432_v3, %v7504_v26  ;;  %v3519_v10 = vsub.f32 %v7430_v35, %v7504_v26  ;;  %v3520_v57 = vsub.f32 %v7442_v27, %v7504_v26 }
 0x241   : > { %v3567_v50 = vadd.f32 %v3566_v54, %v3536_v14  ;;  %v3548_v53 = vmul.f32 %v3516_v36, %v3516_v36  ;;  %v3549_v33 = vmul.f32 %v3517_v0, %v3517_v0  ;;  %v3521_v63 = vsub.f32 %v7440_v23, %v7504_v26 }
 0x242   : > { %v3550_v37 = vmul.f32 %v3518_v46, %v3518_v46  ;;  %v3551_v9 = vmul.f32 %v3519_v10, %v3519_v10  ;;  %v3522_v3 = vsub.f32 %v7452_v47, %v7504_v26  ;;  %v3552_v49 = vmul.f32 %v3520_v57, %v3520_v57 }
 0x243   : > { %v3568_v45 = vadd.f32 %v3567_v50, %v3537_v21  ;;  %v3523_v35 = vsub.f32 %v7450_v20, %v7504_v26  ;;  %v3553_v54 = vmul.f32 %v3521_v63, %v3521_v63  ;;  %v3524_v27 = vsub.f32 %v7462_v62, %v7504_v26 }
 0x244   : > { %v3554_v21 = vmul.f32 %v3522_v3, %v3522_v3  ;;  %v3525_v23 = vsub.f32 %v7460_v56, %v7504_v26  ;;  %v3526_v47 = vsub.f32 %v7472_v6, %v7504_v26  ;;  %v3527_v20 = vsub.f32 %v7470_v15, %v7504_v26 }
 0x245   : > { %v3569_v61 = vadd.f32 %v3568_v45, %v3538_v17  ;;  %v3555_v39 = vmul.f32 %v3523_v35, %v3523_v35  ;;  %v3556_v45 = vmul.f32 %v3524_v27, %v3524_v27  ;;  %v3528_v62 = vsub.f32 %v7482_v22, %v7504_v26 }
 0x246   : > { %v3558_v52 = vmul.f32 %v3526_v47, %v3526_v47  ;;  %v3529_v56 = vsub.f32 %v7480_v58, %v7504_v26  ;;  %v3530_v6 = vsub.f32 %v7492_v31, %v7504_v26  ;;  %v3531_v15 = vsub.f32 %v7490_v30, %v7504_v26 }
 0x247   : > { %v3570_v55 = vadd.f32 %v3569_v61, %v3539_v29  ;;  %v3557_v29 = vmul.f32 %v3525_v23, %v3525_v23 }
 0x248   : > { %v3561_v38 = vmul.f32 %v3529_v56, %v3529_v56  ;;  %v3563_v8 = vmul.f32 %v3531_v15, %v3531_v15 }
 0x249   : > { %v3571_v18 = vadd.f32 %v3570_v55, %v3540_v2  ;;  %v3559_v55 = vmul.f32 %v3527_v20, %v3527_v20 }
 0x24b   : > { %v3572_v7 = vadd.f32 %v3571_v18, %v3541_v11  ;;  %v3560_v11 = vmul.f32 %v3528_v62, %v3528_v62 }
 0x24d   : > { %v3573_v32 = vadd.f32 %v3572_v7, %v3542_v41  ;;  %v3562_v7 = vmul.f32 %v3530_v6, %v3530_v6 }
 0x24f   : > { %v3574_v12 = vadd.f32 %v3573_v32, %v3543_v48 }
 0x251   : > { %v3575_v44 = vadd.f32 %v3574_v12, %v3544_v24 }
 0x253   : > { %v3576_v34 = vadd.f32 %v3575_v44, %v3545_v43 }
 0x255   : > { %v3577_v60 = vadd.f32 %v3576_v34, %v3546_v25 }
 0x257   : > { %v3578_v1 = vadd.f32 %v3577_v60, %v3547_v4 }
 0x259   : > { %v3579_v13 = vadd.f32 %v3578_v1, %v3548_v53 }
 0x25b   : > { %v3580_v16 = vadd.f32 %v3579_v13, %v3549_v33 }
 0x25d   : > { %v3581_v51 = vadd.f32 %v3580_v16, %v3550_v37 }
 0x25f   : > { %v3582_v14 = vadd.f32 %v3581_v51, %v3551_v9 }
 0x261   : > { %v3583_v5 = vadd.f32 %v3582_v14, %v3552_v49 }
 0x263   : > { %v3584_v50 = vadd.f32 %v3583_v5, %v3553_v54 }
 0x265   : > { %v3585_v17 = vadd.f32 %v3584_v50, %v3554_v21 }
 0x267   : > { %v3586_v19 = vadd.f32 %v3585_v17, %v3555_v39 }
 0x269   : > { %v3587_v61 = vadd.f32 %v3586_v19, %v3556_v45 }
 0x26b   : > { %v3588_v2 = vadd.f32 %v3587_v61, %v3557_v29 }
 0x26d   : > { %v3589_v28 = vadd.f32 %v3588_v2, %v3558_v52 }
 0x26f   : > { %v3590_v18 = vadd.f32 %v3589_v28, %v3559_v55 }
 0x271   : > { %v3591_v41 = vadd.f32 %v3590_v18, %v3560_v11 }
 0x273   : > { %v3592_v22 = vadd.f32 %v3591_v41, %v3561_v38 }
 0x275   : > { %v3593_v48 = vadd.f32 %v3592_v22, %v3562_v7 }
 0x277   : > { %v3594_v32 = vadd.f32 %v3593_v48, %v3563_v8 }
 0x279   : > { %v3595_v42 = vrot.slane %v3594_v32, 4 }
 0x27b   : > { %v3596_v58 = vadd.f32 %v3595_v42, %v3594_v32 }
 0x27d   : > { %v3597_v24 = vrot.slane %v3596_v58, 2 }
 0x27f   : > { %v3598_v12 = vadd.f32 %v3597_v24, %v3596_v58 }
 0x281   : > { %v3599_v40 = vrot.slane %v3598_v12, 1 }
 0x283   : > { %v3600_v31 = vadd.f32 %v3599_v40, %v3598_v12 }
 0x285   : > { %v3601_v30 = vsel %vm803_vm1, %v7501_v59, %v3600_v31 }
 0x286   : > { %3602 = vst [vmem:[%s461_s13] sm:$0x3] %v3601_v30 }
 0x287 PF: > { %s18_s26 = sadd.s32 1, %s5829_s26   ;;  %s7793_s24 = smov %s5825_s25 }
 0x288   : > { %p15_p5 = scmp.ge.s32.totalorder %s18_s26, 4   ;;  %s7794_s25 = smov %s7796_s27 }
 0x28a   :  { %17 = sbr.rel (!%p15_p5) target bundleno = 2 (0x2), region = 100 }

</bundles_post_ra>
